<compile_context>
chip_gen: v7x
topology: tpu7x:2x2x1
jax: 0.10.0
libtpu: 0.0.40
codegen_flags: <defaults>
</compile_context>

<pallas_src>
import functools

import jax
import jax.numpy as jnp
import numpy as np
from jax import lax
from jax.experimental import pallas as pl
from jax.experimental.pallas import tpu as pltpu


def _round_up(n, m):
    return ((n + m - 1) // m) * m


def _pick_time_chunk(T, max_chunk=64, min_chunk=16):
    """Largest divisor of T in [min_chunk, max_chunk]; full T if none (or T small)."""
    if T <= max_chunk:
        return T
    for c in range(max_chunk, min_chunk - 1, -1):
        if T % c == 0:
            return c
    return T


# ----------------------------------------------------------------------------
# Fused kernel: [num_layers x LSTM] + final Linear, one invocation per batch block.
# ----------------------------------------------------------------------------
def _make_fused_kernel(num_layers, T, Tc, BB, D, HP, OP, unroll):
    G = 4 * HP
    n_chunks = T // Tc
    tc_pow2 = (Tc & (Tc - 1)) == 0

    def kernel(*refs):
        # inputs: x, (w_ih, w_hh, bias) per layer, fc_w, fc_b
        x_ref = refs[0]
        pos = 1
        layer_refs = []
        for _ in range(num_layers):
            layer_refs.append((refs[pos], refs[pos + 1], refs[pos + 2]))
            pos += 3
        fc_w_ref = refs[pos]
        fc_b_ref = refs[pos + 1]
        # outputs / scratch
        out_ref = refs[pos + 2]                                   # (BB, OP)
        xw_scr = refs[pos + 3]                                    # (Tc, BB, G)
        seq_scr = refs[pos + 4] if num_layers > 1 else None       # (T, BB, HP)

        def run_layer(l, wih_ref, whh_ref, b_ref):
            write_seq = (l + 1) < num_layers    # last layer: only final h is consumed

            def process_chunk(base, h, c):
                # ---- Phase A (per time chunk): hoisted input projection + bias for
                # Tc steps in one MXU matmul; the serial loop below has no bias add.
                if l == 0:
                    inp = x_ref[pl.ds(base, Tc)].reshape(Tc * BB, D)
                else:
                    inp = seq_scr[pl.ds(base, Tc)].reshape(Tc * BB, HP)
                xw_scr[...] = (
                    jnp.dot(inp, wih_ref[...], preferred_element_type=jnp.float32)
                    + b_ref[...]
                ).reshape(Tc, BB, G)

                # ---- Phase B: serial recurrence; only h @ W_hh on the critical path;
                # h/c stay in vregs (fori_loop carry), no VMEM traffic per step.
                # TODO(synk): pltpu.matmul_push_rhs/acc_lhs to keep W_hh staged in the
                # MXU across the time loop (skipped; staging constraints are per-chip).
                def step(t, carry):
                    h_t, c_t = carry
                    gates = xw_scr[t] + jnp.dot(
                        h_t, whh_ref[...], preferred_element_type=jnp.float32)
                    # HP is a multiple of 128 -> each gate slice is lane-aligned.
                    i_g = jax.nn.sigmoid(gates[:, 0 * HP:1 * HP])
                    f_g = jax.nn.sigmoid(gates[:, 1 * HP:2 * HP])
                    g_g = jnp.tanh(gates[:, 2 * HP:3 * HP])
                    o_g = jax.nn.sigmoid(gates[:, 3 * HP:4 * HP])
                    c_new = f_g * c_t + i_g * g_g
                    h_new = o_g * jnp.tanh(c_new)
                    if write_seq:
                        seq_scr[base + t] = h_new   # feeds next layer, VMEM only
                    return (h_new, c_new)

                return lax.fori_loop(0, Tc, step, (h, c), unroll=unroll)

            h0 = jnp.zeros((BB, HP), jnp.float32)
            c0 = jnp.zeros((BB, HP), jnp.float32)
            if n_chunks == 1:
                return process_chunk(0, h0, c0)

            def chunk_body(ci, carry):
                h, c = carry
                base = ci * Tc
                if tc_pow2:
                    base = pl.multiple_of(base, Tc)
                return process_chunk(base, h, c)

            return lax.fori_loop(0, n_chunks, chunk_body, (h0, c0))

        h_last = None
        for l, (wih_ref, whh_ref, b_ref) in enumerate(layer_refs):
            h_last, _ = run_layer(l, wih_ref, whh_ref, b_ref)

        # ---- Phase C: fused FC on the final hidden state (lane-dense (BB,OP) store).
        out_ref[...] = (
            jnp.dot(h_last, fc_w_ref[...], preferred_element_type=jnp.float32)
            + fc_b_ref[...]
        )

    return kernel


# ----------------------------------------------------------------------------
# Forward wrapper — mirrors StockPriceRegressor.forward (batch_first input).
# ----------------------------------------------------------------------------
@functools.partial(jax.jit, static_argnames=("out_size",))
def stock_price_regressor_forward(x_btd, lstm_params, fc_w, fc_b, *, out_size):
    """x_btd: (B, T, D) f32. lstm_params: tuple of (w_ih(Din,4HP), w_hh(HP,4HP), b(1,4HP)).
    fc_w: (HP, OP), fc_b: (1, OP). Returns (B, out_size)."""
    B, T, D = x_btd.shape
    num_layers = len(lstm_params)
    HP, OP = fc_w.shape
    G = 4 * HP

    # Batch block: as many rows as available share each W_hh push, capped at 128.
    BB = min(128, _round_up(B, 8))
    B_pad = _round_up(B, BB)

    # Time chunk for the hoisted input projection (bounds xw scratch VMEM).
    Tc = _pick_time_chunk(T)
    unroll = 1
    for u in (8, 4, 2):
        if Tc % u == 0:
            unroll = u
            break

    # Pad batch to a BB multiple and go time-major (single fused XLA copy).
    x_p = jnp.pad(x_btd, ((0, B_pad - B), (0, 0), (0, 0)))
    x_tm = jnp.transpose(x_p, (1, 0, 2))    # (T, B_pad, D)

    in_specs = [pl.BlockSpec((T, BB, D), lambda b: (0, b, 0))]
    flat_inputs = [x_tm]
    for (w_ih, w_hh, bias) in lstm_params:
        d_in = w_ih.shape[0]
        in_specs += [
            pl.BlockSpec((d_in, G), lambda b: (0, 0)),
            pl.BlockSpec((HP, G), lambda b: (0, 0)),
            pl.BlockSpec((1, G), lambda b: (0, 0)),
        ]
        flat_inputs += [w_ih, w_hh, bias]
    in_specs += [pl.BlockSpec((HP, OP), lambda b: (0, 0)),
                 pl.BlockSpec((1, OP), lambda b: (0, 0))]
    flat_inputs += [fc_w, fc_b]

    scratch_shapes = [pltpu.VMEM((Tc, BB, G), jnp.float32)]          # chunked x@W_ih+b
    if num_layers > 1:
        scratch_shapes.append(pltpu.VMEM((T, BB, HP), jnp.float32))  # inter-layer h seq

    # Explicit VMEM budget: scratch + double-buffered inputs/outputs + headroom.
    weight_elems = sum(int(np.prod(w.shape)) for p in lstm_params for w in p)
    weight_elems += int(np.prod(fc_w.shape)) + int(np.prod(fc_b.shape))
    block_elems = T * BB * D + BB * OP
    scratch_elems = Tc * BB * G + (T * BB * HP if num_layers > 1 else 0)
    need = 4 * (2 * (weight_elems + block_elems) + scratch_elems)
    vmem_limit = int(min(128 << 20, max(need + (4 << 20), 32 << 20)))

    out_p = pl.pallas_call(
        _make_fused_kernel(num_layers, T, Tc, BB, D, HP, OP, unroll),
        out_shape=jax.ShapeDtypeStruct((B_pad, OP), jnp.float32),
        grid_spec=pltpu.PrefetchScalarGridSpec(
            num_scalar_prefetch=0,
            grid=(B_pad // BB,),            # independent batch blocks
            in_specs=in_specs,
            out_specs=pl.BlockSpec((BB, OP), lambda b: (b, 0)),
            scratch_shapes=scratch_shapes,
        ),
        compiler_params=pltpu.CompilerParams(
            dimension_semantics=("parallel",),   # batch blocks independent
            vmem_limit_bytes=vmem_limit,
        ),
    )(*flat_inputs)

    return out_p[:B, :out_size]


# ----------------------------------------------------------------------------
# Parameter init (PyTorch-style uniform(-1/sqrt(H), 1/sqrt(H))) + kernel packing.
# ----------------------------------------------------------------------------
def init_params(key, input_size, hidden_size, num_layers, output_size):
    stdv = 1.0 / np.sqrt(hidden_size)
    raw = {"lstm": [], "fc": None}
    for layer in range(num_layers):
        d_in = input_size if layer == 0 else hidden_size
        key, k1, k2, k3, k4 = jax.random.split(key, 5)
        w_ih = jax.random.uniform(k1, (4 * hidden_size, d_in), jnp.float32, -stdv, stdv)
        w_hh = jax.random.uniform(k2, (4 * hidden_size, hidden_size), jnp.float32, -stdv, stdv)
        b_ih = jax.random.uniform(k3, (4 * hidden_size,), jnp.float32, -stdv, stdv)
        b_hh = jax.random.uniform(k4, (4 * hidden_size,), jnp.float32, -stdv, stdv)
        raw["lstm"].append((w_ih, w_hh, b_ih, b_hh))
    key, k5, k6 = jax.random.split(key, 3)
    fc_w = jax.random.uniform(k5, (output_size, hidden_size), jnp.float32, -stdv, stdv)
    fc_b = jax.random.uniform(k6, (output_size,), jnp.float32, -stdv, stdv)
    raw["fc"] = (fc_w, fc_b)
    return raw


def pack_params(raw, hidden_size, output_size):
    """Transpose to x@W convention, fold the two biases, and pad every gate block /
    the FC weights to 128-lane boundaries (zero padding is exactly neutral)."""
    H = hidden_size
    HP = _round_up(H, 128)
    O = output_size
    OP = _round_up(O, 128)
    G = 4 * HP
    lstm = []
    for layer, (w_ih, w_hh, b_ih, b_hh) in enumerate(raw["lstm"]):
        d_in = w_ih.shape[1]
        d_in_p = d_in if layer == 0 else HP
        wih_t = w_ih.T                       # (d_in, 4H)
        whh_t = w_hh.T                       # (H, 4H)
        bias = (b_ih + b_hh).reshape(1, -1)  # (1, 4H)
        wih_p = jnp.zeros((d_in_p, G), jnp.float32)
        whh_p = jnp.zeros((HP, G), jnp.float32)
        b_p = jnp.zeros((1, G), jnp.float32)
        for k in range(4):                   # PyTorch gate order [i, f, g, o]
            wih_p = wih_p.at[:d_in, k * HP:k * HP + H].set(wih_t[:, k * H:(k + 1) * H])
            whh_p = whh_p.at[:H, k * HP:k * HP + H].set(whh_t[:, k * H:(k + 1) * H])
            b_p = b_p.at[:, k * HP:k * HP + H].set(bias[:, k * H:(k + 1) * H])
        lstm.append((wih_p, whh_p, b_p))
    fc_w, fc_b = raw["fc"]                   # (O, H), (O,)
    fcw_p = jnp.zeros((HP, OP), jnp.float32).at[:H, :O].set(fc_w.T)
    fcb_p = jnp.zeros((1, OP), jnp.float32).at[:, :O].set(fc_b.reshape(1, -1))
    return tuple(lstm), fcw_p, fcb_p


# ----------------------------------------------------------------------------
# Pure-JAX reference (lax.scan LSTM, unpadded) for correctness check.
# ----------------------------------------------------------------------------
def reference_forward(x_btd, raw):
    h_seq = jnp.transpose(x_btd, (1, 0, 2))
    for (w_ih, w_hh, b_ih, b_hh) in raw["lstm"]:
        H = w_hh.shape[1]
        B = h_seq.shape[1]
        wih_t, whh_t = w_ih.T, w_hh.T
        bias = (b_ih + b_hh).reshape(1, -1)

        def step(carry, x_t):
            h, c = carry
            gates = x_t @ wih_t + h @ whh_t + bias
            i = jax.nn.sigmoid(gates[:, :H])
            f = jax.nn.sigmoid(gates[:, H:2 * H])
            g = jnp.tanh(gates[:, 2 * H:3 * H])
            o = jax.nn.sigmoid(gates[:, 3 * H:])
            c = f * c + i * g
            h = o * jnp.tanh(c)
            return (h, c), h

        init = (jnp.zeros((B, H), jnp.float32), jnp.zeros((B, H), jnp.float32))
        _, hs = lax.scan(step, init, h_seq)
        h_seq = hs
    fc_w, fc_b = raw["fc"]
    return h_seq[-1] @ fc_w.T + fc_b


if __name__ == "__main__":
    # Small shapes consistent with the module's forward.
    batch, seq_len = 2, 8
    input_size, hidden_size, num_layers, output_size = 4, 32, 2, 1

    key = jax.random.PRNGKey(0)
    key, pk, xk = jax.random.split(key, 3)
    raw = init_params(pk, input_size, hidden_size, num_layers, output_size)
    x = jax.random.normal(xk, (batch, seq_len, input_size), jnp.float32)

    lstm_p, fcw_p, fcb_p = pack_params(raw, hidden_size, output_size)
    out = stock_price_regressor_forward(x, lstm_p, fcw_p, fcb_p, out_size=output_size)
    out = jax.block_until_ready(out)

    ref = reference_forward(x, raw)
    np.testing.assert_allclose(np.asarray(out), np.asarray(ref), atol=1e-5, rtol=1e-5)
    assert out.shape == (batch, output_size)

    print("KERNEL_OK")
</pallas_src>

<mosaic_0001>
module attributes {stable_mosaic.version = 11 : i64} {
  func.func @kernel(%arg0: i32, %arg1: memref<8x8x4xf32, #tpu.memory_space<vmem>>, %arg2: memref<4x512xf32, #tpu.memory_space<vmem>>, %arg3: memref<128x512xf32, #tpu.memory_space<vmem>>, %arg4: memref<1x512xf32, #tpu.memory_space<vmem>>, %arg5: memref<128x512xf32, #tpu.memory_space<vmem>>, %arg6: memref<128x512xf32, #tpu.memory_space<vmem>>, %arg7: memref<1x512xf32, #tpu.memory_space<vmem>>, %arg8: memref<128x128xf32, #tpu.memory_space<vmem>>, %arg9: memref<1x128xf32, #tpu.memory_space<vmem>>, %arg10: memref<8x128xf32, #tpu.memory_space<vmem>>, %arg11: memref<8x8x512xf32, #tpu.memory_space<vmem>>, %arg12: memref<8x8x128xf32, #tpu.memory_space<vmem>>) attributes {dimension_semantics = [#tpu.dimension_semantics<parallel>], iteration_bounds = array<i64: 1>, scalar_prefetch = 0 : i64, scratch_operands = 2 : i64, tpu.core_type = #tpu.core_type<tc>, window_params = [{transform_indices = @transform_0, window_bounds = array<i64: 8, 8, 4>}, {pipeline_mode = #tpu.pipeline_mode<synchronous>, transform_indices = @transform_1, window_bounds = array<i64: 4, 512>}, {pipeline_mode = #tpu.pipeline_mode<synchronous>, transform_indices = @transform_2, window_bounds = array<i64: 128, 512>}, {pipeline_mode = #tpu.pipeline_mode<synchronous>, transform_indices = @transform_3, window_bounds = array<i64: 1, 512>}, {pipeline_mode = #tpu.pipeline_mode<synchronous>, transform_indices = @transform_4, window_bounds = array<i64: 128, 512>}, {pipeline_mode = #tpu.pipeline_mode<synchronous>, transform_indices = @transform_5, window_bounds = array<i64: 128, 512>}, {pipeline_mode = #tpu.pipeline_mode<synchronous>, transform_indices = @transform_6, window_bounds = array<i64: 1, 512>}, {pipeline_mode = #tpu.pipeline_mode<synchronous>, transform_indices = @transform_7, window_bounds = array<i64: 128, 128>}, {pipeline_mode = #tpu.pipeline_mode<synchronous>, transform_indices = @transform_8, window_bounds = array<i64: 1, 128>}, {transform_indices = @transform_9, window_bounds = array<i64: 8, 128>}]} {
    %cst = arith.constant 0.000000e+00 : f32
    %0 = vector.broadcast %cst : f32 to vector<8x128xf32>
    %cst_0 = arith.constant 0.000000e+00 : f32
    %1 = vector.broadcast %cst_0 : f32 to vector<8x128xf32>
    %c0 = arith.constant 0 : index
    %c0_1 = arith.constant 0 : index
    %c0_2 = arith.constant 0 : index
    %2 = vector.load %arg1[%c0, %c0_1, %c0_2] : memref<8x8x4xf32, #tpu.memory_space<vmem>>, vector<8x8x4xf32>
    %3 = vector.shape_cast %2 : vector<8x8x4xf32> to vector<64x4xf32>
    %c0_3 = arith.constant 0 : index
    %c0_4 = arith.constant 0 : index
    %4 = vector.load %arg2[%c0_3, %c0_4] : memref<4x512xf32, #tpu.memory_space<vmem>>, vector<4x512xf32>
    %cst_5 = arith.constant dense<0.000000e+00> : vector<64x512xf32>
    %5 = tpu.matmul %3, %4, %cst_5 {dimension_numbers = #tpu.dot_dimension_numbers<[1], [0], [0], [1], [0, 0, 1, 1], [], []>} : vector<64x4xf32>, vector<4x512xf32>, vector<64x512xf32> -> vector<64x512xf32>
    %c0_6 = arith.constant 0 : index
    %c0_7 = arith.constant 0 : index
    %6 = vector.load %arg4[%c0_6, %c0_7] : memref<1x512xf32, #tpu.memory_space<vmem>>, vector<1x512xf32>
    %7 = vector.broadcast %6 : vector<1x512xf32> to vector<64x512xf32>
    %8 = arith.addf %5, %7 : vector<64x512xf32>
    %9 = vector.shape_cast %8 : vector<64x512xf32> to vector<8x8x512xf32>
    %c0_8 = arith.constant 0 : index
    %c0_9 = arith.constant 0 : index
    %c0_10 = arith.constant 0 : index
    %10 = vector.load %arg11[%c0_8, %c0_9, %c0_10] : memref<8x8x512xf32, #tpu.memory_space<vmem>>, vector<8x8x512xf32>
    tpu.vector_store %arg11[%c0_8, %c0_9, %c0_10], %9 {strides = array<i32>} : memref<8x8x512xf32, #tpu.memory_space<vmem>>, vector<8x8x512xf32>,
    %c0_i32 = arith.constant 0 : i32
    %11 = arith.index_cast %c0_i32 : i32 to index
    %c0_11 = arith.constant 0 : index
    %c0_12 = arith.constant 0 : index
    %12 = vector.load %arg11[%11, %c0_11, %c0_12] : memref<8x8x512xf32, #tpu.memory_space<vmem>>, vector<1x8x512xf32>
    %13 = vector.shape_cast %12 : vector<1x8x512xf32> to vector<8x512xf32>
    %c0_13 = arith.constant 0 : index
    %c0_14 = arith.constant 0 : index
    %14 = vector.load %arg3[%c0_13, %c0_14] : memref<128x512xf32, #tpu.memory_space<vmem>>, vector<128x512xf32>
    %cst_15 = arith.constant dense<0.000000e+00> : vector<8x512xf32>
    %15 = tpu.matmul %0, %14, %cst_15 {dimension_numbers = #tpu.dot_dimension_numbers<[1], [0], [0], [1], [0, 0, 1, 1], [], []>} : vector<8x128xf32>, vector<128x512xf32>, vector<8x512xf32> -> vector<8x512xf32>
    %16 = arith.addf %13, %15 : vector<8x512xf32>
    %17 = vector.extract_strided_slice %16 {offsets = [0, 0], sizes = [8, 128], strides = [1, 1]} : vector<8x512xf32> to vector<8x128xf32>
    %18 = arith.negf %17 : vector<8x128xf32>
    %19 = math.exp %18 : vector<8x128xf32>
    %cst_16 = arith.constant 1.000000e+00 : f32
    %20 = vector.broadcast %cst_16 : f32 to vector<8x128xf32>
    %21 = arith.addf %20, %19 : vector<8x128xf32>
    %22 = arith.divf %20, %21 : vector<8x128xf32>
    %23 = vector.extract_strided_slice %16 {offsets = [0, 128], sizes = [8, 128], strides = [1, 1]} : vector<8x512xf32> to vector<8x128xf32>
    %24 = arith.negf %23 : vector<8x128xf32>
    %25 = math.exp %24 : vector<8x128xf32>
    %cst_17 = arith.constant 1.000000e+00 : f32
    %26 = vector.broadcast %cst_17 : f32 to vector<8x128xf32>
    %27 = arith.addf %26, %25 : vector<8x128xf32>
    %28 = arith.divf %26, %27 : vector<8x128xf32>
    %29 = vector.extract_strided_slice %16 {offsets = [0, 256], sizes = [8, 128], strides = [1, 1]} : vector<8x512xf32> to vector<8x128xf32>
    %30 = math.tanh %29 : vector<8x128xf32>
    %31 = vector.extract_strided_slice %16 {offsets = [0, 384], sizes = [8, 128], strides = [1, 1]} : vector<8x512xf32> to vector<8x128xf32>
    %32 = arith.negf %31 : vector<8x128xf32>
    %33 = math.exp %32 : vector<8x128xf32>
    %cst_18 = arith.constant 1.000000e+00 : f32
    %34 = vector.broadcast %cst_18 : f32 to vector<8x128xf32>
    %35 = arith.addf %34, %33 : vector<8x128xf32>
    %36 = arith.divf %34, %35 : vector<8x128xf32>
    %37 = arith.mulf %28, %1 : vector<8x128xf32>
    %38 = arith.mulf %22, %30 : vector<8x128xf32>
    %39 = arith.addf %37, %38 : vector<8x128xf32>
    %40 = math.tanh %39 : vector<8x128xf32>
    %41 = arith.mulf %36, %40 : vector<8x128xf32>
    %c0_i32_19 = arith.constant 0 : i32
    %42 = arith.addi %c0_i32_19, %c0_i32 : i32
    %43 = arith.index_cast %42 : i32 to index
    %c0_20 = arith.constant 0 : index
    %c0_21 = arith.constant 0 : index
    %44 = vector.load %arg12[%43, %c0_20, %c0_21] : memref<8x8x128xf32, #tpu.memory_space<vmem>>, vector<1x8x128xf32>
    %45 = vector.shape_cast %44 : vector<1x8x128xf32> to vector<8x128xf32>
    %46 = vector.shape_cast %41 : vector<8x128xf32> to vector<1x8x128xf32>
    tpu.vector_store %arg12[%43, %c0_20, %c0_21], %46 {strides = array<i32>} : memref<8x8x128xf32, #tpu.memory_space<vmem>>, vector<1x8x128xf32>,
    %c1_i32 = arith.constant 1 : i32
    %47 = arith.index_cast %c1_i32 : i32 to index
    %c0_22 = arith.constant 0 : index
    %c0_23 = arith.constant 0 : index
    %48 = vector.load %arg11[%47, %c0_22, %c0_23] : memref<8x8x512xf32, #tpu.memory_space<vmem>>, vector<1x8x512xf32>
    %49 = vector.shape_cast %48 : vector<1x8x512xf32> to vector<8x512xf32>
    %c0_24 = arith.constant 0 : index
    %c0_25 = arith.constant 0 : index
    %50 = vector.load %arg3[%c0_24, %c0_25] : memref<128x512xf32, #tpu.memory_space<vmem>>, vector<128x512xf32>
    %cst_26 = arith.constant dense<0.000000e+00> : vector<8x512xf32>
    %51 = tpu.matmul %41, %50, %cst_26 {dimension_numbers = #tpu.dot_dimension_numbers<[1], [0], [0], [1], [0, 0, 1, 1], [], []>} : vector<8x128xf32>, vector<128x512xf32>, vector<8x512xf32> -> vector<8x512xf32>
    %52 = arith.addf %49, %51 : vector<8x512xf32>
    %53 = vector.extract_strided_slice %52 {offsets = [0, 0], sizes = [8, 128], strides = [1, 1]} : vector<8x512xf32> to vector<8x128xf32>
    %54 = arith.negf %53 : vector<8x128xf32>
    %55 = math.exp %54 : vector<8x128xf32>
    %cst_27 = arith.constant 1.000000e+00 : f32
    %56 = vector.broadcast %cst_27 : f32 to vector<8x128xf32>
    %57 = arith.addf %56, %55 : vector<8x128xf32>
    %58 = arith.divf %56, %57 : vector<8x128xf32>
    %59 = vector.extract_strided_slice %52 {offsets = [0, 128], sizes = [8, 128], strides = [1, 1]} : vector<8x512xf32> to vector<8x128xf32>
    %60 = arith.negf %59 : vector<8x128xf32>
    %61 = math.exp %60 : vector<8x128xf32>
    %cst_28 = arith.constant 1.000000e+00 : f32
    %62 = vector.broadcast %cst_28 : f32 to vector<8x128xf32>
    %63 = arith.addf %62, %61 : vector<8x128xf32>
    %64 = arith.divf %62, %63 : vector<8x128xf32>
    %65 = vector.extract_strided_slice %52 {offsets = [0, 256], sizes = [8, 128], strides = [1, 1]} : vector<8x512xf32> to vector<8x128xf32>
    %66 = math.tanh %65 : vector<8x128xf32>
    %67 = vector.extract_strided_slice %52 {offsets = [0, 384], sizes = [8, 128], strides = [1, 1]} : vector<8x512xf32> to vector<8x128xf32>
    %68 = arith.negf %67 : vector<8x128xf32>
    %69 = math.exp %68 : vector<8x128xf32>
    %cst_29 = arith.constant 1.000000e+00 : f32
    %70 = vector.broadcast %cst_29 : f32 to vector<8x128xf32>
    %71 = arith.addf %70, %69 : vector<8x128xf32>
    %72 = arith.divf %70, %71 : vector<8x128xf32>
    %73 = arith.mulf %64, %39 : vector<8x128xf32>
    %74 = arith.mulf %58, %66 : vector<8x128xf32>
    %75 = arith.addf %73, %74 : vector<8x128xf32>
    %76 = math.tanh %75 : vector<8x128xf32>
    %77 = arith.mulf %72, %76 : vector<8x128xf32>
    %c0_i32_30 = arith.constant 0 : i32
    %78 = arith.addi %c0_i32_30, %c1_i32 : i32
    %79 = arith.index_cast %78 : i32 to index
    %c0_31 = arith.constant 0 : index
    %c0_32 = arith.constant 0 : index
    %80 = vector.load %arg12[%79, %c0_31, %c0_32] : memref<8x8x128xf32, #tpu.memory_space<vmem>>, vector<1x8x128xf32>
    %81 = vector.shape_cast %80 : vector<1x8x128xf32> to vector<8x128xf32>
    %82 = vector.shape_cast %77 : vector<8x128xf32> to vector<1x8x128xf32>
    tpu.vector_store %arg12[%79, %c0_31, %c0_32], %82 {strides = array<i32>} : memref<8x8x128xf32, #tpu.memory_space<vmem>>, vector<1x8x128xf32>,
    %c2_i32 = arith.constant 2 : i32
    %83 = arith.index_cast %c2_i32 : i32 to index
    %c0_33 = arith.constant 0 : index
    %c0_34 = arith.constant 0 : index
    %84 = vector.load %arg11[%83, %c0_33, %c0_34] : memref<8x8x512xf32, #tpu.memory_space<vmem>>, vector<1x8x512xf32>
    %85 = vector.shape_cast %84 : vector<1x8x512xf32> to vector<8x512xf32>
    %c0_35 = arith.constant 0 : index
    %c0_36 = arith.constant 0 : index
    %86 = vector.load %arg3[%c0_35, %c0_36] : memref<128x512xf32, #tpu.memory_space<vmem>>, vector<128x512xf32>
    %cst_37 = arith.constant dense<0.000000e+00> : vector<8x512xf32>
    %87 = tpu.matmul %77, %86, %cst_37 {dimension_numbers = #tpu.dot_dimension_numbers<[1], [0], [0], [1], [0, 0, 1, 1], [], []>} : vector<8x128xf32>, vector<128x512xf32>, vector<8x512xf32> -> vector<8x512xf32>
    %88 = arith.addf %85, %87 : vector<8x512xf32>
    %89 = vector.extract_strided_slice %88 {offsets = [0, 0], sizes = [8, 128], strides = [1, 1]} : vector<8x512xf32> to vector<8x128xf32>
    %90 = arith.negf %89 : vector<8x128xf32>
    %91 = math.exp %90 : vector<8x128xf32>
    %cst_38 = arith.constant 1.000000e+00 : f32
    %92 = vector.broadcast %cst_38 : f32 to vector<8x128xf32>
    %93 = arith.addf %92, %91 : vector<8x128xf32>
    %94 = arith.divf %92, %93 : vector<8x128xf32>
    %95 = vector.extract_strided_slice %88 {offsets = [0, 128], sizes = [8, 128], strides = [1, 1]} : vector<8x512xf32> to vector<8x128xf32>
    %96 = arith.negf %95 : vector<8x128xf32>
    %97 = math.exp %96 : vector<8x128xf32>
    %cst_39 = arith.constant 1.000000e+00 : f32
    %98 = vector.broadcast %cst_39 : f32 to vector<8x128xf32>
    %99 = arith.addf %98, %97 : vector<8x128xf32>
    %100 = arith.divf %98, %99 : vector<8x128xf32>
    %101 = vector.extract_strided_slice %88 {offsets = [0, 256], sizes = [8, 128], strides = [1, 1]} : vector<8x512xf32> to vector<8x128xf32>
    %102 = math.tanh %101 : vector<8x128xf32>
    %103 = vector.extract_strided_slice %88 {offsets = [0, 384], sizes = [8, 128], strides = [1, 1]} : vector<8x512xf32> to vector<8x128xf32>
    %104 = arith.negf %103 : vector<8x128xf32>
    %105 = math.exp %104 : vector<8x128xf32>
    %cst_40 = arith.constant 1.000000e+00 : f32
    %106 = vector.broadcast %cst_40 : f32 to vector<8x128xf32>
    %107 = arith.addf %106, %105 : vector<8x128xf32>
    %108 = arith.divf %106, %107 : vector<8x128xf32>
    %109 = arith.mulf %100, %75 : vector<8x128xf32>
    %110 = arith.mulf %94, %102 : vector<8x128xf32>
    %111 = arith.addf %109, %110 : vector<8x128xf32>
    %112 = math.tanh %111 : vector<8x128xf32>
    %113 = arith.mulf %108, %112 : vector<8x128xf32>
    %c0_i32_41 = arith.constant 0 : i32
    %114 = arith.addi %c0_i32_41, %c2_i32 : i32
    %115 = arith.index_cast %114 : i32 to index
    %c0_42 = arith.constant 0 : index
    %c0_43 = arith.constant 0 : index
    %116 = vector.load %arg12[%115, %c0_42, %c0_43] : memref<8x8x128xf32, #tpu.memory_space<vmem>>, vector<1x8x128xf32>
    %117 = vector.shape_cast %116 : vector<1x8x128xf32> to vector<8x128xf32>
    %118 = vector.shape_cast %113 : vector<8x128xf32> to vector<1x8x128xf32>
    tpu.vector_store %arg12[%115, %c0_42, %c0_43], %118 {strides = array<i32>} : memref<8x8x128xf32, #tpu.memory_space<vmem>>, vector<1x8x128xf32>,
    %c3_i32 = arith.constant 3 : i32
    %119 = arith.index_cast %c3_i32 : i32 to index
    %c0_44 = arith.constant 0 : index
    %c0_45 = arith.constant 0 : index
    %120 = vector.load %arg11[%119, %c0_44, %c0_45] : memref<8x8x512xf32, #tpu.memory_space<vmem>>, vector<1x8x512xf32>
    %121 = vector.shape_cast %120 : vector<1x8x512xf32> to vector<8x512xf32>
    %c0_46 = arith.constant 0 : index
    %c0_47 = arith.constant 0 : index
    %122 = vector.load %arg3[%c0_46, %c0_47] : memref<128x512xf32, #tpu.memory_space<vmem>>, vector<128x512xf32>
    %cst_48 = arith.constant dense<0.000000e+00> : vector<8x512xf32>
    %123 = tpu.matmul %113, %122, %cst_48 {dimension_numbers = #tpu.dot_dimension_numbers<[1], [0], [0], [1], [0, 0, 1, 1], [], []>} : vector<8x128xf32>, vector<128x512xf32>, vector<8x512xf32> -> vector<8x512xf32>
    %124 = arith.addf %121, %123 : vector<8x512xf32>
    %125 = vector.extract_strided_slice %124 {offsets = [0, 0], sizes = [8, 128], strides = [1, 1]} : vector<8x512xf32> to vector<8x128xf32>
    %126 = arith.negf %125 : vector<8x128xf32>
    %127 = math.exp %126 : vector<8x128xf32>
    %cst_49 = arith.constant 1.000000e+00 : f32
    %128 = vector.broadcast %cst_49 : f32 to vector<8x128xf32>
    %129 = arith.addf %128, %127 : vector<8x128xf32>
    %130 = arith.divf %128, %129 : vector<8x128xf32>
    %131 = vector.extract_strided_slice %124 {offsets = [0, 128], sizes = [8, 128], strides = [1, 1]} : vector<8x512xf32> to vector<8x128xf32>
    %132 = arith.negf %131 : vector<8x128xf32>
    %133 = math.exp %132 : vector<8x128xf32>
    %cst_50 = arith.constant 1.000000e+00 : f32
    %134 = vector.broadcast %cst_50 : f32 to vector<8x128xf32>
    %135 = arith.addf %134, %133 : vector<8x128xf32>
    %136 = arith.divf %134, %135 : vector<8x128xf32>
    %137 = vector.extract_strided_slice %124 {offsets = [0, 256], sizes = [8, 128], strides = [1, 1]} : vector<8x512xf32> to vector<8x128xf32>
    %138 = math.tanh %137 : vector<8x128xf32>
    %139 = vector.extract_strided_slice %124 {offsets = [0, 384], sizes = [8, 128], strides = [1, 1]} : vector<8x512xf32> to vector<8x128xf32>
    %140 = arith.negf %139 : vector<8x128xf32>
    %141 = math.exp %140 : vector<8x128xf32>
    %cst_51 = arith.constant 1.000000e+00 : f32
    %142 = vector.broadcast %cst_51 : f32 to vector<8x128xf32>
    %143 = arith.addf %142, %141 : vector<8x128xf32>
    %144 = arith.divf %142, %143 : vector<8x128xf32>
    %145 = arith.mulf %136, %111 : vector<8x128xf32>
    %146 = arith.mulf %130, %138 : vector<8x128xf32>
    %147 = arith.addf %145, %146 : vector<8x128xf32>
    %148 = math.tanh %147 : vector<8x128xf32>
    %149 = arith.mulf %144, %148 : vector<8x128xf32>
    %c0_i32_52 = arith.constant 0 : i32
    %150 = arith.addi %c0_i32_52, %c3_i32 : i32
    %151 = arith.index_cast %150 : i32 to index
    %c0_53 = arith.constant 0 : index
    %c0_54 = arith.constant 0 : index
    %152 = vector.load %arg12[%151, %c0_53, %c0_54] : memref<8x8x128xf32, #tpu.memory_space<vmem>>, vector<1x8x128xf32>
    %153 = vector.shape_cast %152 : vector<1x8x128xf32> to vector<8x128xf32>
    %154 = vector.shape_cast %149 : vector<8x128xf32> to vector<1x8x128xf32>
    tpu.vector_store %arg12[%151, %c0_53, %c0_54], %154 {strides = array<i32>} : memref<8x8x128xf32, #tpu.memory_space<vmem>>, vector<1x8x128xf32>,
    %c4_i32 = arith.constant 4 : i32
    %155 = arith.index_cast %c4_i32 : i32 to index
    %c0_55 = arith.constant 0 : index
    %c0_56 = arith.constant 0 : index
    %156 = vector.load %arg11[%155, %c0_55, %c0_56] : memref<8x8x512xf32, #tpu.memory_space<vmem>>, vector<1x8x512xf32>
    %157 = vector.shape_cast %156 : vector<1x8x512xf32> to vector<8x512xf32>
    %c0_57 = arith.constant 0 : index
    %c0_58 = arith.constant 0 : index
    %158 = vector.load %arg3[%c0_57, %c0_58] : memref<128x512xf32, #tpu.memory_space<vmem>>, vector<128x512xf32>
    %cst_59 = arith.constant dense<0.000000e+00> : vector<8x512xf32>
    %159 = tpu.matmul %149, %158, %cst_59 {dimension_numbers = #tpu.dot_dimension_numbers<[1], [0], [0], [1], [0, 0, 1, 1], [], []>} : vector<8x128xf32>, vector<128x512xf32>, vector<8x512xf32> -> vector<8x512xf32>
    %160 = arith.addf %157, %159 : vector<8x512xf32>
    %161 = vector.extract_strided_slice %160 {offsets = [0, 0], sizes = [8, 128], strides = [1, 1]} : vector<8x512xf32> to vector<8x128xf32>
    %162 = arith.negf %161 : vector<8x128xf32>
    %163 = math.exp %162 : vector<8x128xf32>
    %cst_60 = arith.constant 1.000000e+00 : f32
    %164 = vector.broadcast %cst_60 : f32 to vector<8x128xf32>
    %165 = arith.addf %164, %163 : vector<8x128xf32>
    %166 = arith.divf %164, %165 : vector<8x128xf32>
    %167 = vector.extract_strided_slice %160 {offsets = [0, 128], sizes = [8, 128], strides = [1, 1]} : vector<8x512xf32> to vector<8x128xf32>
    %168 = arith.negf %167 : vector<8x128xf32>
    %169 = math.exp %168 : vector<8x128xf32>
    %cst_61 = arith.constant 1.000000e+00 : f32
    %170 = vector.broadcast %cst_61 : f32 to vector<8x128xf32>
    %171 = arith.addf %170, %169 : vector<8x128xf32>
    %172 = arith.divf %170, %171 : vector<8x128xf32>
    %173 = vector.extract_strided_slice %160 {offsets = [0, 256], sizes = [8, 128], strides = [1, 1]} : vector<8x512xf32> to vector<8x128xf32>
    %174 = math.tanh %173 : vector<8x128xf32>
    %175 = vector.extract_strided_slice %160 {offsets = [0, 384], sizes = [8, 128], strides = [1, 1]} : vector<8x512xf32> to vector<8x128xf32>
    %176 = arith.negf %175 : vector<8x128xf32>
    %177 = math.exp %176 : vector<8x128xf32>
    %cst_62 = arith.constant 1.000000e+00 : f32
    %178 = vector.broadcast %cst_62 : f32 to vector<8x128xf32>
    %179 = arith.addf %178, %177 : vector<8x128xf32>
    %180 = arith.divf %178, %179 : vector<8x128xf32>
    %181 = arith.mulf %172, %147 : vector<8x128xf32>
    %182 = arith.mulf %166, %174 : vector<8x128xf32>
    %183 = arith.addf %181, %182 : vector<8x128xf32>
    %184 = math.tanh %183 : vector<8x128xf32>
    %185 = arith.mulf %180, %184 : vector<8x128xf32>
    %c0_i32_63 = arith.constant 0 : i32
    %186 = arith.addi %c0_i32_63, %c4_i32 : i32
    %187 = arith.index_cast %186 : i32 to index
    %c0_64 = arith.constant 0 : index
    %c0_65 = arith.constant 0 : index
    %188 = vector.load %arg12[%187, %c0_64, %c0_65] : memref<8x8x128xf32, #tpu.memory_space<vmem>>, vector<1x8x128xf32>
    %189 = vector.shape_cast %188 : vector<1x8x128xf32> to vector<8x128xf32>
    %190 = vector.shape_cast %185 : vector<8x128xf32> to vector<1x8x128xf32>
    tpu.vector_store %arg12[%187, %c0_64, %c0_65], %190 {strides = array<i32>} : memref<8x8x128xf32, #tpu.memory_space<vmem>>, vector<1x8x128xf32>,
    %c5_i32 = arith.constant 5 : i32
    %191 = arith.index_cast %c5_i32 : i32 to index
    %c0_66 = arith.constant 0 : index
    %c0_67 = arith.constant 0 : index
    %192 = vector.load %arg11[%191, %c0_66, %c0_67] : memref<8x8x512xf32, #tpu.memory_space<vmem>>, vector<1x8x512xf32>
    %193 = vector.shape_cast %192 : vector<1x8x512xf32> to vector<8x512xf32>
    %c0_68 = arith.constant 0 : index
    %c0_69 = arith.constant 0 : index
    %194 = vector.load %arg3[%c0_68, %c0_69] : memref<128x512xf32, #tpu.memory_space<vmem>>, vector<128x512xf32>
    %cst_70 = arith.constant dense<0.000000e+00> : vector<8x512xf32>
    %195 = tpu.matmul %185, %194, %cst_70 {dimension_numbers = #tpu.dot_dimension_numbers<[1], [0], [0], [1], [0, 0, 1, 1], [], []>} : vector<8x128xf32>, vector<128x512xf32>, vector<8x512xf32> -> vector<8x512xf32>
    %196 = arith.addf %193, %195 : vector<8x512xf32>
    %197 = vector.extract_strided_slice %196 {offsets = [0, 0], sizes = [8, 128], strides = [1, 1]} : vector<8x512xf32> to vector<8x128xf32>
    %198 = arith.negf %197 : vector<8x128xf32>
    %199 = math.exp %198 : vector<8x128xf32>
    %cst_71 = arith.constant 1.000000e+00 : f32
    %200 = vector.broadcast %cst_71 : f32 to vector<8x128xf32>
    %201 = arith.addf %200, %199 : vector<8x128xf32>
    %202 = arith.divf %200, %201 : vector<8x128xf32>
    %203 = vector.extract_strided_slice %196 {offsets = [0, 128], sizes = [8, 128], strides = [1, 1]} : vector<8x512xf32> to vector<8x128xf32>
    %204 = arith.negf %203 : vector<8x128xf32>
    %205 = math.exp %204 : vector<8x128xf32>
    %cst_72 = arith.constant 1.000000e+00 : f32
    %206 = vector.broadcast %cst_72 : f32 to vector<8x128xf32>
    %207 = arith.addf %206, %205 : vector<8x128xf32>
    %208 = arith.divf %206, %207 : vector<8x128xf32>
    %209 = vector.extract_strided_slice %196 {offsets = [0, 256], sizes = [8, 128], strides = [1, 1]} : vector<8x512xf32> to vector<8x128xf32>
    %210 = math.tanh %209 : vector<8x128xf32>
    %211 = vector.extract_strided_slice %196 {offsets = [0, 384], sizes = [8, 128], strides = [1, 1]} : vector<8x512xf32> to vector<8x128xf32>
    %212 = arith.negf %211 : vector<8x128xf32>
    %213 = math.exp %212 : vector<8x128xf32>
    %cst_73 = arith.constant 1.000000e+00 : f32
    %214 = vector.broadcast %cst_73 : f32 to vector<8x128xf32>
    %215 = arith.addf %214, %213 : vector<8x128xf32>
    %216 = arith.divf %214, %215 : vector<8x128xf32>
    %217 = arith.mulf %208, %183 : vector<8x128xf32>
    %218 = arith.mulf %202, %210 : vector<8x128xf32>
    %219 = arith.addf %217, %218 : vector<8x128xf32>
    %220 = math.tanh %219 : vector<8x128xf32>
    %221 = arith.mulf %216, %220 : vector<8x128xf32>
    %c0_i32_74 = arith.constant 0 : i32
    %222 = arith.addi %c0_i32_74, %c5_i32 : i32
    %223 = arith.index_cast %222 : i32 to index
    %c0_75 = arith.constant 0 : index
    %c0_76 = arith.constant 0 : index
    %224 = vector.load %arg12[%223, %c0_75, %c0_76] : memref<8x8x128xf32, #tpu.memory_space<vmem>>, vector<1x8x128xf32>
    %225 = vector.shape_cast %224 : vector<1x8x128xf32> to vector<8x128xf32>
    %226 = vector.shape_cast %221 : vector<8x128xf32> to vector<1x8x128xf32>
    tpu.vector_store %arg12[%223, %c0_75, %c0_76], %226 {strides = array<i32>} : memref<8x8x128xf32, #tpu.memory_space<vmem>>, vector<1x8x128xf32>,
    %c6_i32 = arith.constant 6 : i32
    %227 = arith.index_cast %c6_i32 : i32 to index
    %c0_77 = arith.constant 0 : index
    %c0_78 = arith.constant 0 : index
    %228 = vector.load %arg11[%227, %c0_77, %c0_78] : memref<8x8x512xf32, #tpu.memory_space<vmem>>, vector<1x8x512xf32>
    %229 = vector.shape_cast %228 : vector<1x8x512xf32> to vector<8x512xf32>
    %c0_79 = arith.constant 0 : index
    %c0_80 = arith.constant 0 : index
    %230 = vector.load %arg3[%c0_79, %c0_80] : memref<128x512xf32, #tpu.memory_space<vmem>>, vector<128x512xf32>
    %cst_81 = arith.constant dense<0.000000e+00> : vector<8x512xf32>
    %231 = tpu.matmul %221, %230, %cst_81 {dimension_numbers = #tpu.dot_dimension_numbers<[1], [0], [0], [1], [0, 0, 1, 1], [], []>} : vector<8x128xf32>, vector<128x512xf32>, vector<8x512xf32> -> vector<8x512xf32>
    %232 = arith.addf %229, %231 : vector<8x512xf32>
    %233 = vector.extract_strided_slice %232 {offsets = [0, 0], sizes = [8, 128], strides = [1, 1]} : vector<8x512xf32> to vector<8x128xf32>
    %234 = arith.negf %233 : vector<8x128xf32>
    %235 = math.exp %234 : vector<8x128xf32>
    %cst_82 = arith.constant 1.000000e+00 : f32
    %236 = vector.broadcast %cst_82 : f32 to vector<8x128xf32>
    %237 = arith.addf %236, %235 : vector<8x128xf32>
    %238 = arith.divf %236, %237 : vector<8x128xf32>
    %239 = vector.extract_strided_slice %232 {offsets = [0, 128], sizes = [8, 128], strides = [1, 1]} : vector<8x512xf32> to vector<8x128xf32>
    %240 = arith.negf %239 : vector<8x128xf32>
    %241 = math.exp %240 : vector<8x128xf32>
    %cst_83 = arith.constant 1.000000e+00 : f32
    %242 = vector.broadcast %cst_83 : f32 to vector<8x128xf32>
    %243 = arith.addf %242, %241 : vector<8x128xf32>
    %244 = arith.divf %242, %243 : vector<8x128xf32>
    %245 = vector.extract_strided_slice %232 {offsets = [0, 256], sizes = [8, 128], strides = [1, 1]} : vector<8x512xf32> to vector<8x128xf32>
    %246 = math.tanh %245 : vector<8x128xf32>
    %247 = vector.extract_strided_slice %232 {offsets = [0, 384], sizes = [8, 128], strides = [1, 1]} : vector<8x512xf32> to vector<8x128xf32>
    %248 = arith.negf %247 : vector<8x128xf32>
    %249 = math.exp %248 : vector<8x128xf32>
    %cst_84 = arith.constant 1.000000e+00 : f32
    %250 = vector.broadcast %cst_84 : f32 to vector<8x128xf32>
    %251 = arith.addf %250, %249 : vector<8x128xf32>
    %252 = arith.divf %250, %251 : vector<8x128xf32>
    %253 = arith.mulf %244, %219 : vector<8x128xf32>
    %254 = arith.mulf %238, %246 : vector<8x128xf32>
    %255 = arith.addf %253, %254 : vector<8x128xf32>
    %256 = math.tanh %255 : vector<8x128xf32>
    %257 = arith.mulf %252, %256 : vector<8x128xf32>
    %c0_i32_85 = arith.constant 0 : i32
    %258 = arith.addi %c0_i32_85, %c6_i32 : i32
    %259 = arith.index_cast %258 : i32 to index
    %c0_86 = arith.constant 0 : index
    %c0_87 = arith.constant 0 : index
    %260 = vector.load %arg12[%259, %c0_86, %c0_87] : memref<8x8x128xf32, #tpu.memory_space<vmem>>, vector<1x8x128xf32>
    %261 = vector.shape_cast %260 : vector<1x8x128xf32> to vector<8x128xf32>
    %262 = vector.shape_cast %257 : vector<8x128xf32> to vector<1x8x128xf32>
    tpu.vector_store %arg12[%259, %c0_86, %c0_87], %262 {strides = array<i32>} : memref<8x8x128xf32, #tpu.memory_space<vmem>>, vector<1x8x128xf32>,
    %c7_i32 = arith.constant 7 : i32
    %263 = arith.index_cast %c7_i32 : i32 to index
    %c0_88 = arith.constant 0 : index
    %c0_89 = arith.constant 0 : index
    %264 = vector.load %arg11[%263, %c0_88, %c0_89] : memref<8x8x512xf32, #tpu.memory_space<vmem>>, vector<1x8x512xf32>
    %265 = vector.shape_cast %264 : vector<1x8x512xf32> to vector<8x512xf32>
    %c0_90 = arith.constant 0 : index
    %c0_91 = arith.constant 0 : index
    %266 = vector.load %arg3[%c0_90, %c0_91] : memref<128x512xf32, #tpu.memory_space<vmem>>, vector<128x512xf32>
    %cst_92 = arith.constant dense<0.000000e+00> : vector<8x512xf32>
    %267 = tpu.matmul %257, %266, %cst_92 {dimension_numbers = #tpu.dot_dimension_numbers<[1], [0], [0], [1], [0, 0, 1, 1], [], []>} : vector<8x128xf32>, vector<128x512xf32>, vector<8x512xf32> -> vector<8x512xf32>
    %268 = arith.addf %265, %267 : vector<8x512xf32>
    %269 = vector.extract_strided_slice %268 {offsets = [0, 0], sizes = [8, 128], strides = [1, 1]} : vector<8x512xf32> to vector<8x128xf32>
    %270 = arith.negf %269 : vector<8x128xf32>
    %271 = math.exp %270 : vector<8x128xf32>
    %cst_93 = arith.constant 1.000000e+00 : f32
    %272 = vector.broadcast %cst_93 : f32 to vector<8x128xf32>
    %273 = arith.addf %272, %271 : vector<8x128xf32>
    %274 = arith.divf %272, %273 : vector<8x128xf32>
    %275 = vector.extract_strided_slice %268 {offsets = [0, 128], sizes = [8, 128], strides = [1, 1]} : vector<8x512xf32> to vector<8x128xf32>
    %276 = arith.negf %275 : vector<8x128xf32>
    %277 = math.exp %276 : vector<8x128xf32>
    %cst_94 = arith.constant 1.000000e+00 : f32
    %278 = vector.broadcast %cst_94 : f32 to vector<8x128xf32>
    %279 = arith.addf %278, %277 : vector<8x128xf32>
    %280 = arith.divf %278, %279 : vector<8x128xf32>
    %281 = vector.extract_strided_slice %268 {offsets = [0, 256], sizes = [8, 128], strides = [1, 1]} : vector<8x512xf32> to vector<8x128xf32>
    %282 = math.tanh %281 : vector<8x128xf32>
    %283 = vector.extract_strided_slice %268 {offsets = [0, 384], sizes = [8, 128], strides = [1, 1]} : vector<8x512xf32> to vector<8x128xf32>
    %284 = arith.negf %283 : vector<8x128xf32>
    %285 = math.exp %284 : vector<8x128xf32>
    %cst_95 = arith.constant 1.000000e+00 : f32
    %286 = vector.broadcast %cst_95 : f32 to vector<8x128xf32>
    %287 = arith.addf %286, %285 : vector<8x128xf32>
    %288 = arith.divf %286, %287 : vector<8x128xf32>
    %289 = arith.mulf %280, %255 : vector<8x128xf32>
    %290 = arith.mulf %274, %282 : vector<8x128xf32>
    %291 = arith.addf %289, %290 : vector<8x128xf32>
    %292 = math.tanh %291 : vector<8x128xf32>
    %293 = arith.mulf %288, %292 : vector<8x128xf32>
    %c0_i32_96 = arith.constant 0 : i32
    %294 = arith.addi %c0_i32_96, %c7_i32 : i32
    %295 = arith.index_cast %294 : i32 to index
    %c0_97 = arith.constant 0 : index
    %c0_98 = arith.constant 0 : index
    %296 = vector.load %arg12[%295, %c0_97, %c0_98] : memref<8x8x128xf32, #tpu.memory_space<vmem>>, vector<1x8x128xf32>
    %297 = vector.shape_cast %296 : vector<1x8x128xf32> to vector<8x128xf32>
    %298 = vector.shape_cast %293 : vector<8x128xf32> to vector<1x8x128xf32>
    tpu.vector_store %arg12[%295, %c0_97, %c0_98], %298 {strides = array<i32>} : memref<8x8x128xf32, #tpu.memory_space<vmem>>, vector<1x8x128xf32>,
    %c8_i32 = arith.constant 8 : i32
    %cst_99 = arith.constant 0.000000e+00 : f32
    %299 = vector.broadcast %cst_99 : f32 to vector<8x128xf32>
    %cst_100 = arith.constant 0.000000e+00 : f32
    %300 = vector.broadcast %cst_100 : f32 to vector<8x128xf32>
    %c0_101 = arith.constant 0 : index
    %c0_102 = arith.constant 0 : index
    %c0_103 = arith.constant 0 : index
    %301 = vector.load %arg12[%c0_101, %c0_102, %c0_103] : memref<8x8x128xf32, #tpu.memory_space<vmem>>, vector<8x8x128xf32>
    %302 = vector.shape_cast %301 : vector<8x8x128xf32> to vector<64x128xf32>
    %c0_104 = arith.constant 0 : index
    %c0_105 = arith.constant 0 : index
    %303 = vector.load %arg5[%c0_104, %c0_105] : memref<128x512xf32, #tpu.memory_space<vmem>>, vector<128x512xf32>
    %cst_106 = arith.constant dense<0.000000e+00> : vector<64x512xf32>
    %304 = tpu.matmul %302, %303, %cst_106 {dimension_numbers = #tpu.dot_dimension_numbers<[1], [0], [0], [1], [0, 0, 1, 1], [], []>} : vector<64x128xf32>, vector<128x512xf32>, vector<64x512xf32> -> vector<64x512xf32>
    %c0_107 = arith.constant 0 : index
    %c0_108 = arith.constant 0 : index
    %305 = vector.load %arg7[%c0_107, %c0_108] : memref<1x512xf32, #tpu.memory_space<vmem>>, vector<1x512xf32>
    %306 = vector.broadcast %305 : vector<1x512xf32> to vector<64x512xf32>
    %307 = arith.addf %304, %306 : vector<64x512xf32>
    %308 = vector.shape_cast %307 : vector<64x512xf32> to vector<8x8x512xf32>
    %c0_109 = arith.constant 0 : index
    %c0_110 = arith.constant 0 : index
    %c0_111 = arith.constant 0 : index
    %309 = vector.load %arg11[%c0_109, %c0_110, %c0_111] : memref<8x8x512xf32, #tpu.memory_space<vmem>>, vector<8x8x512xf32>
    tpu.vector_store %arg11[%c0_109, %c0_110, %c0_111], %308 {strides = array<i32>} : memref<8x8x512xf32, #tpu.memory_space<vmem>>, vector<8x8x512xf32>,
    %c0_i32_112 = arith.constant 0 : i32
    %310 = arith.index_cast %c0_i32_112 : i32 to index
    %c0_113 = arith.constant 0 : index
    %c0_114 = arith.constant 0 : index
    %311 = vector.load %arg11[%310, %c0_113, %c0_114] : memref<8x8x512xf32, #tpu.memory_space<vmem>>, vector<1x8x512xf32>
    %312 = vector.shape_cast %311 : vector<1x8x512xf32> to vector<8x512xf32>
    %c0_115 = arith.constant 0 : index
    %c0_116 = arith.constant 0 : index
    %313 = vector.load %arg6[%c0_115, %c0_116] : memref<128x512xf32, #tpu.memory_space<vmem>>, vector<128x512xf32>
    %cst_117 = arith.constant dense<0.000000e+00> : vector<8x512xf32>
    %314 = tpu.matmul %299, %313, %cst_117 {dimension_numbers = #tpu.dot_dimension_numbers<[1], [0], [0], [1], [0, 0, 1, 1], [], []>} : vector<8x128xf32>, vector<128x512xf32>, vector<8x512xf32> -> vector<8x512xf32>
    %315 = arith.addf %312, %314 : vector<8x512xf32>
    %316 = vector.extract_strided_slice %315 {offsets = [0, 0], sizes = [8, 128], strides = [1, 1]} : vector<8x512xf32> to vector<8x128xf32>
    %317 = arith.negf %316 : vector<8x128xf32>
    %318 = math.exp %317 : vector<8x128xf32>
    %cst_118 = arith.constant 1.000000e+00 : f32
    %319 = vector.broadcast %cst_118 : f32 to vector<8x128xf32>
    %320 = arith.addf %319, %318 : vector<8x128xf32>
    %321 = arith.divf %319, %320 : vector<8x128xf32>
    %322 = vector.extract_strided_slice %315 {offsets = [0, 128], sizes = [8, 128], strides = [1, 1]} : vector<8x512xf32> to vector<8x128xf32>
    %323 = arith.negf %322 : vector<8x128xf32>
    %324 = math.exp %323 : vector<8x128xf32>
    %cst_119 = arith.constant 1.000000e+00 : f32
    %325 = vector.broadcast %cst_119 : f32 to vector<8x128xf32>
    %326 = arith.addf %325, %324 : vector<8x128xf32>
    %327 = arith.divf %325, %326 : vector<8x128xf32>
    %328 = vector.extract_strided_slice %315 {offsets = [0, 256], sizes = [8, 128], strides = [1, 1]} : vector<8x512xf32> to vector<8x128xf32>
    %329 = math.tanh %328 : vector<8x128xf32>
    %330 = vector.extract_strided_slice %315 {offsets = [0, 384], sizes = [8, 128], strides = [1, 1]} : vector<8x512xf32> to vector<8x128xf32>
    %331 = arith.negf %330 : vector<8x128xf32>
    %332 = math.exp %331 : vector<8x128xf32>
    %cst_120 = arith.constant 1.000000e+00 : f32
    %333 = vector.broadcast %cst_120 : f32 to vector<8x128xf32>
    %334 = arith.addf %333, %332 : vector<8x128xf32>
    %335 = arith.divf %333, %334 : vector<8x128xf32>
    %336 = arith.mulf %327, %300 : vector<8x128xf32>
    %337 = arith.mulf %321, %329 : vector<8x128xf32>
    %338 = arith.addf %336, %337 : vector<8x128xf32>
    %339 = math.tanh %338 : vector<8x128xf32>
    %340 = arith.mulf %335, %339 : vector<8x128xf32>
    %c1_i32_121 = arith.constant 1 : i32
    %341 = arith.index_cast %c1_i32_121 : i32 to index
    %c0_122 = arith.constant 0 : index
    %c0_123 = arith.constant 0 : index
    %342 = vector.load %arg11[%341, %c0_122, %c0_123] : memref<8x8x512xf32, #tpu.memory_space<vmem>>, vector<1x8x512xf32>
    %343 = vector.shape_cast %342 : vector<1x8x512xf32> to vector<8x512xf32>
    %c0_124 = arith.constant 0 : index
    %c0_125 = arith.constant 0 : index
    %344 = vector.load %arg6[%c0_124, %c0_125] : memref<128x512xf32, #tpu.memory_space<vmem>>, vector<128x512xf32>
    %cst_126 = arith.constant dense<0.000000e+00> : vector<8x512xf32>
    %345 = tpu.matmul %340, %344, %cst_126 {dimension_numbers = #tpu.dot_dimension_numbers<[1], [0], [0], [1], [0, 0, 1, 1], [], []>} : vector<8x128xf32>, vector<128x512xf32>, vector<8x512xf32> -> vector<8x512xf32>
    %346 = arith.addf %343, %345 : vector<8x512xf32>
    %347 = vector.extract_strided_slice %346 {offsets = [0, 0], sizes = [8, 128], strides = [1, 1]} : vector<8x512xf32> to vector<8x128xf32>
    %348 = arith.negf %347 : vector<8x128xf32>
    %349 = math.exp %348 : vector<8x128xf32>
    %cst_127 = arith.constant 1.000000e+00 : f32
    %350 = vector.broadcast %cst_127 : f32 to vector<8x128xf32>
    %351 = arith.addf %350, %349 : vector<8x128xf32>
    %352 = arith.divf %350, %351 : vector<8x128xf32>
    %353 = vector.extract_strided_slice %346 {offsets = [0, 128], sizes = [8, 128], strides = [1, 1]} : vector<8x512xf32> to vector<8x128xf32>
    %354 = arith.negf %353 : vector<8x128xf32>
    %355 = math.exp %354 : vector<8x128xf32>
    %cst_128 = arith.constant 1.000000e+00 : f32
    %356 = vector.broadcast %cst_128 : f32 to vector<8x128xf32>
    %357 = arith.addf %356, %355 : vector<8x128xf32>
    %358 = arith.divf %356, %357 : vector<8x128xf32>
    %359 = vector.extract_strided_slice %346 {offsets = [0, 256], sizes = [8, 128], strides = [1, 1]} : vector<8x512xf32> to vector<8x128xf32>
    %360 = math.tanh %359 : vector<8x128xf32>
    %361 = vector.extract_strided_slice %346 {offsets = [0, 384], sizes = [8, 128], strides = [1, 1]} : vector<8x512xf32> to vector<8x128xf32>
    %362 = arith.negf %361 : vector<8x128xf32>
    %363 = math.exp %362 : vector<8x128xf32>
    %cst_129 = arith.constant 1.000000e+00 : f32
    %364 = vector.broadcast %cst_129 : f32 to vector<8x128xf32>
    %365 = arith.addf %364, %363 : vector<8x128xf32>
    %366 = arith.divf %364, %365 : vector<8x128xf32>
    %367 = arith.mulf %358, %338 : vector<8x128xf32>
    %368 = arith.mulf %352, %360 : vector<8x128xf32>
    %369 = arith.addf %367, %368 : vector<8x128xf32>
    %370 = math.tanh %369 : vector<8x128xf32>
    %371 = arith.mulf %366, %370 : vector<8x128xf32>
    %c2_i32_130 = arith.constant 2 : i32
    %372 = arith.index_cast %c2_i32_130 : i32 to index
    %c0_131 = arith.constant 0 : index
    %c0_132 = arith.constant 0 : index
    %373 = vector.load %arg11[%372, %c0_131, %c0_132] : memref<8x8x512xf32, #tpu.memory_space<vmem>>, vector<1x8x512xf32>
    %374 = vector.shape_cast %373 : vector<1x8x512xf32> to vector<8x512xf32>
    %c0_133 = arith.constant 0 : index
    %c0_134 = arith.constant 0 : index
    %375 = vector.load %arg6[%c0_133, %c0_134] : memref<128x512xf32, #tpu.memory_space<vmem>>, vector<128x512xf32>
    %cst_135 = arith.constant dense<0.000000e+00> : vector<8x512xf32>
    %376 = tpu.matmul %371, %375, %cst_135 {dimension_numbers = #tpu.dot_dimension_numbers<[1], [0], [0], [1], [0, 0, 1, 1], [], []>} : vector<8x128xf32>, vector<128x512xf32>, vector<8x512xf32> -> vector<8x512xf32>
    %377 = arith.addf %374, %376 : vector<8x512xf32>
    %378 = vector.extract_strided_slice %377 {offsets = [0, 0], sizes = [8, 128], strides = [1, 1]} : vector<8x512xf32> to vector<8x128xf32>
    %379 = arith.negf %378 : vector<8x128xf32>
    %380 = math.exp %379 : vector<8x128xf32>
    %cst_136 = arith.constant 1.000000e+00 : f32
    %381 = vector.broadcast %cst_136 : f32 to vector<8x128xf32>
    %382 = arith.addf %381, %380 : vector<8x128xf32>
    %383 = arith.divf %381, %382 : vector<8x128xf32>
    %384 = vector.extract_strided_slice %377 {offsets = [0, 128], sizes = [8, 128], strides = [1, 1]} : vector<8x512xf32> to vector<8x128xf32>
    %385 = arith.negf %384 : vector<8x128xf32>
    %386 = math.exp %385 : vector<8x128xf32>
    %cst_137 = arith.constant 1.000000e+00 : f32
    %387 = vector.broadcast %cst_137 : f32 to vector<8x128xf32>
    %388 = arith.addf %387, %386 : vector<8x128xf32>
    %389 = arith.divf %387, %388 : vector<8x128xf32>
    %390 = vector.extract_strided_slice %377 {offsets = [0, 256], sizes = [8, 128], strides = [1, 1]} : vector<8x512xf32> to vector<8x128xf32>
    %391 = math.tanh %390 : vector<8x128xf32>
    %392 = vector.extract_strided_slice %377 {offsets = [0, 384], sizes = [8, 128], strides = [1, 1]} : vector<8x512xf32> to vector<8x128xf32>
    %393 = arith.negf %392 : vector<8x128xf32>
    %394 = math.exp %393 : vector<8x128xf32>
    %cst_138 = arith.constant 1.000000e+00 : f32
    %395 = vector.broadcast %cst_138 : f32 to vector<8x128xf32>
    %396 = arith.addf %395, %394 : vector<8x128xf32>
    %397 = arith.divf %395, %396 : vector<8x128xf32>
    %398 = arith.mulf %389, %369 : vector<8x128xf32>
    %399 = arith.mulf %383, %391 : vector<8x128xf32>
    %400 = arith.addf %398, %399 : vector<8x128xf32>
    %401 = math.tanh %400 : vector<8x128xf32>
    %402 = arith.mulf %397, %401 : vector<8x128xf32>
    %c3_i32_139 = arith.constant 3 : i32
    %403 = arith.index_cast %c3_i32_139 : i32 to index
    %c0_140 = arith.constant 0 : index
    %c0_141 = arith.constant 0 : index
    %404 = vector.load %arg11[%403, %c0_140, %c0_141] : memref<8x8x512xf32, #tpu.memory_space<vmem>>, vector<1x8x512xf32>
    %405 = vector.shape_cast %404 : vector<1x8x512xf32> to vector<8x512xf32>
    %c0_142 = arith.constant 0 : index
    %c0_143 = arith.constant 0 : index
    %406 = vector.load %arg6[%c0_142, %c0_143] : memref<128x512xf32, #tpu.memory_space<vmem>>, vector<128x512xf32>
    %cst_144 = arith.constant dense<0.000000e+00> : vector<8x512xf32>
    %407 = tpu.matmul %402, %406, %cst_144 {dimension_numbers = #tpu.dot_dimension_numbers<[1], [0], [0], [1], [0, 0, 1, 1], [], []>} : vector<8x128xf32>, vector<128x512xf32>, vector<8x512xf32> -> vector<8x512xf32>
    %408 = arith.addf %405, %407 : vector<8x512xf32>
    %409 = vector.extract_strided_slice %408 {offsets = [0, 0], sizes = [8, 128], strides = [1, 1]} : vector<8x512xf32> to vector<8x128xf32>
    %410 = arith.negf %409 : vector<8x128xf32>
    %411 = math.exp %410 : vector<8x128xf32>
    %cst_145 = arith.constant 1.000000e+00 : f32
    %412 = vector.broadcast %cst_145 : f32 to vector<8x128xf32>
    %413 = arith.addf %412, %411 : vector<8x128xf32>
    %414 = arith.divf %412, %413 : vector<8x128xf32>
    %415 = vector.extract_strided_slice %408 {offsets = [0, 128], sizes = [8, 128], strides = [1, 1]} : vector<8x512xf32> to vector<8x128xf32>
    %416 = arith.negf %415 : vector<8x128xf32>
    %417 = math.exp %416 : vector<8x128xf32>
    %cst_146 = arith.constant 1.000000e+00 : f32
    %418 = vector.broadcast %cst_146 : f32 to vector<8x128xf32>
    %419 = arith.addf %418, %417 : vector<8x128xf32>
    %420 = arith.divf %418, %419 : vector<8x128xf32>
    %421 = vector.extract_strided_slice %408 {offsets = [0, 256], sizes = [8, 128], strides = [1, 1]} : vector<8x512xf32> to vector<8x128xf32>
    %422 = math.tanh %421 : vector<8x128xf32>
    %423 = vector.extract_strided_slice %408 {offsets = [0, 384], sizes = [8, 128], strides = [1, 1]} : vector<8x512xf32> to vector<8x128xf32>
    %424 = arith.negf %423 : vector<8x128xf32>
    %425 = math.exp %424 : vector<8x128xf32>
    %cst_147 = arith.constant 1.000000e+00 : f32
    %426 = vector.broadcast %cst_147 : f32 to vector<8x128xf32>
    %427 = arith.addf %426, %425 : vector<8x128xf32>
    %428 = arith.divf %426, %427 : vector<8x128xf32>
    %429 = arith.mulf %420, %400 : vector<8x128xf32>
    %430 = arith.mulf %414, %422 : vector<8x128xf32>
    %431 = arith.addf %429, %430 : vector<8x128xf32>
    %432 = math.tanh %431 : vector<8x128xf32>
    %433 = arith.mulf %428, %432 : vector<8x128xf32>
    %c4_i32_148 = arith.constant 4 : i32
    %434 = arith.index_cast %c4_i32_148 : i32 to index
    %c0_149 = arith.constant 0 : index
    %c0_150 = arith.constant 0 : index
    %435 = vector.load %arg11[%434, %c0_149, %c0_150] : memref<8x8x512xf32, #tpu.memory_space<vmem>>, vector<1x8x512xf32>
    %436 = vector.shape_cast %435 : vector<1x8x512xf32> to vector<8x512xf32>
    %c0_151 = arith.constant 0 : index
    %c0_152 = arith.constant 0 : index
    %437 = vector.load %arg6[%c0_151, %c0_152] : memref<128x512xf32, #tpu.memory_space<vmem>>, vector<128x512xf32>
    %cst_153 = arith.constant dense<0.000000e+00> : vector<8x512xf32>
    %438 = tpu.matmul %433, %437, %cst_153 {dimension_numbers = #tpu.dot_dimension_numbers<[1], [0], [0], [1], [0, 0, 1, 1], [], []>} : vector<8x128xf32>, vector<128x512xf32>, vector<8x512xf32> -> vector<8x512xf32>
    %439 = arith.addf %436, %438 : vector<8x512xf32>
    %440 = vector.extract_strided_slice %439 {offsets = [0, 0], sizes = [8, 128], strides = [1, 1]} : vector<8x512xf32> to vector<8x128xf32>
    %441 = arith.negf %440 : vector<8x128xf32>
    %442 = math.exp %441 : vector<8x128xf32>
    %cst_154 = arith.constant 1.000000e+00 : f32
    %443 = vector.broadcast %cst_154 : f32 to vector<8x128xf32>
    %444 = arith.addf %443, %442 : vector<8x128xf32>
    %445 = arith.divf %443, %444 : vector<8x128xf32>
    %446 = vector.extract_strided_slice %439 {offsets = [0, 128], sizes = [8, 128], strides = [1, 1]} : vector<8x512xf32> to vector<8x128xf32>
    %447 = arith.negf %446 : vector<8x128xf32>
    %448 = math.exp %447 : vector<8x128xf32>
    %cst_155 = arith.constant 1.000000e+00 : f32
    %449 = vector.broadcast %cst_155 : f32 to vector<8x128xf32>
    %450 = arith.addf %449, %448 : vector<8x128xf32>
    %451 = arith.divf %449, %450 : vector<8x128xf32>
    %452 = vector.extract_strided_slice %439 {offsets = [0, 256], sizes = [8, 128], strides = [1, 1]} : vector<8x512xf32> to vector<8x128xf32>
    %453 = math.tanh %452 : vector<8x128xf32>
    %454 = vector.extract_strided_slice %439 {offsets = [0, 384], sizes = [8, 128], strides = [1, 1]} : vector<8x512xf32> to vector<8x128xf32>
    %455 = arith.negf %454 : vector<8x128xf32>
    %456 = math.exp %455 : vector<8x128xf32>
    %cst_156 = arith.constant 1.000000e+00 : f32
    %457 = vector.broadcast %cst_156 : f32 to vector<8x128xf32>
    %458 = arith.addf %457, %456 : vector<8x128xf32>
    %459 = arith.divf %457, %458 : vector<8x128xf32>
    %460 = arith.mulf %451, %431 : vector<8x128xf32>
    %461 = arith.mulf %445, %453 : vector<8x128xf32>
    %462 = arith.addf %460, %461 : vector<8x128xf32>
    %463 = math.tanh %462 : vector<8x128xf32>
    %464 = arith.mulf %459, %463 : vector<8x128xf32>
    %c5_i32_157 = arith.constant 5 : i32
    %465 = arith.index_cast %c5_i32_157 : i32 to index
    %c0_158 = arith.constant 0 : index
    %c0_159 = arith.constant 0 : index
    %466 = vector.load %arg11[%465, %c0_158, %c0_159] : memref<8x8x512xf32, #tpu.memory_space<vmem>>, vector<1x8x512xf32>
    %467 = vector.shape_cast %466 : vector<1x8x512xf32> to vector<8x512xf32>
    %c0_160 = arith.constant 0 : index
    %c0_161 = arith.constant 0 : index
    %468 = vector.load %arg6[%c0_160, %c0_161] : memref<128x512xf32, #tpu.memory_space<vmem>>, vector<128x512xf32>
    %cst_162 = arith.constant dense<0.000000e+00> : vector<8x512xf32>
    %469 = tpu.matmul %464, %468, %cst_162 {dimension_numbers = #tpu.dot_dimension_numbers<[1], [0], [0], [1], [0, 0, 1, 1], [], []>} : vector<8x128xf32>, vector<128x512xf32>, vector<8x512xf32> -> vector<8x512xf32>
    %470 = arith.addf %467, %469 : vector<8x512xf32>
    %471 = vector.extract_strided_slice %470 {offsets = [0, 0], sizes = [8, 128], strides = [1, 1]} : vector<8x512xf32> to vector<8x128xf32>
    %472 = arith.negf %471 : vector<8x128xf32>
    %473 = math.exp %472 : vector<8x128xf32>
    %cst_163 = arith.constant 1.000000e+00 : f32
    %474 = vector.broadcast %cst_163 : f32 to vector<8x128xf32>
    %475 = arith.addf %474, %473 : vector<8x128xf32>
    %476 = arith.divf %474, %475 : vector<8x128xf32>
    %477 = vector.extract_strided_slice %470 {offsets = [0, 128], sizes = [8, 128], strides = [1, 1]} : vector<8x512xf32> to vector<8x128xf32>
    %478 = arith.negf %477 : vector<8x128xf32>
    %479 = math.exp %478 : vector<8x128xf32>
    %cst_164 = arith.constant 1.000000e+00 : f32
    %480 = vector.broadcast %cst_164 : f32 to vector<8x128xf32>
    %481 = arith.addf %480, %479 : vector<8x128xf32>
    %482 = arith.divf %480, %481 : vector<8x128xf32>
    %483 = vector.extract_strided_slice %470 {offsets = [0, 256], sizes = [8, 128], strides = [1, 1]} : vector<8x512xf32> to vector<8x128xf32>
    %484 = math.tanh %483 : vector<8x128xf32>
    %485 = vector.extract_strided_slice %470 {offsets = [0, 384], sizes = [8, 128], strides = [1, 1]} : vector<8x512xf32> to vector<8x128xf32>
    %486 = arith.negf %485 : vector<8x128xf32>
    %487 = math.exp %486 : vector<8x128xf32>
    %cst_165 = arith.constant 1.000000e+00 : f32
    %488 = vector.broadcast %cst_165 : f32 to vector<8x128xf32>
    %489 = arith.addf %488, %487 : vector<8x128xf32>
    %490 = arith.divf %488, %489 : vector<8x128xf32>
    %491 = arith.mulf %482, %462 : vector<8x128xf32>
    %492 = arith.mulf %476, %484 : vector<8x128xf32>
    %493 = arith.addf %491, %492 : vector<8x128xf32>
    %494 = math.tanh %493 : vector<8x128xf32>
    %495 = arith.mulf %490, %494 : vector<8x128xf32>
    %c6_i32_166 = arith.constant 6 : i32
    %496 = arith.index_cast %c6_i32_166 : i32 to index
    %c0_167 = arith.constant 0 : index
    %c0_168 = arith.constant 0 : index
    %497 = vector.load %arg11[%496, %c0_167, %c0_168] : memref<8x8x512xf32, #tpu.memory_space<vmem>>, vector<1x8x512xf32>
    %498 = vector.shape_cast %497 : vector<1x8x512xf32> to vector<8x512xf32>
    %c0_169 = arith.constant 0 : index
    %c0_170 = arith.constant 0 : index
    %499 = vector.load %arg6[%c0_169, %c0_170] : memref<128x512xf32, #tpu.memory_space<vmem>>, vector<128x512xf32>
    %cst_171 = arith.constant dense<0.000000e+00> : vector<8x512xf32>
    %500 = tpu.matmul %495, %499, %cst_171 {dimension_numbers = #tpu.dot_dimension_numbers<[1], [0], [0], [1], [0, 0, 1, 1], [], []>} : vector<8x128xf32>, vector<128x512xf32>, vector<8x512xf32> -> vector<8x512xf32>
    %501 = arith.addf %498, %500 : vector<8x512xf32>
    %502 = vector.extract_strided_slice %501 {offsets = [0, 0], sizes = [8, 128], strides = [1, 1]} : vector<8x512xf32> to vector<8x128xf32>
    %503 = arith.negf %502 : vector<8x128xf32>
    %504 = math.exp %503 : vector<8x128xf32>
    %cst_172 = arith.constant 1.000000e+00 : f32
    %505 = vector.broadcast %cst_172 : f32 to vector<8x128xf32>
    %506 = arith.addf %505, %504 : vector<8x128xf32>
    %507 = arith.divf %505, %506 : vector<8x128xf32>
    %508 = vector.extract_strided_slice %501 {offsets = [0, 128], sizes = [8, 128], strides = [1, 1]} : vector<8x512xf32> to vector<8x128xf32>
    %509 = arith.negf %508 : vector<8x128xf32>
    %510 = math.exp %509 : vector<8x128xf32>
    %cst_173 = arith.constant 1.000000e+00 : f32
    %511 = vector.broadcast %cst_173 : f32 to vector<8x128xf32>
    %512 = arith.addf %511, %510 : vector<8x128xf32>
    %513 = arith.divf %511, %512 : vector<8x128xf32>
    %514 = vector.extract_strided_slice %501 {offsets = [0, 256], sizes = [8, 128], strides = [1, 1]} : vector<8x512xf32> to vector<8x128xf32>
    %515 = math.tanh %514 : vector<8x128xf32>
    %516 = vector.extract_strided_slice %501 {offsets = [0, 384], sizes = [8, 128], strides = [1, 1]} : vector<8x512xf32> to vector<8x128xf32>
    %517 = arith.negf %516 : vector<8x128xf32>
    %518 = math.exp %517 : vector<8x128xf32>
    %cst_174 = arith.constant 1.000000e+00 : f32
    %519 = vector.broadcast %cst_174 : f32 to vector<8x128xf32>
    %520 = arith.addf %519, %518 : vector<8x128xf32>
    %521 = arith.divf %519, %520 : vector<8x128xf32>
    %522 = arith.mulf %513, %493 : vector<8x128xf32>
    %523 = arith.mulf %507, %515 : vector<8x128xf32>
    %524 = arith.addf %522, %523 : vector<8x128xf32>
    %525 = math.tanh %524 : vector<8x128xf32>
    %526 = arith.mulf %521, %525 : vector<8x128xf32>
    %c7_i32_175 = arith.constant 7 : i32
    %527 = arith.index_cast %c7_i32_175 : i32 to index
    %c0_176 = arith.constant 0 : index
    %c0_177 = arith.constant 0 : index
    %528 = vector.load %arg11[%527, %c0_176, %c0_177] : memref<8x8x512xf32, #tpu.memory_space<vmem>>, vector<1x8x512xf32>
    %529 = vector.shape_cast %528 : vector<1x8x512xf32> to vector<8x512xf32>
    %c0_178 = arith.constant 0 : index
    %c0_179 = arith.constant 0 : index
    %530 = vector.load %arg6[%c0_178, %c0_179] : memref<128x512xf32, #tpu.memory_space<vmem>>, vector<128x512xf32>
    %cst_180 = arith.constant dense<0.000000e+00> : vector<8x512xf32>
    %531 = tpu.matmul %526, %530, %cst_180 {dimension_numbers = #tpu.dot_dimension_numbers<[1], [0], [0], [1], [0, 0, 1, 1], [], []>} : vector<8x128xf32>, vector<128x512xf32>, vector<8x512xf32> -> vector<8x512xf32>
    %532 = arith.addf %529, %531 : vector<8x512xf32>
    %533 = vector.extract_strided_slice %532 {offsets = [0, 0], sizes = [8, 128], strides = [1, 1]} : vector<8x512xf32> to vector<8x128xf32>
    %534 = arith.negf %533 : vector<8x128xf32>
    %535 = math.exp %534 : vector<8x128xf32>
    %cst_181 = arith.constant 1.000000e+00 : f32
    %536 = vector.broadcast %cst_181 : f32 to vector<8x128xf32>
    %537 = arith.addf %536, %535 : vector<8x128xf32>
    %538 = arith.divf %536, %537 : vector<8x128xf32>
    %539 = vector.extract_strided_slice %532 {offsets = [0, 128], sizes = [8, 128], strides = [1, 1]} : vector<8x512xf32> to vector<8x128xf32>
    %540 = arith.negf %539 : vector<8x128xf32>
    %541 = math.exp %540 : vector<8x128xf32>
    %cst_182 = arith.constant 1.000000e+00 : f32
    %542 = vector.broadcast %cst_182 : f32 to vector<8x128xf32>
    %543 = arith.addf %542, %541 : vector<8x128xf32>
    %544 = arith.divf %542, %543 : vector<8x128xf32>
    %545 = vector.extract_strided_slice %532 {offsets = [0, 256], sizes = [8, 128], strides = [1, 1]} : vector<8x512xf32> to vector<8x128xf32>
    %546 = math.tanh %545 : vector<8x128xf32>
    %547 = vector.extract_strided_slice %532 {offsets = [0, 384], sizes = [8, 128], strides = [1, 1]} : vector<8x512xf32> to vector<8x128xf32>
    %548 = arith.negf %547 : vector<8x128xf32>
    %549 = math.exp %548 : vector<8x128xf32>
    %cst_183 = arith.constant 1.000000e+00 : f32
    %550 = vector.broadcast %cst_183 : f32 to vector<8x128xf32>
    %551 = arith.addf %550, %549 : vector<8x128xf32>
    %552 = arith.divf %550, %551 : vector<8x128xf32>
    %553 = arith.mulf %544, %524 : vector<8x128xf32>
    %554 = arith.mulf %538, %546 : vector<8x128xf32>
    %555 = arith.addf %553, %554 : vector<8x128xf32>
    %556 = math.tanh %555 : vector<8x128xf32>
    %557 = arith.mulf %552, %556 : vector<8x128xf32>
    %c8_i32_184 = arith.constant 8 : i32
    %c0_185 = arith.constant 0 : index
    %c0_186 = arith.constant 0 : index
    %558 = vector.load %arg8[%c0_185, %c0_186] : memref<128x128xf32, #tpu.memory_space<vmem>>, vector<128x128xf32>
    %cst_187 = arith.constant dense<0.000000e+00> : vector<8x128xf32>
    %559 = tpu.matmul %557, %558, %cst_187 {dimension_numbers = #tpu.dot_dimension_numbers<[1], [0], [0], [1], [0, 0, 1, 1], [], []>} : vector<8x128xf32>, vector<128x128xf32>, vector<8x128xf32> -> vector<8x128xf32>
    %c0_188 = arith.constant 0 : index
    %c0_189 = arith.constant 0 : index
    %560 = vector.load %arg9[%c0_188, %c0_189] : memref<1x128xf32, #tpu.memory_space<vmem>>, vector<1x128xf32>
    %561 = vector.broadcast %560 : vector<1x128xf32> to vector<8x128xf32>
    %562 = arith.addf %559, %561 : vector<8x128xf32>
    %c0_190 = arith.constant 0 : index
    %c0_191 = arith.constant 0 : index
    %563 = vector.load %arg10[%c0_190, %c0_191] : memref<8x128xf32, #tpu.memory_space<vmem>>, vector<8x128xf32>
    tpu.vector_store %arg10[%c0_190, %c0_191], %562 {strides = array<i32>} : memref<8x128xf32, #tpu.memory_space<vmem>>, vector<8x128xf32>,
    return
  }
  func.func @transform_0(%arg0: i32) -> (i32, i32, i32) {
    %c0_i32 = arith.constant 0 : i32
    %c0_i32_0 = arith.constant 0 : i32
    %c0_i32_1 = arith.constant 0 : i32
    return %c0_i32, %arg0, %c0_i32_0 : i32, i32, i32
  }
  func.func @transform_1(%arg0: i32) -> (i32, i32) {
    %c0_i32 = arith.constant 0 : i32
    %c0_i32_0 = arith.constant 0 : i32
    %c0_i32_1 = arith.constant 0 : i32
    return %c0_i32, %c0_i32_0 : i32, i32
  }
  func.func @transform_2(%arg0: i32) -> (i32, i32) {
    %c0_i32 = arith.constant 0 : i32
    %c0_i32_0 = arith.constant 0 : i32
    %c0_i32_1 = arith.constant 0 : i32
    return %c0_i32, %c0_i32_0 : i32, i32
  }
  func.func @transform_3(%arg0: i32) -> (i32, i32) {
    %c0_i32 = arith.constant 0 : i32
    %c0_i32_0 = arith.constant 0 : i32
    %c0_i32_1 = arith.constant 0 : i32
    return %c0_i32, %c0_i32_0 : i32, i32
  }
  func.func @transform_4(%arg0: i32) -> (i32, i32) {
    %c0_i32 = arith.constant 0 : i32
    %c0_i32_0 = arith.constant 0 : i32
    %c0_i32_1 = arith.constant 0 : i32
    return %c0_i32, %c0_i32_0 : i32, i32
  }
  func.func @transform_5(%arg0: i32) -> (i32, i32) {
    %c0_i32 = arith.constant 0 : i32
    %c0_i32_0 = arith.constant 0 : i32
    %c0_i32_1 = arith.constant 0 : i32
    return %c0_i32, %c0_i32_0 : i32, i32
  }
  func.func @transform_6(%arg0: i32) -> (i32, i32) {
    %c0_i32 = arith.constant 0 : i32
    %c0_i32_0 = arith.constant 0 : i32
    %c0_i32_1 = arith.constant 0 : i32
    return %c0_i32, %c0_i32_0 : i32, i32
  }
  func.func @transform_7(%arg0: i32) -> (i32, i32) {
    %c0_i32 = arith.constant 0 : i32
    %c0_i32_0 = arith.constant 0 : i32
    %c0_i32_1 = arith.constant 0 : i32
    return %c0_i32, %c0_i32_0 : i32, i32
  }
  func.func @transform_8(%arg0: i32) -> (i32, i32) {
    %c0_i32 = arith.constant 0 : i32
    %c0_i32_0 = arith.constant 0 : i32
    %c0_i32_1 = arith.constant 0 : i32
    return %c0_i32, %c0_i32_0 : i32, i32
  }
  func.func @transform_9(%arg0: i32) -> (i32, i32) {
    %c0_i32 = arith.constant 0 : i32
    %c0_i32_0 = arith.constant 0 : i32
    return %arg0, %c0_i32 : i32, i32
  }
}

</mosaic_0001>

<bundles_post_ra>
// kernel: stock_price_regressor_forward.1
= control target key start
LH: loop header
LB: loop body
LE: loop exit
PB: predicated region body
PF: predicated region fallthrough
CT: control target
= control target key end

     0   :  { %14 = vsyncpa [#allocation5], 0  ;;  %s7247_s0 = inlined_call_operand.vmem [shape: f32[8,8,4], index: 0, kind: input, shape index: {}]   ;;  %s7248_s1 = inlined_call_operand.hbm [shape: f32[4,512], index: 1, kind: input, shape index: {}]   ;;  %s7249_s2 = inlined_call_operand.hbm [shape: f32[128,512], index: 2, kind: input, shape index: {}]   ;;  %s7250_s3 = inlined_call_operand.hbm [shape: f32[1,512], index: 3, kind: input, shape index: {}]   ;;  %s7251_s4 = inlined_call_operand.hbm [shape: f32[128,512], index: 4, kind: input, shape index: {}]   ;;  %s7252_s5 = inlined_call_operand.hbm [shape: f32[128,512], index: 5, kind: input, shape index: {}]   ;;  %s7253_s6 = inlined_call_operand.hbm [shape: f32[1,512], index: 6, kind: input, shape index: {}]   ;;  %s7254_s7 = inlined_call_operand.vmem [shape: f32[128,128], index: 7, kind: input, shape index: {}]   ;;  %s7255_s8 = inlined_call_operand.vmem [shape: f32[1,128], index: 8, kind: input, shape index: {}]   ;;  %s7256_s9 = inlined_call_operand.vmem [shape: f32[8,128], index: 9, kind: output, shape index: {}]  }
   0x1   :  { %15 = vsyncpa [#allocation7], 0 }
   0x2   :  { %16 = vsyncpa [#allocation10], 0 }
   0x3   :  { %17 = vsyncpa [#allocation13], 0  ;;  %s6042_s30 = smov [#allocation6]   ;;  %s5902_s13 = scalar_lea.hbm %s7249_s2, 8192 }
   0x4   :  { %s35_s10 = sshll.u32 %s6042_s30, 4  ;;  %p5903_p0 = scmp.ne.s32.totalorder %s7249_s2, %s5902_s13  ;;  %s36_s10 = int_to_ptr.vmem [resolvable:$true] %s35_s10 }
   0x5   :  { %p5906_p1 = scmp.lt.u32.totalorder %s5902_s13, %s7249_s2 }
   0x7   :  { %p5908_p2 = pnand %p5906_p1, %p5903_p0 }
   0x9   :  { %5911 = shalt.err (!%p5908_p2)
}
   0xa   :  { %s5912_s18 = scalar_lea.vmem %s36_s10, 8192  ;;  %p5917_p4 = scmp.lt.s32.totalorder %s36_s10, %s36_s10 }
   0xb   :  { %p5913_p3 = scmp.ne.s32.totalorder %s36_s10, %s5912_s18  ;;  %p5918_p5 = scmp.lt.s32.totalorder %s5912_s18, %s5912_s18 }
   0xd   :  { %p5919_p6 = por %p5918_p5, %p5917_p4 }
   0xf   :  { %p5920_p7 = pnand %p5919_p6, %p5913_p3 }
  0x11   :  { %5923 = shalt.err (!%p5920_p7)
}
  0x12   :  { %s6043_s19 = smov 512   ;;  %s6044_s20 = smov 32  }
  0x13   :  { %41 = dma.hbm_to_vmem [thread:$0]  %s7249_s2, 8192, %s36_s10, [#allocation7], %s6043_s19, %s6043_s19, %s6044_s20  }
  0x14   :  { %s6045_s23 = smov [#allocation9]   ;;  %s6046_s25 = smov [#allocation4]  }
  0x15   :  { %s57_s24 = sshll.u32 %s6045_s23, 4  ;;  %s26_s26 = sshll.u32 %s6046_s25, 4  ;;  %s58_s24 = int_to_ptr.vmem [resolvable:$true] %s57_s24  ;;  %s27_s26 = int_to_ptr.vmem [resolvable:$true] %s26_s26 }
  0x16   :  { %s5924_s29 = scalar_lea.hbm %s7251_s4, 8192 }
  0x17   :  { %p5925_p8 = scmp.ne.s32.totalorder %s7251_s4, %s5924_s29  ;;  %p5928_p9 = scmp.lt.u32.totalorder %s5924_s29, %s7251_s4 }
  0x19   :  { %p5930_p10 = pnand %p5928_p9, %p5925_p8 }
  0x1b   :  { %5933 = shalt.err (!%p5930_p10)
}
  0x1c   :  { %s5934_s2 = scalar_lea.vmem %s58_s24, 8192  ;;  %p5939_p12 = scmp.lt.s32.totalorder %s58_s24, %s58_s24 }
  0x1d   :  { %p5935_p11 = scmp.ne.s32.totalorder %s58_s24, %s5934_s2  ;;  %p5940_p13 = scmp.lt.s32.totalorder %s5934_s2, %s5934_s2 }
  0x1f   :  { %p5941_p0 = por %p5940_p13, %p5939_p12 }
  0x21   :  { %p5942_p1 = pnand %p5941_p0, %p5935_p11 }
  0x23   :  { %5945 = shalt.err (!%p5942_p1)
}
  0x24   :  { %63 = dma.hbm_to_vmem [thread:$0]  %s7251_s4, 8192, %s58_s24, [#allocation10], %s6043_s19, %s6043_s19, %s6044_s20  }
  0x25   :  { %s5946_s17 = scalar_lea.hbm %s7248_s1, 256 }
  0x26   :  { %p5947_p2 = scmp.ne.s32.totalorder %s7248_s1, %s5946_s17  ;;  %p5950_p3 = scmp.lt.u32.totalorder %s5946_s17, %s7248_s1 }
  0x28   :  { %p5952_p4 = pnand %p5950_p3, %p5947_p2 }
  0x2a   :  { %5955 = shalt.err (!%p5952_p4)
}
  0x2b   :  { %s5956_s25 = scalar_lea.vmem %s27_s26, 256  ;;  %p5961_p6 = scmp.lt.s32.totalorder %s27_s26, %s27_s26 }
  0x2c   :  { %p5957_p5 = scmp.ne.s32.totalorder %s27_s26, %s5956_s25  ;;  %p5962_p7 = scmp.lt.s32.totalorder %s5956_s25, %s5956_s25 }
  0x2e   :  { %p5963_p8 = por %p5962_p7, %p5961_p6 }
  0x30   :  { %p5964_p9 = pnand %p5963_p8, %p5957_p5 }
  0x32   :  { %5967 = shalt.err (!%p5964_p9)
}
  0x33   :  { %29 = dma.hbm_to_vmem [thread:$0]  %s7248_s1, 256, %s27_s26, [#allocation5]  }
  0x34   :  { %s6047_s27 = smov [#allocation8]   ;;  %s6048_s29 = smov [#allocation11]  }
  0x35   :  { %s48_s28 = sshll.u32 %s6047_s27, 4  ;;  %s69_s30 = sshll.u32 %s6048_s29, 4  ;;  %s49_s28 = int_to_ptr.vmem [resolvable:$true] %s48_s28  ;;  %s70_s30 = int_to_ptr.vmem [resolvable:$true] %s69_s30 }
  0x36   :  { %s5968_s13 = scalar_lea.hbm %s7250_s3, 64 }
  0x37   :  { %p5969_p10 = scmp.ne.s32.totalorder %s7250_s3, %s5968_s13  ;;  %p5972_p11 = scmp.lt.u32.totalorder %s5968_s13, %s7250_s3 }
  0x39   :  { %p5974_p12 = pnand %p5972_p11, %p5969_p10 }
  0x3b   :  { %5977 = shalt.err (!%p5974_p12)
}
  0x3c   :  { %s5978_s1 = scalar_lea.vmem %s49_s28, 64  ;;  %p5983_p0 = scmp.lt.s32.totalorder %s49_s28, %s49_s28 }
  0x3d   :  { %p5979_p13 = scmp.ne.s32.totalorder %s49_s28, %s5978_s1  ;;  %p5984_p1 = scmp.lt.s32.totalorder %s5978_s1, %s5978_s1 }
  0x3f   :  { %p5985_p2 = por %p5984_p1, %p5983_p0 }
  0x41   :  { %p5986_p3 = pnand %p5985_p2, %p5979_p13 }
  0x43   :  { %5989 = shalt.err (!%p5986_p3)
}
  0x44   :  { %51 = dma.hbm_to_vmem [thread:$0]  %s7250_s3, 64, %s49_s28, [#allocation7]  }
  0x45   :  { %s5990_s21 = scalar_lea.hbm %s7252_s5, 8192 }
  0x46   :  { %p5991_p4 = scmp.ne.s32.totalorder %s7252_s5, %s5990_s21  ;;  %p5994_p5 = scmp.lt.u32.totalorder %s5990_s21, %s7252_s5 }
  0x48   :  { %p5996_p6 = pnand %p5994_p5, %p5991_p4 }
  0x4a   :  { %5999 = shalt.err (!%p5996_p6)
}
  0x4b   :  { %s6000_s24 = scalar_lea.vmem %s70_s30, 8192  ;;  %p6005_p8 = scmp.lt.s32.totalorder %s70_s30, %s70_s30 }
  0x4c   :  { %p6001_p7 = scmp.ne.s32.totalorder %s70_s30, %s6000_s24  ;;  %p6006_p9 = scmp.lt.s32.totalorder %s6000_s24, %s6000_s24 }
  0x4e   :  { %p6007_p10 = por %p6006_p9, %p6005_p8 }
  0x50   :  { %p6008_p11 = pnand %p6007_p10, %p6001_p7 }
  0x52   :  { %6011 = shalt.err (!%p6008_p11)
}
  0x53   :  { %75 = dma.hbm_to_vmem [thread:$0]  %s7252_s5, 8192, %s70_s30, [#allocation10], %s6043_s19, %s6043_s19, %s6044_s20  }
  0x54   :  { %s6049_s28 = smov [#allocation12]   ;;  %s6012_s13 = scalar_lea.hbm %s7253_s6, 64 }
  0x55   :  { %s82_s29 = sshll.u32 %s6049_s28, 4  ;;  %p6013_p12 = scmp.ne.s32.totalorder %s7253_s6, %s6012_s13  ;;  %s83_s29 = int_to_ptr.vmem [resolvable:$true] %s82_s29 }
  0x56   :  { %p6016_p13 = scmp.lt.u32.totalorder %s6012_s13, %s7253_s6 }
  0x58   :  { %p6018_p0 = pnand %p6016_p13, %p6013_p12 }
  0x5a   :  { %6021 = shalt.err (!%p6018_p0)
}
  0x5b   :  { %s6022_s1 = scalar_lea.vmem %s83_s29, 64  ;;  %p6027_p2 = scmp.lt.s32.totalorder %s83_s29, %s83_s29 }
  0x5c   :  { %p6023_p1 = scmp.ne.s32.totalorder %s83_s29, %s6022_s1  ;;  %p6028_p3 = scmp.lt.s32.totalorder %s6022_s1, %s6022_s1 }
  0x5e   :  { %p6029_p4 = por %p6028_p3, %p6027_p2 }
  0x60   :  { %p6030_p5 = pnand %p6029_p4, %p6023_p1 }
  0x62   :  { %6033 = shalt.err (!%p6030_p5)
}
  0x63   :  { %85 = dma.hbm_to_vmem [thread:$0]  %s7253_s6, 64, %s83_s29, [#allocation13]  }
  0x64   :  { %6034 = dma.done.wait [#allocation5], 256  }
  0x65   :  { %6035 = vsyncadd [#allocation5], 4294967040 }
  0x66   :  { %6036 = dma.done.wait [#allocation7], 8256  }
  0x67   :  { %6037 = vsyncadd [#allocation7], 4294959040 }
  0x68   :  { %6038 = dma.done.wait [#allocation10], 16384  }
  0x69   :  { %6039 = vsyncadd [#allocation10], 4294950912 }
  0x6a   :  { %6040 = dma.done.wait [#allocation13], 64  }
  0x6b   :  { %6041 = vsyncadd [#allocation13], 4294967232  ;;  %v6050_v0 = vmov 0.0   ;;  %v116_v1 = vld [vmem:[#allocation4] sm:$0xff]  ;;  %vm169_vm0 = vcmask 1043456   ;;  %v117_v2 = vld [vmem:[#allocation4 + $0x8] sm:$0xff] }
  0x6c   :  { %242 = vmatprep.mubr.f32.mxu0 %v6050_v0  ;;  %355 = vmatprep.mubr.f32.mxu1 %v6050_v0  ;;  %v108_v3 = vld [vmem:[%s7247_s0] sm:$0xff]  ;;  %v142_v4 = vcombine.high %v116_v1, %v116_v1  ;;  %v143_v5 = vcombine.high %v117_v2, %v117_v2  ;;  %v441_v6 = vld [vmem:[#allocation6 + $0x8] sm:$0xff]  ;;  %v443_v8 = vld [vmem:[#allocation6 + $0x18] sm:$0xff]  ;;  %vm144_vm1 = vcmask 31744   ;;  %vm6052_vm2 = vmmov 0  }
  0x6d   :  { %v445_v7 = vld [vmem:[#allocation6 + $0x28] sm:$0xff]  ;;  %v447_v10 = vld [vmem:[#allocation6 + $0x38] sm:$0xff]  ;;  %v440_v11 = vld [vmem:[#allocation6] sm:$0xff] }
  0x6e   :  { %v6189_v9 = vpack.c.bf16 %v445_v7, %v441_v6  ;;  %v444_v12 = vld [vmem:[#allocation6 + $0x20] sm:$0xff]  ;;  %4272 = vmatprep.subr.msk.mxu0 %vm169_vm0, %v142_v4  ;;  %4282 = vmatprep.subr.msk.mxu1 %vm169_vm0, %v143_v5  ;;  %v6193_v13 = vpack.c.bf16 %v447_v10, %v443_v8  ;;  %v442_v15 = vld [vmem:[#allocation6 + $0x10] sm:$0xff]  ;;  %v449_v18 = vld [vmem:[#allocation6 + $0x48] sm:$0xff] }
  0x6f   :  { %v6195_v14 = vpack.c.bf16 %v444_v12, %v440_v11  ;;  %v446_v16 = vld [vmem:[#allocation6 + $0x30] sm:$0xff]  ;;  %4273 = vmatpush1.msk.msra.mxu0 %vm169_vm0, %v116_v1  ;;  %4283 = vmatpush1.msk.msra.mxu1 %vm169_vm0, %v117_v2  ;;  %v453_v19 = vld [vmem:[#allocation6 + $0x68] sm:$0xff]  ;;  %v451_v20 = vld [vmem:[#allocation6 + $0x58] sm:$0xff] }
  0x70   :  { %v6199_v17 = vpack.c.bf16 %v446_v16, %v442_v15  ;;  %4274 = vmatmul.mubr.msk.f32.vlgmr.msra.gmra.mrb[0].mxu0 %vm144_vm1, %v108_v3  ;;  %4284 = vmatmul.mubr.msk.f32.vlgmr.msra.gmra.mrb[0].mxu1 %vm144_vm1, %v108_v3  ;;  %v455_v21 = vld [vmem:[#allocation6 + $0x78] sm:$0xff]  ;;  %v448_v22 = vld [vmem:[#allocation6 + $0x40] sm:$0xff]  ;;  %v6208_v25 = vpack.c.bf16 %v453_v19, %v449_v18  ;;  %v450_v27 = vld [vmem:[#allocation6 + $0x50] sm:$0xff] }
  0x71   :  { %v452_v23 = vld [vmem:[#allocation6 + $0x60] sm:$0xff]  ;;  %4394 = vmatprep.subr.bf16.mxu0 %v6189_v9  ;;  %4426 = vmatprep.subr.bf16.mxu1 %v6193_v13  ;;  %v109_v24 = vld [vmem:[%s7247_s0 + $0x8] sm:$0xff]  ;;  %v6210_v26 = vpack.c.bf16 %v455_v21, %v451_v20  ;;  %v454_v28 = vld [vmem:[#allocation6 + $0x70] sm:$0xff] }
  0x72   :  { %4396 = vmatpush1.bf16.msra.mxu0 %v6195_v14  ;;  %4428 = vmatpush1.bf16.msra.mxu1 %v6199_v17  ;;  %v6214_v29 = vpack.c.bf16 %v452_v23, %v448_v22  ;;  %v6216_v30 = vpack.c.bf16 %v454_v28, %v450_v27  ;;  %v457_v31 = vld [vmem:[#allocation6 + $0x88] sm:$0xff]  ;;  %v459_v33 = vld [vmem:[#allocation6 + $0x98] sm:$0xff]  ;;  %v456_v35 = vld [vmem:[#allocation6 + $0x80] sm:$0xff] }
  0x73   :  { %v461_v32 = vld [vmem:[#allocation6 + $0xa8] sm:$0xff]  ;;  %248 = vmatprep.mubr.f32.mxu0 %v6050_v0  ;;  %361 = vmatprep.mubr.f32.mxu1 %v6050_v0  ;;  %v463_v34 = vld [vmem:[#allocation6 + $0xb8] sm:$0xff]  ;;  %v460_v36 = vld [vmem:[#allocation6 + $0xa0] sm:$0xff] }
  0x74   :  { %4275 = vmatmul.mubr.msk.f32.gmra.mrb[2].mxu0 %vm144_vm1, %v109_v24  ;;  %4285 = vmatmul.mubr.msk.f32.gmra.mrb[2].mxu1 %vm144_vm1, %v109_v24  ;;  %v458_v37 = vld [vmem:[#allocation6 + $0x90] sm:$0xff]  ;;  %v110_v39 = vld [vmem:[%s7247_s0 + $0x10] sm:$0xff]  ;;  %v6227_v40 = vpack.c.bf16 %v461_v32, %v457_v31  ;;  %v6229_v41 = vpack.c.bf16 %v463_v34, %v459_v33  ;;  %v465_v42 = vld [vmem:[#allocation6 + $0xc8] sm:$0xff]  ;;  %v6233_v44 = vpack.c.bf16 %v460_v36, %v456_v35 }
  0x75   :  { %v462_v38 = vld [vmem:[#allocation6 + $0xb0] sm:$0xff]  ;;  %4398 = vmatprep.subr.bf16.mxu0 %v6208_v25  ;;  %4430 = vmatprep.subr.bf16.mxu1 %v6210_v26  ;;  %v469_v43 = vld [vmem:[#allocation6 + $0xe8] sm:$0xff]  ;;  %v467_v46 = vld [vmem:[#allocation6 + $0xd8] sm:$0xff] }
  0x76   :  { %4400 = vmatpush1.bf16.msra.mxu0 %v6214_v29  ;;  %4432 = vmatpush1.bf16.msra.mxu1 %v6216_v30  ;;  %v6235_v45 = vpack.c.bf16 %v462_v38, %v458_v37  ;;  %v471_v47 = vld [vmem:[#allocation6 + $0xf8] sm:$0xff]  ;;  %v464_v48 = vld [vmem:[#allocation6 + $0xc0] sm:$0xff]  ;;  %v466_v50 = vld [vmem:[#allocation6 + $0xd0] sm:$0xff]  ;;  %v6246_v53 = vpack.c.bf16 %v469_v43, %v465_v42 }
  0x77   :  { %254 = vmatprep.mubr.f32.mxu0 %v6050_v0  ;;  %367 = vmatprep.mubr.f32.mxu1 %v6050_v0  ;;  %v468_v49 = vld [vmem:[#allocation6 + $0xe0] sm:$0xff]  ;;  %v470_v51 = vld [vmem:[#allocation6 + $0xf0] sm:$0xff]  ;;  %v111_v52 = vld [vmem:[%s7247_s0 + $0x18] sm:$0xff]  ;;  %v6248_v54 = vpack.c.bf16 %v471_v47, %v467_v46 }
  0x78   :  { %4276 = vmatmul.mubr.msk.f32.gmra.mrb[4].mxu0 %vm144_vm1, %v110_v39  ;;  %4286 = vmatmul.mubr.msk.f32.gmra.mrb[4].mxu1 %vm144_vm1, %v110_v39  ;;  %v473_v55 = vld [vmem:[#allocation6 + $0x108] sm:$0xff]  ;;  %v6252_v57 = vpack.c.bf16 %v468_v49, %v464_v48  ;;  %v6254_v58 = vpack.c.bf16 %v470_v51, %v466_v50  ;;  %v475_v59 = vld [vmem:[#allocation6 + $0x118] sm:$0xff]  ;;  %v472_v61 = vld [vmem:[#allocation6 + $0x100] sm:$0xff] }
  0x79   :  { %4402 = vmatprep.subr.bf16.mxu0 %v6227_v40  ;;  %4434 = vmatprep.subr.bf16.mxu1 %v6229_v41  ;;  %v477_v56 = vld [vmem:[#allocation6 + $0x128] sm:$0xff]  ;;  %v479_v60 = vld [vmem:[#allocation6 + $0x138] sm:$0xff]  ;;  %v476_v62 = vld [vmem:[#allocation6 + $0x120] sm:$0xff] }
  0x7a   :  { %4404 = vmatpush1.bf16.msra.mxu0 %v6233_v44  ;;  %4436 = vmatpush1.bf16.msra.mxu1 %v6235_v45  ;;  %v474_v63 = vld [vmem:[#allocation6 + $0x110] sm:$0xff]  ;;  %v6265_v3 = vpack.c.bf16 %v477_v56, %v473_v55  ;;  %v6267_v4 = vpack.c.bf16 %v479_v60, %v475_v59  ;;  %v481_v5 = vld [vmem:[#allocation6 + $0x148] sm:$0xff]  ;;  %v6271_v7 = vpack.c.bf16 %v476_v62, %v472_v61  ;;  %v483_v10 = vld [vmem:[#allocation6 + $0x158] sm:$0xff]  ;;  %v120_v62 = vlaneseq }
  0x7b   :  { %260 = vmatprep.mubr.f32.mxu0 %v6050_v0  ;;  %373 = vmatprep.mubr.f32.mxu1 %v6050_v0  ;;  %v478_v1 = vld [vmem:[#allocation6 + $0x130] sm:$0xff]  ;;  %v485_v6 = vld [vmem:[#allocation6 + $0x168] sm:$0xff]  ;;  %v487_v11 = vld [vmem:[#allocation6 + $0x178] sm:$0xff] }
  0x7c   :  { %4277 = vmatmul.mubr.msk.f32.gmra.mrb[6].mxu0 %vm144_vm1, %v111_v52  ;;  %4287 = vmatmul.mubr.msk.f32.gmra.mrb[6].mxu1 %vm144_vm1, %v111_v52  ;;  %v112_v2 = vld [vmem:[%s7247_s0 + $0x20] sm:$0xff]  ;;  %v6273_v8 = vpack.c.bf16 %v478_v1, %v474_v63  ;;  %v480_v12 = vld [vmem:[#allocation6 + $0x140] sm:$0xff]  ;;  %v113_v19 = vld [vmem:[%s7247_s0 + $0x28] sm:$0xff]  ;;  %v6284_v20 = vpack.c.bf16 %v485_v6, %v481_v5  ;;  %v6286_v21 = vpack.c.bf16 %v487_v11, %v483_v10  ;;  %v6380_v63 = vshrl.u32 %v120_v62, 7 }
  0x7d   :  { %4406 = vmatprep.subr.bf16.mxu0 %v6246_v53  ;;  %4438 = vmatprep.subr.bf16.mxu1 %v6248_v54  ;;  %v484_v15 = vld [vmem:[#allocation6 + $0x160] sm:$0xff]  ;;  %v482_v16 = vld [vmem:[#allocation6 + $0x150] sm:$0xff]  ;;  %v489_v22 = vld [vmem:[#allocation6 + $0x188] sm:$0xff] }
  0x7e   :  { %4408 = vmatpush1.bf16.msra.mxu0 %v6252_v57  ;;  %4440 = vmatpush1.bf16.msra.mxu1 %v6254_v58  ;;  %v486_v18 = vld [vmem:[#allocation6 + $0x170] sm:$0xff]  ;;  %v493_v23 = vld [vmem:[#allocation6 + $0x1a8] sm:$0xff]  ;;  %v6290_v24 = vpack.c.bf16 %v484_v15, %v480_v12  ;;  %v491_v28 = vld [vmem:[#allocation6 + $0x198] sm:$0xff]  ;;  %v122_v1 = vsub.s32 0, %v6380_v63  ;;  %v126_v5 = vsub.s32 1, %v6380_v63 }
  0x7f   :  { %266 = vmatprep.mubr.f32.mxu0 %v6050_v0  ;;  %379 = vmatprep.mubr.f32.mxu1 %v6050_v0  ;;  %v6292_v27 = vpack.c.bf16 %v486_v18, %v482_v16  ;;  %v495_v31 = vld [vmem:[#allocation6 + $0x1b8] sm:$0xff]  ;;  %v488_v32 = vld [vmem:[#allocation6 + $0x180] sm:$0xff]  ;;  %v490_v34 = vld [vmem:[#allocation6 + $0x190] sm:$0xff]  ;;  %v6303_v37 = vpack.c.bf16 %v493_v23, %v489_v22 }
  0x80   :  { %4278 = vmatmul.mubr.msk.f32.gmra.mrb[8].mxu0 %vm144_vm1, %v112_v2  ;;  %4288 = vmatmul.mubr.msk.f32.gmra.mrb[8].mxu1 %vm144_vm1, %v112_v2  ;;  %v492_v33 = vld [vmem:[#allocation6 + $0x1a0] sm:$0xff]  ;;  %v494_v35 = vld [vmem:[#allocation6 + $0x1b0] sm:$0xff]  ;;  %v6305_v38 = vpack.c.bf16 %v495_v31, %v491_v28  ;;  %v497_v39 = vld [vmem:[#allocation6 + $0x1c8] sm:$0xff]  ;;  %v130_v28 = vsub.s32 2, %v6380_v63 }
  0x81   :  { %4410 = vmatprep.subr.bf16.mxu0 %v6265_v3  ;;  %4442 = vmatprep.subr.bf16.mxu1 %v6267_v4  ;;  %v114_v36 = vld [vmem:[%s7247_s0 + $0x30] sm:$0xff]  ;;  %v501_v42 = vld [vmem:[#allocation6 + $0x1e8] sm:$0xff]  ;;  %v6309_v43 = vpack.c.bf16 %v492_v33, %v488_v32  ;;  %v6311_v46 = vpack.c.bf16 %v494_v35, %v490_v34  ;;  %v499_v47 = vld [vmem:[#allocation6 + $0x1d8] sm:$0xff] }
  0x82   :  { %4412 = vmatpush1.bf16.msra.mxu0 %v6271_v7  ;;  %4444 = vmatpush1.bf16.msra.mxu1 %v6273_v8  ;;  %v503_v48 = vld [vmem:[#allocation6 + $0x1f8] sm:$0xff]  ;;  %v496_v49 = vld [vmem:[#allocation6 + $0x1c0] sm:$0xff]  ;;  %v498_v51 = vld [vmem:[#allocation6 + $0x1d0] sm:$0xff]  ;;  %v6322_v56 = vpack.c.bf16 %v501_v42, %v497_v39 }
  0x83   :  { %272 = vmatprep.mubr.f32.mxu0 %v6050_v0  ;;  %385 = vmatprep.mubr.f32.mxu1 %v6050_v0  ;;  %v500_v50 = vld [vmem:[#allocation6 + $0x1e0] sm:$0xff]  ;;  %v502_v52 = vld [vmem:[#allocation6 + $0x1f0] sm:$0xff]  ;;  %v115_v55 = vld [vmem:[%s7247_s0 + $0x38] sm:$0xff]  ;;  %v6324_v59 = vpack.c.bf16 %v503_v48, %v499_v47 }
  0x84   :  { %4279 = vmatmul.mubr.msk.f32.gmra.mrb[10].mxu0 %vm144_vm1, %v113_v19  ;;  %4289 = vmatmul.mubr.msk.f32.gmra.mrb[10].mxu1 %vm144_vm1, %v113_v19  ;;  %v6328_v60 = vpack.c.bf16 %v500_v50, %v496_v49  ;;  %v6330_v61 = vpack.c.bf16 %v502_v52, %v498_v51  ;;  %v118_v2 = vld [vmem:[#allocation8] sm:$0xf] }
  0x85   :  { %4414 = vmatprep.subr.bf16.mxu0 %v6284_v20  ;;  %4446 = vmatprep.subr.bf16.mxu1 %v6286_v21  ;;  %v6386_v6 = vrot.slane %v118_v2, %v122_v1  ;;  %v6390_v10 = vrot.slane %v118_v2, %v126_v5  ;;  %v6403_v32 = vrot.slane %v118_v2, %v130_v28 }
  0x86   :  { %4416 = vmatpush1.bf16.msra.mxu0 %v6290_v24  ;;  %4448 = vmatpush1.bf16.msra.mxu1 %v6292_v27 }
  0x87   :  { %278 = vmatprep.mubr.f32.mxu0 %v6050_v0  ;;  %391 = vmatprep.mubr.f32.mxu1 %v6050_v0 }
  0x88   :  { %4280 = vmatmul.mubr.msk.f32.gmra.mrb[12].mxu0 %vm144_vm1, %v114_v36  ;;  %4290 = vmatmul.mubr.msk.f32.gmra.mrb[12].mxu1 %vm144_vm1, %v114_v36 }
  0x89   :  { %4418 = vmatprep.subr.bf16.mxu0 %v6303_v37  ;;  %4450 = vmatprep.subr.bf16.mxu1 %v6305_v38 }
  0x8a   :  { %4420 = vmatpush1.bf16.msra.mxu0 %v6309_v43  ;;  %4452 = vmatpush1.bf16.msra.mxu1 %v6311_v46 }
  0x8b   :  { %284 = vmatprep.mubr.f32.mxu0 %v6050_v0  ;;  %397 = vmatprep.mubr.f32.mxu1 %v6050_v0 }
  0x8c   :  { %4281 = vmatmul.mubr.msk.f32.gmra.mrb[14].mxu0 %vm144_vm1, %v115_v55  ;;  %4291 = vmatmul.mubr.msk.f32.gmra.mrb[14].mxu1 %vm144_vm1, %v115_v55 }
  0x8d   :  { %4422 = vmatprep.subr.bf16.mxu0 %v6322_v56  ;;  %4454 = vmatprep.subr.bf16.mxu1 %v6324_v59 }
  0x8e   :  { %4424 = vmatpush1.bf16.msra.mxu0 %v6328_v60  ;;  %4456 = vmatpush1.bf16.msra.mxu1 %v6330_v61 }
  0x8f   :  { %568 = vmatprep.mubr.f32.mxu0 %v6050_v0  ;;  %639 = vmatprep.mubr.f32.mxu1 %v6050_v0 }
  0x90   :  { %4458 = vmatprep.subr.bf16.mxu0 %v6189_v9  ;;  %4490 = vmatprep.subr.bf16.mxu1 %v6193_v13 }
  0x91   :  { %569 = vmatmul.mubr.f32.vlgmr.msra.gmra.mrb[0].mxu0 %v6050_v0  ;;  %640 = vmatmul.mubr.f32.vlgmr.msra.gmra.mrb[0].mxu1 %v6050_v0 }
  0x92   :  { %4460 = vmatpush1.bf16.msra.mxu0 %v6195_v14  ;;  %4492 = vmatpush1.bf16.msra.mxu1 %v6199_v17 }
  0x93   :  { %4462 = vmatprep.subr.bf16.mxu0 %v6208_v25  ;;  %4494 = vmatprep.subr.bf16.mxu1 %v6210_v26 }
  0x94   :  { %808 = vmatprep.mubr.f32.mxu0 %v6050_v0  ;;  %879 = vmatprep.mubr.f32.mxu1 %v6050_v0 }
  0x96   :  { %4464 = vmatpush1.bf16.msra.mxu0 %v6214_v29  ;;  %4496 = vmatpush1.bf16.msra.mxu1 %v6216_v30 }
  0x97   :  { %4466 = vmatprep.subr.bf16.mxu0 %v6227_v40  ;;  %4498 = vmatprep.subr.bf16.mxu1 %v6229_v41 }
  0x9a   :  { %4468 = vmatpush1.bf16.msra.mxu0 %v6233_v44  ;;  %4500 = vmatpush1.bf16.msra.mxu1 %v6235_v45 }
  0x9b   :  { %4470 = vmatprep.subr.bf16.mxu0 %v6246_v53  ;;  %4502 = vmatprep.subr.bf16.mxu1 %v6248_v54 }
  0x9e   :  { %4472 = vmatpush1.bf16.msra.mxu0 %v6252_v57  ;;  %4504 = vmatpush1.bf16.msra.mxu1 %v6254_v58 }
  0x9f   :  { %4474 = vmatprep.subr.bf16.mxu0 %v6265_v3  ;;  %4506 = vmatprep.subr.bf16.mxu1 %v6267_v4 }
  0xa2   :  { %4476 = vmatpush1.bf16.msra.mxu0 %v6271_v7  ;;  %4508 = vmatpush1.bf16.msra.mxu1 %v6273_v8 }
  0xa3   :  { %4478 = vmatprep.subr.bf16.mxu0 %v6284_v20  ;;  %4510 = vmatprep.subr.bf16.mxu1 %v6286_v21 }
  0xa6   :  { %4480 = vmatpush1.bf16.msra.mxu0 %v6290_v24  ;;  %4512 = vmatpush1.bf16.msra.mxu1 %v6292_v27 }
  0xa7   :  { %4482 = vmatprep.subr.bf16.mxu0 %v6303_v37  ;;  %4514 = vmatprep.subr.bf16.mxu1 %v6305_v38 }
  0xaa   :  { %4484 = vmatpush1.bf16.msra.mxu0 %v6309_v43  ;;  %4516 = vmatpush1.bf16.msra.mxu1 %v6311_v46 }
  0xab   :  { %4486 = vmatprep.subr.bf16.mxu0 %v6322_v56  ;;  %4518 = vmatprep.subr.bf16.mxu1 %v6324_v59 }
  0xae   :  { %4488 = vmatpush1.bf16.msra.mxu0 %v6328_v60  ;;  %4520 = vmatpush1.bf16.msra.mxu1 %v6330_v61 }
  0xaf   :  { %4522 = vmatprep.subr.bf16.mxu0 %v6189_v9  ;;  %4554 = vmatprep.subr.bf16.mxu1 %v6193_v13  ;;  %v134_v13 = vsub.s32 3, %v6380_v63 }
  0xb1   :  { %v6397_v23 = vrot.slane %v118_v2, %v134_v13 }
 0x164   :  { %v570_v11 = vpop.f32.mrb[0].mxu0  ;;  %v641_v9 = vpop.f32.mrb[0].mxu1 }
 0x165   :  { %v5505_v12 = vadd.f32 %v570_v11, %v6386_v6  ;;  %v572_v15 = vpop.f32.mrb[1].mxu0  ;;  %v643_v16 = vpop.f32.mrb[1].mxu1  ;;  %v5521_v34 = vadd.f32 %v641_v9, %v6403_v32 }
 0x166   :  { %v5506_v18 = vadd.f32 %v572_v15, %v6390_v10  ;;  %v5522_v31 = vadd.f32 %v643_v16, %v6397_v23 }
 0x167   :  { %v4292_v19 = vmul.f32 -1.442695, %v5505_v12 }
 0x168   :  { %v4293_v22 = vmul.f32 -1.442695, %v5506_v18  ;;  %v4294_v33 = vmul.f32 -1.442695, %v5522_v31 }
 0x169   :  { %5646 = vpow2.f32 %v4292_v19 }
 0x16a   :  { %5648 = vpow2.f32 %v4293_v22 }
 0x16b   :  { %5650 = vpow2.f32 %v4294_v33 }
 0x16c   :  { %5652 = vtanh.f32 %v5521_v34 }
 0x173   :  { %v5647_v35 = vpop.eup %5646 }
 0x174   :  { %v5649_v36 = vpop.eup %5648  ;;  %v653_v39 = vadd.f32 1.0, %v5647_v35 }
 0x175   :  { %v659_v42 = vadd.f32 1.0, %v5649_v36  ;;  %v5651_v47 = vpop.eup %5650 }
 0x176   :  { %5654 = vrcp.f32 %v653_v39  ;;  %v5653_v48 = vpop.eup %5652  ;;  %v666_v52 = vadd.f32 1.0, %v5651_v47 }
 0x177   :  { %5656 = vrcp.f32 %v659_v42 }
 0x178   :  { %5658 = vrcp.f32 %v666_v52 }
 0x180   :  { %v5655_v49 = vpop.eup %5654 }
 0x181   :  { %v5657_v50 = vpop.eup %5656  ;;  %v670_v51 = vmul.f32 %v5655_v49, %v5653_v48 }
 0x182   :  { %v669_v55 = vmul.f32 0.0, %v5657_v50  ;;  %v5659_v2 = vpop.eup %5658 }
 0x184   :  { %v6406_v62 = vadd.f32 %v670_v51, %v669_v55 }
 0x186   :  { %5660 = vtanh.f32 %v6406_v62 }
 0x190   :  { %v5661_v11 = vpop.eup %5660 }
 0x191   :  { %v6409_v9 = vmul.f32 %v5661_v11, %v5659_v2  ;;  %v1163_v2 = vld [vmem:[#allocation6 + $0x8] sm:$0xff] }
 0x192   :  { %v1167_v11 = vld [vmem:[#allocation6 + $0x28] sm:$0xff] }
 0x193   :  { %809 = vmatmul.mubr.f32.vlgmr.msra.gmra.mrb[2].mxu0 %v6409_v9  ;;  %880 = vmatmul.mubr.f32.vlgmr.msra.gmra.mrb[2].mxu1 %v6409_v9 }
 0x194   :  { %4524 = vmatpush1.bf16.msra.mxu0 %v6195_v14  ;;  %4556 = vmatpush1.bf16.msra.mxu1 %v6199_v17 }
 0x195   :  { %4526 = vmatprep.subr.bf16.mxu0 %v6208_v25  ;;  %4558 = vmatprep.subr.bf16.mxu1 %v6210_v26 }
 0x196   :  { %1049 = vmatprep.mubr.f32.mxu0 %v6050_v0  ;;  %1120 = vmatprep.mubr.f32.mxu1 %v6050_v0 }
 0x198   :  { %4528 = vmatpush1.bf16.msra.mxu0 %v6214_v29  ;;  %4560 = vmatpush1.bf16.msra.mxu1 %v6216_v30 }
 0x199   :  { %4530 = vmatprep.subr.bf16.mxu0 %v6227_v40  ;;  %4562 = vmatprep.subr.bf16.mxu1 %v6229_v41 }
 0x19c   :  { %4532 = vmatpush1.bf16.msra.mxu0 %v6233_v44  ;;  %4564 = vmatpush1.bf16.msra.mxu1 %v6235_v45 }
 0x19d   :  { %4534 = vmatprep.subr.bf16.mxu0 %v6246_v53  ;;  %4566 = vmatprep.subr.bf16.mxu1 %v6248_v54 }
 0x1a0   :  { %4536 = vmatpush1.bf16.msra.mxu0 %v6252_v57  ;;  %4568 = vmatpush1.bf16.msra.mxu1 %v6254_v58 }
 0x1a1   :  { %4538 = vmatprep.subr.bf16.mxu0 %v6265_v3  ;;  %4570 = vmatprep.subr.bf16.mxu1 %v6267_v4 }
 0x1a4   :  { %4540 = vmatpush1.bf16.msra.mxu0 %v6271_v7  ;;  %4572 = vmatpush1.bf16.msra.mxu1 %v6273_v8 }
 0x1a5   :  { %4542 = vmatprep.subr.bf16.mxu0 %v6284_v20  ;;  %4574 = vmatprep.subr.bf16.mxu1 %v6286_v21 }
 0x1a8   :  { %4544 = vmatpush1.bf16.msra.mxu0 %v6290_v24  ;;  %4576 = vmatpush1.bf16.msra.mxu1 %v6292_v27 }
 0x1a9   :  { %4546 = vmatprep.subr.bf16.mxu0 %v6303_v37  ;;  %4578 = vmatprep.subr.bf16.mxu1 %v6305_v38 }
 0x1ac   :  { %4548 = vmatpush1.bf16.msra.mxu0 %v6309_v43  ;;  %4580 = vmatpush1.bf16.msra.mxu1 %v6311_v46 }
 0x1ad   :  { %4550 = vmatprep.subr.bf16.mxu0 %v6322_v56  ;;  %4582 = vmatprep.subr.bf16.mxu1 %v6324_v59 }
 0x1b0   :  { %4552 = vmatpush1.bf16.msra.mxu0 %v6328_v60  ;;  %4584 = vmatpush1.bf16.msra.mxu1 %v6330_v61 }
 0x266   :  { %v810_v14 = vpop.f32.mrb[2].mxu0  ;;  %v881_v17 = vpop.f32.mrb[2].mxu1 }
 0x267   :  { %v5507_v25 = vadd.f32 %v810_v14, %v6386_v6  ;;  %v812_v26 = vpop.f32.mrb[3].mxu0  ;;  %v883_v29 = vpop.f32.mrb[3].mxu1  ;;  %v5523_v19 = vadd.f32 %v881_v17, %v6403_v32  ;;  %v6459_v14 = vpack.c.bf16 %v1167_v11, %v1163_v2  ;;  %v1169_v17 = vld [vmem:[#allocation6 + $0x38] sm:$0xff] }
 0x268   :  { %v5508_v30 = vadd.f32 %v812_v26, %v6390_v10  ;;  %v5524_v16 = vadd.f32 %v883_v29, %v6397_v23  ;;  %v1166_v26 = vld [vmem:[#allocation6 + $0x20] sm:$0xff]  ;;  %v1422_v2 = vld [vmem:[#allocation6 + $0x98] sm:$0xff] }
 0x269   :  { %v4295_v12 = vmul.f32 -1.442695, %v5507_v25  ;;  %v1162_v25 = vld [vmem:[#allocation6] sm:$0xff]  ;;  %4586 = vmatprep.subr.bf16.mxu0 %v6459_v14 }
 0x26a   :  { %v4296_v15 = vmul.f32 -1.442695, %v5508_v30  ;;  %v4297_v18 = vmul.f32 -1.442695, %v5524_v16  ;;  %v6463_v30 = vpack.c.bf16 %v1166_v26, %v1162_v25  ;;  %v1423_v25 = vld [vmem:[#allocation6 + $0xa0] sm:$0xff] }
 0x26b   :  { %5662 = vpow2.f32 %v4295_v12  ;;  %v1164_v12 = vld [vmem:[#allocation6 + $0x10] sm:$0xff] }
 0x26c   :  { %5664 = vpow2.f32 %v4296_v15  ;;  %v1168_v15 = vld [vmem:[#allocation6 + $0x30] sm:$0xff] }
 0x26d   :  { %5666 = vpow2.f32 %v4297_v18  ;;  %v6466_v16 = vpack.c.bf16 %v1168_v15, %v1164_v12  ;;  %v1171_v18 = vld [vmem:[#allocation6 + $0x48] sm:$0xff]  ;;  %v1421_v15 = vld [vmem:[#allocation6 + $0x90] sm:$0xff] }
 0x26e   :  { %5668 = vtanh.f32 %v5523_v19  ;;  %v1175_v19 = vld [vmem:[#allocation6 + $0x68] sm:$0xff] }
 0x275   :  { %v5663_v22 = vpop.eup %5662 }
 0x276   :  { %v5665_v31 = vpop.eup %5664  ;;  %v893_v33 = vadd.f32 1.0, %v5663_v22  ;;  %v1173_v22 = vld [vmem:[#allocation6 + $0x58] sm:$0xff] }
 0x277   :  { %v899_v34 = vadd.f32 1.0, %v5665_v31  ;;  %v5667_v35 = vpop.eup %5666  ;;  %v6471_v31 = vpack.c.bf16 %v1175_v19, %v1171_v18  ;;  %v1425_v18 = vld [vmem:[#allocation6 + $0xb0] sm:$0xff] }
 0x278   :  { %5670 = vrcp.f32 %v893_v33  ;;  %v5669_v36 = vpop.eup %5668  ;;  %v906_v48 = vadd.f32 1.0, %v5667_v35  ;;  %v1177_v33 = vld [vmem:[#allocation6 + $0x78] sm:$0xff]  ;;  %v1174_v35 = vld [vmem:[#allocation6 + $0x60] sm:$0xff]  ;;  %v6536_v19 = vpack.c.bf16 %v1425_v18, %v1421_v15  ;;  %v1456_v18 = vld [vmem:[#allocation6 + $0x1a8] sm:$0xff] }
 0x279   :  { %5672 = vrcp.f32 %v899_v34  ;;  %v1170_v34 = vld [vmem:[#allocation6 + $0x40] sm:$0xff] }
 0x27a   :  { %5674 = vrcp.f32 %v906_v48 }
 0x282   :  { %v5671_v39 = vpop.eup %5670 }
 0x283   :  { %v5673_v42 = vpop.eup %5672  ;;  %v910_v47 = vmul.f32 %v5671_v39, %v5669_v36  ;;  %v6473_v36 = vpack.c.bf16 %v1177_v33, %v1173_v22  ;;  %v6475_v39 = vpack.c.bf16 %v1174_v35, %v1170_v34  ;;  %v1428_v22 = vld [vmem:[#allocation6 + $0xc8] sm:$0xff]  ;;  %v1430_v34 = vld [vmem:[#allocation6 + $0xd8] sm:$0xff] }
 0x284   :  { %v909_v49 = vmul.f32 %v5673_v42, %v6406_v62  ;;  %v5675_v51 = vpop.eup %5674  ;;  %v1165_v62 = vld [vmem:[#allocation6 + $0x18] sm:$0xff]  ;;  %v1172_v42 = vld [vmem:[#allocation6 + $0x50] sm:$0xff]  ;;  %v1432_v33 = vld [vmem:[#allocation6 + $0xe8] sm:$0xff] }
 0x285   :  { %v6461_v29 = vpack.c.bf16 %v1169_v17, %v1165_v62  ;;  %v1426_v62 = vld [vmem:[#allocation6 + $0xb8] sm:$0xff]  ;;  %v1419_v17 = vld [vmem:[#allocation6 + $0x80] sm:$0xff]  ;;  %v6541_v35 = vpack.c.bf16 %v1432_v33, %v1428_v22 }
 0x286   :  { %v6450_v50 = vadd.f32 %v910_v47, %v909_v49  ;;  %v1176_v47 = vld [vmem:[#allocation6 + $0x70] sm:$0xff]  ;;  %v6531_v26 = vpack.c.bf16 %v1426_v62, %v1422_v2  ;;  %v6533_v12 = vpack.c.bf16 %v1423_v25, %v1419_v17  ;;  %v1452_v25 = vld [vmem:[#allocation6 + $0x188] sm:$0xff]  ;;  %v1454_v22 = vld [vmem:[#allocation6 + $0x198] sm:$0xff] }
 0x287   :  { %4618 = vmatprep.subr.bf16.mxu1 %v6461_v29  ;;  %v6478_v48 = vpack.c.bf16 %v1176_v47, %v1172_v42  ;;  %v1434_v42 = vld [vmem:[#allocation6 + $0xf8] sm:$0xff]  ;;  %v1427_v47 = vld [vmem:[#allocation6 + $0xc0] sm:$0xff]  ;;  %v1445_v62 = vld [vmem:[#allocation6 + $0x150] sm:$0xff] }
 0x288   :  { %5676 = vtanh.f32 %v6450_v50  ;;  %v1449_v17 = vld [vmem:[#allocation6 + $0x170] sm:$0xff]  ;;  %v1458_v33 = vld [vmem:[#allocation6 + $0x1b8] sm:$0xff] }
 0x289   :  { %v6572_v15 = vpack.c.bf16 %v1449_v17, %v1445_v62 }
 0x292   :  { %v5677_v52 = vpop.eup %5676 }
 0x293   :  { %v6453_v55 = vmul.f32 %v5677_v52, %v5675_v51  ;;  %v1424_v52 = vld [vmem:[#allocation6 + $0xa8] sm:$0xff] }
 0x295   :  { %1050 = vmatmul.mubr.f32.vlgmr.msra.gmra.mrb[4].mxu0 %v6453_v55  ;;  %1121 = vmatmul.mubr.f32.vlgmr.msra.gmra.mrb[4].mxu1 %v6453_v55 }
 0x296   :  { %1290 = vmatprep.mubr.f32.mxu0 %v6050_v0  ;;  %1361 = vmatprep.mubr.f32.mxu1 %v6050_v0 }
 0x297   :  { %4588 = vmatpush1.bf16.msra.mxu0 %v6463_v30  ;;  %4620 = vmatpush1.bf16.msra.mxu1 %v6466_v16 }
 0x298   :  { %4590 = vmatprep.subr.bf16.mxu0 %v6471_v31  ;;  %4622 = vmatprep.subr.bf16.mxu1 %v6473_v36 }
 0x29b   :  { %4592 = vmatpush1.bf16.msra.mxu0 %v6475_v39  ;;  %4624 = vmatpush1.bf16.msra.mxu1 %v6478_v48 }
 0x29c   :  { %4594 = vmatprep.subr.bf16.mxu0 %v6227_v40  ;;  %4626 = vmatprep.subr.bf16.mxu1 %v6229_v41 }
 0x29f   :  { %4596 = vmatpush1.bf16.msra.mxu0 %v6233_v44  ;;  %4628 = vmatpush1.bf16.msra.mxu1 %v6235_v45 }
 0x2a0   :  { %4598 = vmatprep.subr.bf16.mxu0 %v6246_v53  ;;  %4630 = vmatprep.subr.bf16.mxu1 %v6248_v54 }
 0x2a3   :  { %4600 = vmatpush1.bf16.msra.mxu0 %v6252_v57  ;;  %4632 = vmatpush1.bf16.msra.mxu1 %v6254_v58 }
 0x2a4   :  { %4602 = vmatprep.subr.bf16.mxu0 %v6265_v3  ;;  %4634 = vmatprep.subr.bf16.mxu1 %v6267_v4 }
 0x2a7   :  { %4604 = vmatpush1.bf16.msra.mxu0 %v6271_v7  ;;  %4636 = vmatpush1.bf16.msra.mxu1 %v6273_v8 }
 0x2a8   :  { %4606 = vmatprep.subr.bf16.mxu0 %v6284_v20  ;;  %4638 = vmatprep.subr.bf16.mxu1 %v6286_v21 }
 0x2ab   :  { %4608 = vmatpush1.bf16.msra.mxu0 %v6290_v24  ;;  %4640 = vmatpush1.bf16.msra.mxu1 %v6292_v27 }
 0x2ac   :  { %4610 = vmatprep.subr.bf16.mxu0 %v6303_v37  ;;  %4642 = vmatprep.subr.bf16.mxu1 %v6305_v38 }
 0x2af   :  { %4612 = vmatpush1.bf16.msra.mxu0 %v6309_v43  ;;  %4644 = vmatpush1.bf16.msra.mxu1 %v6311_v46 }
 0x2b0   :  { %4614 = vmatprep.subr.bf16.mxu0 %v6322_v56  ;;  %4646 = vmatprep.subr.bf16.mxu1 %v6324_v59 }
 0x2b3   :  { %4616 = vmatpush1.bf16.msra.mxu0 %v6328_v60  ;;  %4648 = vmatpush1.bf16.msra.mxu1 %v6330_v61 }
 0x2b4   :  { %4650 = vmatprep.subr.bf16.mxu0 %v6459_v14  ;;  %4682 = vmatprep.subr.bf16.mxu1 %v6461_v29 }
 0x368   :  { %v1051_v40 = vpop.f32.mrb[4].mxu0  ;;  %v1122_v41 = vpop.f32.mrb[4].mxu1 }
 0x369   :  { %v5509_v44 = vadd.f32 %v1051_v40, %v6386_v6  ;;  %v1053_v45 = vpop.f32.mrb[5].mxu0  ;;  %v1124_v53 = vpop.f32.mrb[5].mxu1  ;;  %v5525_v7 = vadd.f32 %v1122_v41, %v6403_v32  ;;  %v1431_v40 = vld [vmem:[#allocation6 + $0xe0] sm:$0xff]  ;;  %v6543_v41 = vpack.c.bf16 %v1434_v42, %v1430_v34  ;;  %v6575_v34 = vpack.c.bf16 %v1456_v18, %v1452_v25 }
 0x36a   :  { %v5510_v54 = vadd.f32 %v1053_v45, %v6390_v10  ;;  %v5526_v3 = vadd.f32 %v1124_v53, %v6397_v23  ;;  %v1429_v45 = vld [vmem:[#allocation6 + $0xd0] sm:$0xff]  ;;  %v6577_v42 = vpack.c.bf16 %v1458_v33, %v1454_v22 }
 0x36b   :  { %v4298_v57 = vmul.f32 -1.442695, %v5509_v44  ;;  %v6545_v44 = vpack.c.bf16 %v1431_v40, %v1427_v47  ;;  %v1433_v53 = vld [vmem:[#allocation6 + $0xf0] sm:$0xff]  ;;  %v1451_v47 = vld [vmem:[#allocation6 + $0x180] sm:$0xff] }
 0x36c   :  { %v4299_v58 = vmul.f32 -1.442695, %v5510_v54  ;;  %v4300_v4 = vmul.f32 -1.442695, %v5526_v3  ;;  %v6548_v54 = vpack.c.bf16 %v1433_v53, %v1429_v45  ;;  %v1438_v3 = vld [vmem:[#allocation6 + $0x118] sm:$0xff]  ;;  %v1455_v40 = vld [vmem:[#allocation6 + $0x1a0] sm:$0xff] }
 0x36d   :  { %5678 = vpow2.f32 %v4298_v57  ;;  %v1436_v57 = vld [vmem:[#allocation6 + $0x108] sm:$0xff]  ;;  %v1453_v45 = vld [vmem:[#allocation6 + $0x190] sm:$0xff]  ;;  %v6580_v53 = vpack.c.bf16 %v1455_v40, %v1451_v47 }
 0x36e   :  { %5680 = vpow2.f32 %v4299_v58  ;;  %v1440_v58 = vld [vmem:[#allocation6 + $0x128] sm:$0xff] }
 0x36f   :  { %5682 = vpow2.f32 %v4300_v4  ;;  %v6553_v4 = vpack.c.bf16 %v1440_v58, %v1436_v57  ;;  %v1457_v57 = vld [vmem:[#allocation6 + $0x1b0] sm:$0xff]  ;;  %v1460_v58 = vld [vmem:[#allocation6 + $0x1c8] sm:$0xff] }
 0x370   :  { %5684 = vtanh.f32 %v5525_v7  ;;  %v1442_v7 = vld [vmem:[#allocation6 + $0x138] sm:$0xff] }
 0x377   :  { %v5679_v8 = vpop.eup %5678 }
 0x378   :  { %v5681_v20 = vpop.eup %5680  ;;  %v1134_v21 = vadd.f32 1.0, %v5679_v8  ;;  %v1435_v8 = vld [vmem:[#allocation6 + $0x100] sm:$0xff] }
 0x379   :  { %v1140_v24 = vadd.f32 1.0, %v5681_v20  ;;  %v5683_v27 = vpop.eup %5682  ;;  %v1439_v20 = vld [vmem:[#allocation6 + $0x120] sm:$0xff] }
 0x37a   :  { %5686 = vrcp.f32 %v1134_v21  ;;  %v5685_v37 = vpop.eup %5684  ;;  %v1147_v56 = vadd.f32 1.0, %v5683_v27  ;;  %v6555_v21 = vpack.c.bf16 %v1442_v7, %v1438_v3  ;;  %v1437_v27 = vld [vmem:[#allocation6 + $0x110] sm:$0xff]  ;;  %v1464_v3 = vld [vmem:[#allocation6 + $0x1e8] sm:$0xff]  ;;  %v6584_v7 = vpack.c.bf16 %v1457_v57, %v1453_v45 }
 0x37b   :  { %5688 = vrcp.f32 %v1140_v24  ;;  %v6557_v24 = vpack.c.bf16 %v1439_v20, %v1435_v8  ;;  %v6586_v8 = vpack.c.bf16 %v1464_v3, %v1460_v58  ;;  %v1462_v20 = vld [vmem:[#allocation6 + $0x1d8] sm:$0xff] }
 0x37c   :  { %5690 = vrcp.f32 %v1147_v56  ;;  %v1446_v56 = vld [vmem:[#allocation6 + $0x158] sm:$0xff] }
 0x384   :  { %v5687_v38 = vpop.eup %5686 }
 0x385   :  { %v5689_v43 = vpop.eup %5688  ;;  %v1151_v46 = vmul.f32 %v5687_v38, %v5685_v37  ;;  %v1441_v37 = vld [vmem:[#allocation6 + $0x130] sm:$0xff] }
 0x386   :  { %v1150_v59 = vmul.f32 %v5689_v43, %v6450_v50  ;;  %v5691_v61 = vpop.eup %5690  ;;  %v1420_v50 = vld [vmem:[#allocation6 + $0x88] sm:$0xff]  ;;  %v6560_v38 = vpack.c.bf16 %v1441_v37, %v1437_v27  ;;  %v1466_v27 = vld [vmem:[#allocation6 + $0x1f8] sm:$0xff]  ;;  %v1459_v37 = vld [vmem:[#allocation6 + $0x1c0] sm:$0xff] }
 0x387   :  { %v6529_v11 = vpack.c.bf16 %v1424_v52, %v1420_v50  ;;  %v1444_v43 = vld [vmem:[#allocation6 + $0x148] sm:$0xff]  ;;  %v1447_v50 = vld [vmem:[#allocation6 + $0x160] sm:$0xff] }
 0x388   :  { %v6514_v60 = vadd.f32 %v1151_v46, %v1150_v59  ;;  %v1448_v46 = vld [vmem:[#allocation6 + $0x168] sm:$0xff] }
 0x389   :  { %v6564_v59 = vpack.c.bf16 %v1448_v46, %v1444_v43  ;;  %v6589_v43 = vpack.c.bf16 %v1466_v27, %v1462_v20  ;;  %v1463_v46 = vld [vmem:[#allocation6 + $0x1e0] sm:$0xff] }
 0x38a   :  { %5692 = vtanh.f32 %v6514_v60 }
 0x394   :  { %v5693_v49 = vpop.eup %5692 }
 0x395   :  { %v6517_v51 = vmul.f32 %v5693_v49, %v5691_v61  ;;  %v1450_v61 = vld [vmem:[#allocation6 + $0x178] sm:$0xff]  ;;  %v1443_v49 = vld [vmem:[#allocation6 + $0x140] sm:$0xff] }
 0x396   :  { %v6567_v52 = vpack.c.bf16 %v1450_v61, %v1446_v56  ;;  %v6569_v2 = vpack.c.bf16 %v1447_v50, %v1443_v49  ;;  %v1461_v56 = vld [vmem:[#allocation6 + $0x1d0] sm:$0xff]  ;;  %v6592_v49 = vpack.c.bf16 %v1463_v46, %v1459_v37 }
 0x397   :  { %1291 = vmatmul.mubr.f32.vlgmr.msra.gmra.mrb[6].mxu0 %v6517_v51  ;;  %1362 = vmatmul.mubr.f32.vlgmr.msra.gmra.mrb[6].mxu1 %v6517_v51  ;;  %v1465_v61 = vld [vmem:[#allocation6 + $0x1f0] sm:$0xff] }
 0x398   :  { %4652 = vmatpush1.bf16.msra.mxu0 %v6463_v30  ;;  %4684 = vmatpush1.bf16.msra.mxu1 %v6466_v16  ;;  %v6596_v50 = vpack.c.bf16 %v1465_v61, %v1461_v56 }
 0x399   :  { %4654 = vmatprep.subr.bf16.mxu0 %v6471_v31  ;;  %4686 = vmatprep.subr.bf16.mxu1 %v6473_v36 }
 0x39a   :  { %1531 = vmatprep.mubr.f32.mxu0 %v6050_v0  ;;  %1602 = vmatprep.mubr.f32.mxu1 %v6050_v0 }
 0x39c   :  { %4656 = vmatpush1.bf16.msra.mxu0 %v6475_v39  ;;  %4688 = vmatpush1.bf16.msra.mxu1 %v6478_v48 }
 0x39d   :  { %4658 = vmatprep.subr.bf16.mxu0 %v6529_v11  ;;  %4690 = vmatprep.subr.bf16.mxu1 %v6531_v26 }
 0x3a0   :  { %4660 = vmatpush1.bf16.msra.mxu0 %v6533_v12  ;;  %4692 = vmatpush1.bf16.msra.mxu1 %v6536_v19 }
 0x3a1   :  { %4662 = vmatprep.subr.bf16.mxu0 %v6541_v35  ;;  %4694 = vmatprep.subr.bf16.mxu1 %v6543_v41 }
 0x3a4   :  { %4664 = vmatpush1.bf16.msra.mxu0 %v6545_v44  ;;  %4696 = vmatpush1.bf16.msra.mxu1 %v6548_v54 }
 0x3a5   :  { %4666 = vmatprep.subr.bf16.mxu0 %v6553_v4  ;;  %4698 = vmatprep.subr.bf16.mxu1 %v6555_v21 }
 0x3a8   :  { %4668 = vmatpush1.bf16.msra.mxu0 %v6557_v24  ;;  %4700 = vmatpush1.bf16.msra.mxu1 %v6560_v38 }
 0x3a9   :  { %4670 = vmatprep.subr.bf16.mxu0 %v6564_v59  ;;  %4702 = vmatprep.subr.bf16.mxu1 %v6567_v52 }
 0x3ac   :  { %4672 = vmatpush1.bf16.msra.mxu0 %v6569_v2  ;;  %4704 = vmatpush1.bf16.msra.mxu1 %v6572_v15 }
 0x3ad   :  { %4674 = vmatprep.subr.bf16.mxu0 %v6575_v34  ;;  %4706 = vmatprep.subr.bf16.mxu1 %v6577_v42 }
 0x3b0   :  { %4676 = vmatpush1.bf16.msra.mxu0 %v6580_v53  ;;  %4708 = vmatpush1.bf16.msra.mxu1 %v6584_v7 }
 0x3b1   :  { %4678 = vmatprep.subr.bf16.mxu0 %v6586_v8  ;;  %4710 = vmatprep.subr.bf16.mxu1 %v6589_v43 }
 0x3b4   :  { %4680 = vmatpush1.bf16.msra.mxu0 %v6592_v49  ;;  %4712 = vmatpush1.bf16.msra.mxu1 %v6596_v50 }
 0x3b5   :  { %4714 = vmatprep.subr.bf16.mxu0 %v6459_v14  ;;  %4746 = vmatprep.subr.bf16.mxu1 %v6461_v29 }
 0x46a   :  { %v1292_v62 = vpop.f32.mrb[6].mxu0  ;;  %v1363_v17 = vpop.f32.mrb[6].mxu1 }
 0x46b   :  { %v5511_v25 = vadd.f32 %v1292_v62, %v6386_v6  ;;  %v1294_v18 = vpop.f32.mrb[7].mxu0  ;;  %v1365_v22 = vpop.f32.mrb[7].mxu1  ;;  %v5527_v58 = vadd.f32 %v1363_v17, %v6403_v32 }
 0x46c   :  { %v5512_v33 = vadd.f32 %v1294_v18, %v6390_v10  ;;  %v5528_v45 = vadd.f32 %v1365_v22, %v6397_v23 }
 0x46d   :  { %v4301_v47 = vmul.f32 -1.442695, %v5511_v25 }
 0x46e   :  { %v4302_v40 = vmul.f32 -1.442695, %v5512_v33  ;;  %v4303_v57 = vmul.f32 -1.442695, %v5528_v45 }
 0x46f   :  { %5694 = vpow2.f32 %v4301_v47 }
 0x470   :  { %5696 = vpow2.f32 %v4302_v40 }
 0x471   :  { %5698 = vpow2.f32 %v4303_v57 }
 0x472   :  { %5700 = vtanh.f32 %v5527_v58 }
 0x479   :  { %v5695_v3 = vpop.eup %5694 }
 0x47a   :  { %v5697_v20 = vpop.eup %5696  ;;  %v1375_v27 = vadd.f32 1.0, %v5695_v3 }
 0x47b   :  { %v1381_v37 = vadd.f32 1.0, %v5697_v20  ;;  %v5699_v46 = vpop.eup %5698 }
 0x47c   :  { %5702 = vrcp.f32 %v1375_v27  ;;  %v5701_v56 = vpop.eup %5700  ;;  %v1388_v18 = vadd.f32 1.0, %v5699_v46 }
 0x47d   :  { %5704 = vrcp.f32 %v1381_v37 }
 0x47e   :  { %5706 = vrcp.f32 %v1388_v18 }
 0x486   :  { %v5703_v61 = vpop.eup %5702 }
 0x487   :  { %v5705_v62 = vpop.eup %5704  ;;  %v1392_v25 = vmul.f32 %v5703_v61, %v5701_v56 }
 0x488   :  { %v1391_v33 = vmul.f32 %v5705_v62, %v6514_v60  ;;  %v5707_v17 = vpop.eup %5706 }
 0x48a   :  { %v6608_v22 = vadd.f32 %v1392_v25, %v1391_v33 }
 0x48c   :  { %5708 = vtanh.f32 %v6608_v22 }
 0x496   :  { %v5709_v47 = vpop.eup %5708 }
 0x497   :  { %v6611_v40 = vmul.f32 %v5709_v47, %v5707_v17 }
 0x499   :  { %1532 = vmatmul.mubr.f32.vlgmr.msra.gmra.mrb[8].mxu0 %v6611_v40  ;;  %1603 = vmatmul.mubr.f32.vlgmr.msra.gmra.mrb[8].mxu1 %v6611_v40 }
 0x49a   :  { %4716 = vmatpush1.bf16.msra.mxu0 %v6463_v30  ;;  %4748 = vmatpush1.bf16.msra.mxu1 %v6466_v16 }
 0x49b   :  { %4718 = vmatprep.subr.bf16.mxu0 %v6471_v31  ;;  %4750 = vmatprep.subr.bf16.mxu1 %v6473_v36 }
 0x49c   :  { %1772 = vmatprep.mubr.f32.mxu0 %v6050_v0  ;;  %1843 = vmatprep.mubr.f32.mxu1 %v6050_v0 }
 0x49e   :  { %4720 = vmatpush1.bf16.msra.mxu0 %v6475_v39  ;;  %4752 = vmatpush1.bf16.msra.mxu1 %v6478_v48 }
 0x49f   :  { %4722 = vmatprep.subr.bf16.mxu0 %v6529_v11  ;;  %4754 = vmatprep.subr.bf16.mxu1 %v6531_v26 }
 0x4a2   :  { %4724 = vmatpush1.bf16.msra.mxu0 %v6533_v12  ;;  %4756 = vmatpush1.bf16.msra.mxu1 %v6536_v19 }
 0x4a3   :  { %4726 = vmatprep.subr.bf16.mxu0 %v6541_v35  ;;  %4758 = vmatprep.subr.bf16.mxu1 %v6543_v41 }
 0x4a6   :  { %4728 = vmatpush1.bf16.msra.mxu0 %v6545_v44  ;;  %4760 = vmatpush1.bf16.msra.mxu1 %v6548_v54 }
 0x4a7   :  { %4730 = vmatprep.subr.bf16.mxu0 %v6553_v4  ;;  %4762 = vmatprep.subr.bf16.mxu1 %v6555_v21 }
 0x4aa   :  { %4732 = vmatpush1.bf16.msra.mxu0 %v6557_v24  ;;  %4764 = vmatpush1.bf16.msra.mxu1 %v6560_v38 }
 0x4ab   :  { %4734 = vmatprep.subr.bf16.mxu0 %v6564_v59  ;;  %4766 = vmatprep.subr.bf16.mxu1 %v6567_v52 }
 0x4ae   :  { %4736 = vmatpush1.bf16.msra.mxu0 %v6569_v2  ;;  %4768 = vmatpush1.bf16.msra.mxu1 %v6572_v15 }
 0x4af   :  { %4738 = vmatprep.subr.bf16.mxu0 %v6575_v34  ;;  %4770 = vmatprep.subr.bf16.mxu1 %v6577_v42 }
 0x4b2   :  { %4740 = vmatpush1.bf16.msra.mxu0 %v6580_v53  ;;  %4772 = vmatpush1.bf16.msra.mxu1 %v6584_v7 }
 0x4b3   :  { %4742 = vmatprep.subr.bf16.mxu0 %v6586_v8  ;;  %4774 = vmatprep.subr.bf16.mxu1 %v6589_v43 }
 0x4b6   :  { %4744 = vmatpush1.bf16.msra.mxu0 %v6592_v49  ;;  %4776 = vmatpush1.bf16.msra.mxu1 %v6596_v50 }
 0x4b7   :  { %4778 = vmatprep.subr.bf16.mxu0 %v6459_v14  ;;  %4810 = vmatprep.subr.bf16.mxu1 %v6461_v29 }
 0x56c   :  { %v1533_v60 = vpop.f32.mrb[8].mxu0  ;;  %v1604_v45 = vpop.f32.mrb[8].mxu1 }
 0x56d   :  { %v5513_v57 = vadd.f32 %v1533_v60, %v6386_v6  ;;  %v1535_v58 = vpop.f32.mrb[9].mxu0  ;;  %v1606_v3 = vpop.f32.mrb[9].mxu1  ;;  %v5529_v61 = vadd.f32 %v1604_v45, %v6403_v32 }
 0x56e   :  { %v5514_v20 = vadd.f32 %v1535_v58, %v6390_v10  ;;  %v5530_v46 = vadd.f32 %v1606_v3, %v6397_v23 }
 0x56f   :  { %v4304_v27 = vmul.f32 -1.442695, %v5513_v57 }
 0x570   :  { %v4305_v37 = vmul.f32 -1.442695, %v5514_v20  ;;  %v4306_v56 = vmul.f32 -1.442695, %v5530_v46 }
 0x571   :  { %5710 = vpow2.f32 %v4304_v27 }
 0x572   :  { %5712 = vpow2.f32 %v4305_v37 }
 0x573   :  { %5714 = vpow2.f32 %v4306_v56 }
 0x574   :  { %5716 = vtanh.f32 %v5529_v61 }
 0x57b   :  { %v5711_v14 = vpop.eup %5710 }
 0x57c   :  { %v5713_v62 = vpop.eup %5712  ;;  %v1616_v29 = vadd.f32 1.0, %v5711_v14 }
 0x57d   :  { %v1622_v25 = vadd.f32 1.0, %v5713_v62  ;;  %v5715_v18 = vpop.eup %5714 }
 0x57e   :  { %5718 = vrcp.f32 %v1616_v29  ;;  %v5717_v33 = vpop.eup %5716  ;;  %v1629_v57 = vadd.f32 1.0, %v5715_v18 }
 0x57f   :  { %5720 = vrcp.f32 %v1622_v25 }
 0x580   :  { %5722 = vrcp.f32 %v1629_v57 }
 0x588   :  { %v5719_v17 = vpop.eup %5718 }
 0x589   :  { %v5721_v47 = vpop.eup %5720  ;;  %v1633_v60 = vmul.f32 %v5719_v17, %v5717_v33 }
 0x58a   :  { %v1632_v58 = vmul.f32 %v5721_v47, %v6608_v22  ;;  %v5723_v45 = vpop.eup %5722 }
 0x58c   :  { %v6654_v3 = vadd.f32 %v1633_v60, %v1632_v58 }
 0x58e   :  { %5724 = vtanh.f32 %v6654_v3 }
 0x598   :  { %v5725_v20 = vpop.eup %5724 }
 0x599   :  { %v6657_v27 = vmul.f32 %v5725_v20, %v5723_v45 }
 0x59b   :  { %1773 = vmatmul.mubr.f32.vlgmr.msra.gmra.mrb[10].mxu0 %v6657_v27  ;;  %1844 = vmatmul.mubr.f32.vlgmr.msra.gmra.mrb[10].mxu1 %v6657_v27 }
 0x59c   :  { %4780 = vmatpush1.bf16.msra.mxu0 %v6463_v30  ;;  %4812 = vmatpush1.bf16.msra.mxu1 %v6466_v16 }
 0x59d   :  { %4782 = vmatprep.subr.bf16.mxu0 %v6471_v31  ;;  %4814 = vmatprep.subr.bf16.mxu1 %v6473_v36 }
 0x59e   :  { %2013 = vmatprep.mubr.f32.mxu0 %v6050_v0  ;;  %2084 = vmatprep.mubr.f32.mxu1 %v6050_v0 }
 0x5a0   :  { %4784 = vmatpush1.bf16.msra.mxu0 %v6475_v39  ;;  %4816 = vmatpush1.bf16.msra.mxu1 %v6478_v48 }
 0x5a1   :  { %4786 = vmatprep.subr.bf16.mxu0 %v6529_v11  ;;  %4818 = vmatprep.subr.bf16.mxu1 %v6531_v26 }
 0x5a4   :  { %4788 = vmatpush1.bf16.msra.mxu0 %v6533_v12  ;;  %4820 = vmatpush1.bf16.msra.mxu1 %v6536_v19 }
 0x5a5   :  { %4790 = vmatprep.subr.bf16.mxu0 %v6541_v35  ;;  %4822 = vmatprep.subr.bf16.mxu1 %v6543_v41 }
 0x5a8   :  { %4792 = vmatpush1.bf16.msra.mxu0 %v6545_v44  ;;  %4824 = vmatpush1.bf16.msra.mxu1 %v6548_v54 }
 0x5a9   :  { %4794 = vmatprep.subr.bf16.mxu0 %v6553_v4  ;;  %4826 = vmatprep.subr.bf16.mxu1 %v6555_v21 }
 0x5ac   :  { %4796 = vmatpush1.bf16.msra.mxu0 %v6557_v24  ;;  %4828 = vmatpush1.bf16.msra.mxu1 %v6560_v38 }
 0x5ad   :  { %4798 = vmatprep.subr.bf16.mxu0 %v6564_v59  ;;  %4830 = vmatprep.subr.bf16.mxu1 %v6567_v52 }
 0x5b0   :  { %4800 = vmatpush1.bf16.msra.mxu0 %v6569_v2  ;;  %4832 = vmatpush1.bf16.msra.mxu1 %v6572_v15 }
 0x5b1   :  { %4802 = vmatprep.subr.bf16.mxu0 %v6575_v34  ;;  %4834 = vmatprep.subr.bf16.mxu1 %v6577_v42 }
 0x5b4   :  { %4804 = vmatpush1.bf16.msra.mxu0 %v6580_v53  ;;  %4836 = vmatpush1.bf16.msra.mxu1 %v6584_v7 }
 0x5b5   :  { %4806 = vmatprep.subr.bf16.mxu0 %v6586_v8  ;;  %4838 = vmatprep.subr.bf16.mxu1 %v6589_v43 }
 0x5b8   :  { %4808 = vmatpush1.bf16.msra.mxu0 %v6592_v49  ;;  %4840 = vmatpush1.bf16.msra.mxu1 %v6596_v50 }
 0x66e   :  { %v1774_v30 = vpop.f32.mrb[10].mxu0  ;;  %v1845_v16 = vpop.f32.mrb[10].mxu1 }
 0x66f   :  { %v5515_v31 = vadd.f32 %v1774_v30, %v6386_v6  ;;  %v1776_v36 = vpop.f32.mrb[11].mxu0  ;;  %v1847_v39 = vpop.f32.mrb[11].mxu1  ;;  %v5531_v61 = vadd.f32 %v1845_v16, %v6403_v32 }
 0x670   :  { %v5516_v48 = vadd.f32 %v1776_v36, %v6390_v10  ;;  %v5532_v46 = vadd.f32 %v1847_v39, %v6397_v23  ;;  %v2131_v36 = vld [vmem:[#allocation6 + $0x28] sm:$0xff] }
 0x671   :  { %v4307_v22 = vmul.f32 -1.442695, %v5515_v31  ;;  %v2127_v31 = vld [vmem:[#allocation6 + $0x8] sm:$0xff] }
 0x672   :  { %v4308_v37 = vmul.f32 -1.442695, %v5516_v48  ;;  %v4309_v56 = vmul.f32 -1.442695, %v5532_v46  ;;  %v4841_v39 = vpack.c.bf16 %v2131_v36, %v2127_v31  ;;  %v2133_v48 = vld [vmem:[#allocation6 + $0x38] sm:$0xff] }
 0x673   :  { %5726 = vpow2.f32 %v4307_v22  ;;  %v2126_v22 = vld [vmem:[#allocation6] sm:$0xff] }
 0x674   :  { %5728 = vpow2.f32 %v4308_v37  ;;  %v2130_v37 = vld [vmem:[#allocation6 + $0x20] sm:$0xff]  ;;  %4842 = vmatprep.subr.bf16.mxu0 %v4841_v39 }
 0x675   :  { %5730 = vpow2.f32 %v4309_v56  ;;  %v4843_v56 = vpack.c.bf16 %v2130_v37, %v2126_v22  ;;  %v2370_v37 = vld [vmem:[#allocation9] sm:$0xff] }
 0x676   :  { %5732 = vtanh.f32 %v5531_v61  ;;  %v2128_v61 = vld [vmem:[#allocation6 + $0x10] sm:$0xff] }
 0x67d   :  { %v5727_v14 = vpop.eup %5726 }
 0x67e   :  { %v5729_v62 = vpop.eup %5728  ;;  %v1857_v29 = vadd.f32 1.0, %v5727_v14  ;;  %v2132_v14 = vld [vmem:[#allocation6 + $0x30] sm:$0xff] }
 0x67f   :  { %v1863_v25 = vadd.f32 1.0, %v5729_v62  ;;  %v5731_v18 = vpop.eup %5730  ;;  %v4875_v62 = vpack.c.bf16 %v2132_v14, %v2128_v61  ;;  %v2376_v61 = vld [vmem:[#allocation9 + $0x30] sm:$0xff]  ;;  %v2379_v14 = vld [vmem:[#allocation9 + $0x48] sm:$0xff] }
 0x680   :  { %5734 = vrcp.f32 %v1857_v29  ;;  %v5733_v33 = vpop.eup %5732  ;;  %v1870_v57 = vadd.f32 1.0, %v5731_v18  ;;  %v2135_v29 = vld [vmem:[#allocation6 + $0x48] sm:$0xff]  ;;  %v2137_v18 = vld [vmem:[#allocation6 + $0x58] sm:$0xff] }
 0x681   :  { %5736 = vrcp.f32 %v1863_v25  ;;  %v2139_v25 = vld [vmem:[#allocation6 + $0x68] sm:$0xff] }
 0x682   :  { %5738 = vrcp.f32 %v1870_v57 }
 0x68a   :  { %v5735_v17 = vpop.eup %5734 }
 0x68b   :  { %v5737_v47 = vpop.eup %5736  ;;  %v1874_v60 = vmul.f32 %v5735_v17, %v5733_v33  ;;  %v4845_v33 = vpack.c.bf16 %v2139_v25, %v2135_v29  ;;  %v2141_v17 = vld [vmem:[#allocation6 + $0x78] sm:$0xff] }
 0x68c   :  { %v1873_v58 = vmul.f32 %v5737_v47, %v6654_v3  ;;  %v5739_v20 = vpop.eup %5738  ;;  %v2129_v3 = vld [vmem:[#allocation6 + $0x18] sm:$0xff]  ;;  %v2134_v47 = vld [vmem:[#allocation6 + $0x40] sm:$0xff]  ;;  %v4877_v57 = vpack.c.bf16 %v2141_v17, %v2137_v18 }
 0x68d   :  { %v4873_v46 = vpack.c.bf16 %v2133_v48, %v2129_v3  ;;  %v2381_v29 = vld [vmem:[#allocation9 + $0x58] sm:$0xff] }
 0x68e   :  { %v6698_v45 = vadd.f32 %v1874_v60, %v1873_v58  ;;  %v2138_v60 = vld [vmem:[#allocation6 + $0x60] sm:$0xff] }
 0x68f   :  { %4874 = vmatprep.subr.bf16.mxu1 %v4873_v46  ;;  %v4847_v58 = vpack.c.bf16 %v2138_v60, %v2134_v47  ;;  %v2374_v46 = vld [vmem:[#allocation9 + $0x20] sm:$0xff]  ;;  %v2385_v25 = vld [vmem:[#allocation9 + $0x78] sm:$0xff] }
 0x690   :  { %5740 = vtanh.f32 %v6698_v45  ;;  %v4907_v17 = vpack.c.bf16 %v2374_v46, %v2370_v37  ;;  %v2378_v60 = vld [vmem:[#allocation9 + $0x40] sm:$0xff] }
 0x69a   :  { %v5741_v30 = vpop.eup %5740 }
 0x69b   :  { %v6701_v16 = vmul.f32 %v5741_v30, %v5739_v20  ;;  %v2136_v20 = vld [vmem:[#allocation6 + $0x50] sm:$0xff] }
 0x69c   :  { %v2140_v30 = vld [vmem:[#allocation6 + $0x70] sm:$0xff] }
 0x69d   :  { %2014 = vmatmul.mubr.f32.vlgmr.msra.gmra.mrb[12].mxu0 %v6701_v16  ;;  %2085 = vmatmul.mubr.f32.vlgmr.msra.gmra.mrb[12].mxu1 %v6701_v16  ;;  %v4879_v31 = vpack.c.bf16 %v2140_v30, %v2136_v20  ;;  %v4941_v20 = vpack.c.bf16 %v2385_v25, %v2381_v29  ;;  %v2380_v30 = vld [vmem:[#allocation9 + $0x50] sm:$0xff] }
 0x69e   :  { %2254 = vmatprep.mubr.f32.mxu0 %v6050_v0  ;;  %2325 = vmatprep.mubr.f32.mxu1 %v6050_v0  ;;  %v2404_v29 = vld [vmem:[#allocation9 + $0x110] sm:$0xff] }
 0x69f   :  { %4844 = vmatpush1.bf16.msra.mxu0 %v4843_v56  ;;  %4876 = vmatpush1.bf16.msra.mxu1 %v4875_v62  ;;  %v2372_v56 = vld [vmem:[#allocation9 + $0x10] sm:$0xff]  ;;  %v2383_v62 = vld [vmem:[#allocation9 + $0x68] sm:$0xff] }
 0x6a0   :  { %4846 = vmatprep.subr.bf16.mxu0 %v4845_v33  ;;  %4878 = vmatprep.subr.bf16.mxu1 %v4877_v57  ;;  %v4939_v47 = vpack.c.bf16 %v2376_v61, %v2372_v56  ;;  %v2382_v57 = vld [vmem:[#allocation9 + $0x60] sm:$0xff]  ;;  %v2408_v25 = vld [vmem:[#allocation9 + $0x130] sm:$0xff] }
 0x6a1   :  { %v2402_v56 = vld [vmem:[#allocation9 + $0x100] sm:$0xff] }
 0x6a2   :  { %v2406_v61 = vld [vmem:[#allocation9 + $0x120] sm:$0xff] }
 0x6a3   :  { %4848 = vmatpush1.bf16.msra.mxu0 %v4847_v58  ;;  %4880 = vmatpush1.bf16.msra.mxu1 %v4879_v31  ;;  %v4909_v58 = vpack.c.bf16 %v2383_v62, %v2379_v14  ;;  %v2384_v31 = vld [vmem:[#allocation9 + $0x70] sm:$0xff] }
 0x6a4   :  { %4850 = vmatprep.subr.bf16.mxu0 %v6529_v11  ;;  %4882 = vmatprep.subr.bf16.mxu1 %v6531_v26  ;;  %v2371_v11 = vld [vmem:[#allocation9 + $0x8] sm:$0xff] }
 0x6a5   :  { %v2375_v26 = vld [vmem:[#allocation9 + $0x28] sm:$0xff] }
 0x6a7   :  { %4852 = vmatpush1.bf16.msra.mxu0 %v6533_v12  ;;  %4884 = vmatpush1.bf16.msra.mxu1 %v6536_v19  ;;  %v2373_v12 = vld [vmem:[#allocation9 + $0x18] sm:$0xff] }
 0x6a8   :  { %4854 = vmatprep.subr.bf16.mxu0 %v6541_v35  ;;  %4886 = vmatprep.subr.bf16.mxu1 %v6543_v41  ;;  %v2377_v19 = vld [vmem:[#allocation9 + $0x38] sm:$0xff]  ;;  %v4905_v35 = vpack.c.bf16 %v2375_v26, %v2371_v11  ;;  %v2387_v11 = vld [vmem:[#allocation9 + $0x88] sm:$0xff] }
 0x6a9   :  { %v4937_v41 = vpack.c.bf16 %v2377_v19, %v2373_v12  ;;  %v2391_v26 = vld [vmem:[#allocation9 + $0xa8] sm:$0xff]  ;;  %v2389_v12 = vld [vmem:[#allocation9 + $0x98] sm:$0xff] }
 0x6aa   :  { %v2393_v19 = vld [vmem:[#allocation9 + $0xb8] sm:$0xff] }
 0x6ab   :  { %4856 = vmatpush1.bf16.msra.mxu0 %v6545_v44  ;;  %4888 = vmatpush1.bf16.msra.mxu1 %v6548_v54 }
 0x6ac   :  { %4858 = vmatprep.subr.bf16.mxu0 %v6553_v4  ;;  %4890 = vmatprep.subr.bf16.mxu1 %v6555_v21 }
 0x6af   :  { %4860 = vmatpush1.bf16.msra.mxu0 %v6557_v24  ;;  %4892 = vmatpush1.bf16.msra.mxu1 %v6560_v38 }
 0x6b0   :  { %4862 = vmatprep.subr.bf16.mxu0 %v6564_v59  ;;  %4894 = vmatprep.subr.bf16.mxu1 %v6567_v52 }
 0x6b3   :  { %4864 = vmatpush1.bf16.msra.mxu0 %v6569_v2  ;;  %4896 = vmatpush1.bf16.msra.mxu1 %v6572_v15 }
 0x6b4   :  { %4866 = vmatprep.subr.bf16.mxu0 %v6575_v34  ;;  %4898 = vmatprep.subr.bf16.mxu1 %v6577_v42 }
 0x6b7   :  { %4868 = vmatpush1.bf16.msra.mxu0 %v6580_v53  ;;  %4900 = vmatpush1.bf16.msra.mxu1 %v6584_v7 }
 0x6b8   :  { %4870 = vmatprep.subr.bf16.mxu0 %v6586_v8  ;;  %4902 = vmatprep.subr.bf16.mxu1 %v6589_v43 }
 0x6bb   :  { %4872 = vmatpush1.bf16.msra.mxu0 %v6592_v49  ;;  %4904 = vmatpush1.bf16.msra.mxu1 %v6596_v50 }
 0x6bc   :  { %4906 = vmatprep.subr.bf16.mxu0 %v4905_v35  ;;  %4938 = vmatprep.subr.bf16.mxu1 %v4937_v41  ;;  %v4911_v35 = vpack.c.bf16 %v2382_v57, %v2378_v60  ;;  %v4943_v41 = vpack.c.bf16 %v2384_v31, %v2380_v30  ;;  %v4923_v60 = vpack.c.bf16 %v2406_v61, %v2402_v56  ;;  %v2720_v61 = vld [vmem:[#allocation11 + $0x10] sm:$0xff] }
 0x6bd   :  { %v4955_v57 = vpack.c.bf16 %v2408_v25, %v2404_v29  ;;  %v2731_v29 = vld [vmem:[#allocation11 + $0x68] sm:$0xff]  ;;  %v2729_v25 = vld [vmem:[#allocation11 + $0x58] sm:$0xff] }
 0x770   :  { %v2015_v44 = vpop.f32.mrb[12].mxu0  ;;  %v2086_v54 = vpop.f32.mrb[12].mxu1 }
 0x771   :  { %v5517_v4 = vadd.f32 %v2015_v44, %v6386_v6  ;;  %v2017_v21 = vpop.f32.mrb[13].mxu0  ;;  %v2088_v24 = vpop.f32.mrb[13].mxu1  ;;  %v5533_v34 = vadd.f32 %v2086_v54, %v6403_v32  ;;  %v2386_v44 = vld [vmem:[#allocation9 + $0x80] sm:$0xff] }
 0x772   :  { %v5518_v38 = vadd.f32 %v2017_v21, %v6390_v10  ;;  %v5534_v2 = vadd.f32 %v2088_v24, %v6397_v23  ;;  %v2390_v54 = vld [vmem:[#allocation9 + $0xa0] sm:$0xff]  ;;  %v4945_v21 = vpack.c.bf16 %v2393_v19, %v2389_v12  ;;  %v2388_v24 = vld [vmem:[#allocation9 + $0x90] sm:$0xff]  ;;  %v2419_v12 = vld [vmem:[#allocation9 + $0x188] sm:$0xff] }
 0x773   :  { %v4310_v59 = vmul.f32 -1.442695, %v5517_v4  ;;  %v4913_v4 = vpack.c.bf16 %v2391_v26, %v2387_v11  ;;  %v2412_v11 = vld [vmem:[#allocation9 + $0x150] sm:$0xff]  ;;  %v2423_v19 = vld [vmem:[#allocation9 + $0x1a8] sm:$0xff] }
 0x774   :  { %v4311_v52 = vmul.f32 -1.442695, %v5518_v38  ;;  %v4312_v15 = vmul.f32 -1.442695, %v5534_v2  ;;  %v2392_v38 = vld [vmem:[#allocation9 + $0xb0] sm:$0xff]  ;;  %v2397_v2 = vld [vmem:[#allocation9 + $0xd8] sm:$0xff] }
 0x775   :  { %5742 = vpow2.f32 %v4310_v59  ;;  %v2395_v59 = vld [vmem:[#allocation9 + $0xc8] sm:$0xff]  ;;  %v2416_v26 = vld [vmem:[#allocation9 + $0x170] sm:$0xff] }
 0x776   :  { %5744 = vpow2.f32 %v4311_v52  ;;  %v2399_v52 = vld [vmem:[#allocation9 + $0xe8] sm:$0xff] }
 0x777   :  { %5746 = vpow2.f32 %v4312_v15  ;;  %v2401_v15 = vld [vmem:[#allocation9 + $0xf8] sm:$0xff] }
 0x778   :  { %5748 = vtanh.f32 %v5533_v34  ;;  %v4915_v34 = vpack.c.bf16 %v2390_v54, %v2386_v44  ;;  %v4959_v54 = vpack.c.bf16 %v2416_v26, %v2412_v11  ;;  %v2739_v11 = vld [vmem:[#allocation11 + $0xa8] sm:$0xff]  ;;  %v2737_v26 = vld [vmem:[#allocation11 + $0x98] sm:$0xff] }
 0x77f   :  { %v5743_v42 = vpop.eup %5742 }
 0x780   :  { %v5745_v53 = vpop.eup %5744  ;;  %v2098_v7 = vadd.f32 1.0, %v5743_v42  ;;  %v4947_v42 = vpack.c.bf16 %v2392_v38, %v2388_v24  ;;  %v4929_v24 = vpack.c.bf16 %v2423_v19, %v2419_v12  ;;  %v2741_v19 = vld [vmem:[#allocation11 + $0xb8] sm:$0xff] }
 0x781   :  { %v2104_v8 = vadd.f32 1.0, %v5745_v53  ;;  %v5747_v43 = vpop.eup %5746  ;;  %v2394_v53 = vld [vmem:[#allocation9 + $0xc0] sm:$0xff] }
 0x782   :  { %5750 = vrcp.f32 %v2098_v7  ;;  %v5749_v49 = vpop.eup %5748  ;;  %v2111_v39 = vadd.f32 1.0, %v5747_v43  ;;  %v2398_v7 = vld [vmem:[#allocation9 + $0xe0] sm:$0xff]  ;;  %v4949_v43 = vpack.c.bf16 %v2401_v15, %v2397_v2  ;;  %v2427_v2 = vld [vmem:[#allocation9 + $0x1c8] sm:$0xff] }
 0x783   :  { %5752 = vrcp.f32 %v2104_v8  ;;  %v4917_v8 = vpack.c.bf16 %v2399_v52, %v2395_v59  ;;  %v4919_v37 = vpack.c.bf16 %v2398_v7, %v2394_v53  ;;  %v2420_v59 = vld [vmem:[#allocation9 + $0x190] sm:$0xff]  ;;  %v2431_v15 = vld [vmem:[#allocation9 + $0x1e8] sm:$0xff] }
 0x784   :  { %5754 = vrcp.f32 %v2111_v39  ;;  %v2405_v39 = vld [vmem:[#allocation9 + $0x118] sm:$0xff]  ;;  %v2424_v52 = vld [vmem:[#allocation9 + $0x1b0] sm:$0xff] }
 0x785   :  { %v4963_v7 = vpack.c.bf16 %v2424_v52, %v2420_v59  ;;  %v2747_v59 = vld [vmem:[#allocation11 + $0xe8] sm:$0xff]  ;;  %v2745_v52 = vld [vmem:[#allocation11 + $0xd8] sm:$0xff] }
 0x78c   :  { %v5751_v50 = vpop.eup %5750 }
 0x78d   :  { %v5753_v36 = vpop.eup %5752  ;;  %v2115_v3 = vmul.f32 %v5751_v50, %v5749_v49  ;;  %v2396_v49 = vld [vmem:[#allocation9 + $0xd0] sm:$0xff] }
 0x78e   :  { %v2114_v48 = vmul.f32 %v5753_v36, %v6698_v45  ;;  %v5755_v18 = vpop.eup %5754  ;;  %v2400_v50 = vld [vmem:[#allocation9 + $0xf0] sm:$0xff]  ;;  %v2403_v36 = vld [vmem:[#allocation9 + $0x108] sm:$0xff] }
 0x78f   :  { %v4951_v46 = vpack.c.bf16 %v2400_v50, %v2396_v49  ;;  %v2430_v50 = vld [vmem:[#allocation9 + $0x1e0] sm:$0xff] }
 0x790   :  { %v6736_v22 = vadd.f32 %v2115_v3, %v2114_v48  ;;  %v2407_v3 = vld [vmem:[#allocation9 + $0x128] sm:$0xff]  ;;  %v2409_v48 = vld [vmem:[#allocation9 + $0x138] sm:$0xff] }
 0x791   :  { %v4921_v14 = vpack.c.bf16 %v2407_v3, %v2403_v36  ;;  %v4953_v62 = vpack.c.bf16 %v2409_v48, %v2405_v39  ;;  %v2428_v36 = vld [vmem:[#allocation9 + $0x1d0] sm:$0xff] }
 0x792   :  { %5756 = vtanh.f32 %v6736_v22  ;;  %v2432_v3 = vld [vmem:[#allocation9 + $0x1f0] sm:$0xff] }
 0x793   :  { %v4967_v48 = vpack.c.bf16 %v2432_v3, %v2428_v36  ;;  %v2755_v36 = vld [vmem:[#allocation11 + $0x128] sm:$0xff]  ;;  %v2753_v3 = vld [vmem:[#allocation11 + $0x118] sm:$0xff] }
 0x79c   :  { %v5757_v33 = vpop.eup %5756 }
 0x79d   :  { %v6739_v45 = vmul.f32 %v5757_v33, %v5755_v18  ;;  %v2411_v18 = vld [vmem:[#allocation9 + $0x148] sm:$0xff] }
 0x79e   :  { %v2415_v33 = vld [vmem:[#allocation9 + $0x168] sm:$0xff] }
 0x79f   :  { %2255 = vmatmul.mubr.f32.vlgmr.msra.gmra.mrb[14].mxu0 %v6739_v45  ;;  %2326 = vmatmul.mubr.f32.vlgmr.msra.gmra.mrb[14].mxu1 %v6739_v45  ;;  %v4925_v30 = vpack.c.bf16 %v2415_v33, %v2411_v18  ;;  %v2733_v33 = vld [vmem:[#allocation11 + $0x78] sm:$0xff] }
 0x7a0   :  { %4908 = vmatpush1.bf16.msra.mxu0 %v4907_v17  ;;  %4940 = vmatpush1.bf16.msra.mxu1 %v4939_v47  ;;  %v2413_v17 = vld [vmem:[#allocation9 + $0x158] sm:$0xff] }
 0x7a1   :  { %4910 = vmatprep.subr.bf16.mxu0 %v4909_v58  ;;  %4942 = vmatprep.subr.bf16.mxu1 %v4941_v20  ;;  %v2417_v47 = vld [vmem:[#allocation9 + $0x178] sm:$0xff]  ;;  %v2410_v58 = vld [vmem:[#allocation9 + $0x140] sm:$0xff] }
 0x7a2   :  { %2520 = vmatprep.mubr.f32.mxu0 %v6050_v0  ;;  %2633 = vmatprep.mubr.f32.mxu1 %v6050_v0  ;;  %v2414_v20 = vld [vmem:[#allocation9 + $0x160] sm:$0xff]  ;;  %v4957_v31 = vpack.c.bf16 %v2417_v47, %v2413_v17 }
 0x7a3   :  { %v4927_v44 = vpack.c.bf16 %v2414_v20, %v2410_v58  ;;  %v2726_v17 = vld [vmem:[#allocation11 + $0x40] sm:$0xff]  ;;  %v2728_v58 = vld [vmem:[#allocation11 + $0x50] sm:$0xff] }
 0x7a4   :  { %4912 = vmatpush1.bf16.msra.mxu0 %v4911_v35  ;;  %4944 = vmatpush1.bf16.msra.mxu1 %v4943_v41  ;;  %v2421_v35 = vld [vmem:[#allocation9 + $0x198] sm:$0xff]  ;;  %v2730_v47 = vld [vmem:[#allocation11 + $0x60] sm:$0xff]  ;;  %v2732_v20 = vld [vmem:[#allocation11 + $0x70] sm:$0xff] }
 0x7a5   :  { %4914 = vmatprep.subr.bf16.mxu0 %v4913_v4  ;;  %4946 = vmatprep.subr.bf16.mxu1 %v4945_v21  ;;  %v2425_v41 = vld [vmem:[#allocation9 + $0x1b8] sm:$0xff]  ;;  %v2418_v4 = vld [vmem:[#allocation9 + $0x180] sm:$0xff] }
 0x7a6   :  { %v2422_v21 = vld [vmem:[#allocation9 + $0x1a0] sm:$0xff]  ;;  %v4961_v38 = vpack.c.bf16 %v2425_v41, %v2421_v35 }
 0x7a7   :  { %v4931_v53 = vpack.c.bf16 %v2422_v21, %v2418_v4  ;;  %v2734_v35 = vld [vmem:[#allocation11 + $0x80] sm:$0xff]  ;;  %v2736_v4 = vld [vmem:[#allocation11 + $0x90] sm:$0xff] }
 0x7a8   :  { %4916 = vmatpush1.bf16.msra.mxu0 %v4915_v34  ;;  %4948 = vmatpush1.bf16.msra.mxu1 %v4947_v42  ;;  %v2429_v34 = vld [vmem:[#allocation9 + $0x1d8] sm:$0xff]  ;;  %v2738_v41 = vld [vmem:[#allocation11 + $0xa0] sm:$0xff]  ;;  %v2740_v21 = vld [vmem:[#allocation11 + $0xb0] sm:$0xff] }
 0x7a9   :  { %4918 = vmatprep.subr.bf16.mxu0 %v4917_v8  ;;  %4950 = vmatprep.subr.bf16.mxu1 %v4949_v43  ;;  %v2433_v42 = vld [vmem:[#allocation9 + $0x1f8] sm:$0xff]  ;;  %v2426_v8 = vld [vmem:[#allocation9 + $0x1c0] sm:$0xff]  ;;  %v4933_v43 = vpack.c.bf16 %v2431_v15, %v2427_v2 }
 0x7aa   :  { %v4965_v49 = vpack.c.bf16 %v2433_v42, %v2429_v34  ;;  %v4935_v39 = vpack.c.bf16 %v2430_v50, %v2426_v8  ;;  %v2749_v15 = vld [vmem:[#allocation11 + $0xf8] sm:$0xff]  ;;  %v2742_v34 = vld [vmem:[#allocation11 + $0xc0] sm:$0xff]  ;;  %v2744_v8 = vld [vmem:[#allocation11 + $0xd0] sm:$0xff] }
 0x7ab   :  { %v2746_v42 = vld [vmem:[#allocation11 + $0xe0] sm:$0xff] }
 0x7ac   :  { %4920 = vmatpush1.bf16.msra.mxu0 %v4919_v37  ;;  %4952 = vmatpush1.bf16.msra.mxu1 %v4951_v46  ;;  %v2718_v37 = vld [vmem:[#allocation11] sm:$0xff] }
 0x7ad   :  { %4922 = vmatprep.subr.bf16.mxu0 %v4921_v14  ;;  %4954 = vmatprep.subr.bf16.mxu1 %v4953_v62  ;;  %v2724_v14 = vld [vmem:[#allocation11 + $0x30] sm:$0xff]  ;;  %v2727_v62 = vld [vmem:[#allocation11 + $0x48] sm:$0xff] }
 0x7ae   :  { %v6785_v18 = vpack.c.bf16 %v2731_v29, %v2727_v62 }
 0x7b0   :  { %4924 = vmatpush1.bf16.msra.mxu0 %v4923_v60  ;;  %4956 = vmatpush1.bf16.msra.mxu1 %v4955_v57  ;;  %v6787_v60 = vpack.c.bf16 %v2733_v33, %v2729_v25  ;;  %v6789_v57 = vpack.c.bf16 %v2730_v47, %v2726_v17  ;;  %v2761_v25 = vld [vmem:[#allocation11 + $0x158] sm:$0xff]  ;;  %v2758_v17 = vld [vmem:[#allocation11 + $0x140] sm:$0xff] }
 0x7b1   :  { %4926 = vmatprep.subr.bf16.mxu0 %v4925_v30  ;;  %4958 = vmatprep.subr.bf16.mxu1 %v4957_v31  ;;  %v6792_v30 = vpack.c.bf16 %v2732_v20, %v2728_v58  ;;  %v2735_v31 = vld [vmem:[#allocation11 + $0x88] sm:$0xff]  ;;  %v2765_v33 = vld [vmem:[#allocation11 + $0x178] sm:$0xff]  ;;  %v2762_v58 = vld [vmem:[#allocation11 + $0x160] sm:$0xff] }
 0x7b2   :  { %v6797_v12 = vpack.c.bf16 %v2739_v11, %v2735_v31  ;;  %v6833_v47 = vpack.c.bf16 %v2765_v33, %v2761_v25  ;;  %v2760_v20 = vld [vmem:[#allocation11 + $0x150] sm:$0xff]  ;;  %v6836_v11 = vpack.c.bf16 %v2762_v58, %v2758_v17 }
 0x7b3   :  { %v2764_v31 = vld [vmem:[#allocation11 + $0x170] sm:$0xff] }
 0x7b4   :  { %4928 = vmatpush1.bf16.msra.mxu0 %v4927_v44  ;;  %4960 = vmatpush1.bf16.msra.mxu1 %v4959_v54  ;;  %v6799_v44 = vpack.c.bf16 %v2741_v19, %v2737_v26  ;;  %v6801_v54 = vpack.c.bf16 %v2738_v41, %v2734_v35  ;;  %v2767_v26 = vld [vmem:[#allocation11 + $0x188] sm:$0xff]  ;;  %v2769_v35 = vld [vmem:[#allocation11 + $0x198] sm:$0xff]  ;;  %v6840_v41 = vpack.c.bf16 %v2764_v31, %v2760_v20 }
 0x7b5   :  { %4930 = vmatprep.subr.bf16.mxu0 %v4929_v24  ;;  %4962 = vmatprep.subr.bf16.mxu1 %v4961_v38  ;;  %v6804_v24 = vpack.c.bf16 %v2740_v21, %v2736_v4  ;;  %v2743_v38 = vld [vmem:[#allocation11 + $0xc8] sm:$0xff]  ;;  %v2773_v21 = vld [vmem:[#allocation11 + $0x1b8] sm:$0xff] }
 0x7b6   :  { %v6809_v2 = vpack.c.bf16 %v2747_v59, %v2743_v38  ;;  %v2771_v19 = vld [vmem:[#allocation11 + $0x1a8] sm:$0xff]  ;;  %v2766_v38 = vld [vmem:[#allocation11 + $0x180] sm:$0xff] }
 0x7b7   :  { %v6842_v4 = vpack.c.bf16 %v2771_v19, %v2767_v26  ;;  %v2770_v59 = vld [vmem:[#allocation11 + $0x1a0] sm:$0xff] }
 0x7b8   :  { %4932 = vmatpush1.bf16.msra.mxu0 %v4931_v53  ;;  %4964 = vmatpush1.bf16.msra.mxu1 %v4963_v7  ;;  %v6811_v53 = vpack.c.bf16 %v2749_v15, %v2745_v52  ;;  %v6813_v7 = vpack.c.bf16 %v2746_v42, %v2742_v34  ;;  %v6845_v52 = vpack.c.bf16 %v2773_v21, %v2769_v35  ;;  %v2768_v15 = vld [vmem:[#allocation11 + $0x190] sm:$0xff] }
 0x7b9   :  { %4934 = vmatprep.subr.bf16.mxu0 %v4933_v43  ;;  %4966 = vmatprep.subr.bf16.mxu1 %v4965_v49  ;;  %v2748_v43 = vld [vmem:[#allocation11 + $0xf0] sm:$0xff]  ;;  %v2751_v49 = vld [vmem:[#allocation11 + $0x108] sm:$0xff]  ;;  %v6848_v42 = vpack.c.bf16 %v2770_v59, %v2766_v38 }
 0x7ba   :  { %v6816_v50 = vpack.c.bf16 %v2748_v43, %v2744_v8  ;;  %v2772_v34 = vld [vmem:[#allocation11 + $0x1b0] sm:$0xff]  ;;  %v2775_v43 = vld [vmem:[#allocation11 + $0x1c8] sm:$0xff] }
 0x7bb   :  { %v6852_v8 = vpack.c.bf16 %v2772_v34, %v2768_v15 }
 0x7bc   :  { %4936 = vmatpush1.bf16.msra.mxu0 %v4935_v39  ;;  %4968 = vmatpush1.bf16.msra.mxu1 %v4967_v48  ;;  %v2757_v39 = vld [vmem:[#allocation11 + $0x138] sm:$0xff]  ;;  %v6820_v48 = vpack.c.bf16 %v2755_v36, %v2751_v49  ;;  %v2779_v49 = vld [vmem:[#allocation11 + $0x1e8] sm:$0xff] }
 0x7bd   :  { %v2777_v36 = vld [vmem:[#allocation11 + $0x1d8] sm:$0xff] }
 0x7bf   :  { %2521 = vmatmul.mubr.f32.vlgmr.msra.gmra.mrb[16].mxu0 %v6409_v9  ;;  %2634 = vmatmul.mubr.f32.vlgmr.msra.gmra.mrb[16].mxu1 %v6409_v9  ;;  %v2719_v9 = vld [vmem:[#allocation11 + $0x8] sm:$0xff] }
 0x7c0   :  { %2526 = vmatprep.mubr.f32.mxu0 %v6050_v0  ;;  %2639 = vmatprep.mubr.f32.mxu1 %v6050_v0 }
 0x7c3   :  { %2527 = vmatmul.mubr.f32.gmra.mrb[18].mxu0 %v6453_v55  ;;  %2640 = vmatmul.mubr.f32.gmra.mrb[18].mxu1 %v6453_v55  ;;  %v2723_v55 = vld [vmem:[#allocation11 + $0x28] sm:$0xff] }
 0x7c4   :  { %2532 = vmatprep.mubr.f32.mxu0 %v6050_v0  ;;  %2645 = vmatprep.mubr.f32.mxu1 %v6050_v0 }
 0x7c7   :  { %2533 = vmatmul.mubr.f32.gmra.mrb[20].mxu0 %v6517_v51  ;;  %2646 = vmatmul.mubr.f32.gmra.mrb[20].mxu1 %v6517_v51  ;;  %v2721_v51 = vld [vmem:[#allocation11 + $0x18] sm:$0xff] }
 0x7c8   :  { %2538 = vmatprep.mubr.f32.mxu0 %v6050_v0  ;;  %2651 = vmatprep.mubr.f32.mxu1 %v6050_v0 }
 0x7cb   :  { %2539 = vmatmul.mubr.f32.gmra.mrb[22].mxu0 %v6611_v40  ;;  %2652 = vmatmul.mubr.f32.gmra.mrb[22].mxu1 %v6611_v40  ;;  %v6773_v40 = vpack.c.bf16 %v2723_v55, %v2719_v9  ;;  %v6822_v9 = vpack.c.bf16 %v2757_v39, %v2753_v3  ;;  %v2750_v55 = vld [vmem:[#allocation11 + $0x100] sm:$0xff]  ;;  %v6857_v3 = vpack.c.bf16 %v2779_v49, %v2775_v43  ;;  %v2781_v39 = vld [vmem:[#allocation11 + $0x1f8] sm:$0xff] }
 0x7cc   :  { %2544 = vmatprep.mubr.f32.mxu0 %v6050_v0  ;;  %2657 = vmatprep.mubr.f32.mxu1 %v6050_v0 }
 0x7cd   :  { %4970 = vmatprep.subr.bf16.mxu0 %v6773_v40 }
 0x7cf   :  { %2545 = vmatmul.mubr.f32.gmra.mrb[24].mxu0 %v6657_v27  ;;  %2658 = vmatmul.mubr.f32.gmra.mrb[24].mxu1 %v6657_v27  ;;  %v2725_v27 = vld [vmem:[#allocation11 + $0x38] sm:$0xff] }
 0x7d0   :  { %2550 = vmatprep.mubr.f32.mxu0 %v6050_v0  ;;  %2663 = vmatprep.mubr.f32.mxu1 %v6050_v0  ;;  %v6775_v46 = vpack.c.bf16 %v2725_v27, %v2721_v51  ;;  %v2754_v51 = vld [vmem:[#allocation11 + $0x120] sm:$0xff]  ;;  %v2752_v27 = vld [vmem:[#allocation11 + $0x110] sm:$0xff] }
 0x7d2   :  { %5002 = vmatprep.subr.bf16.mxu1 %v6775_v46 }
 0x7d3   :  { %2551 = vmatmul.mubr.f32.gmra.mrb[26].mxu0 %v6701_v16  ;;  %2664 = vmatmul.mubr.f32.gmra.mrb[26].mxu1 %v6701_v16  ;;  %v2722_v16 = vld [vmem:[#allocation11 + $0x20] sm:$0xff] }
 0x7d4   :  { %2556 = vmatprep.mubr.f32.mxu0 %v6050_v0  ;;  %2669 = vmatprep.mubr.f32.mxu1 %v6050_v0  ;;  %v6777_v56 = vpack.c.bf16 %v2722_v16, %v2718_v37  ;;  %v6825_v37 = vpack.c.bf16 %v2754_v51, %v2750_v55  ;;  %v2756_v16 = vld [vmem:[#allocation11 + $0x130] sm:$0xff]  ;;  %v2774_v55 = vld [vmem:[#allocation11 + $0x1c0] sm:$0xff] }
 0x7d5   :  { %v6829_v62 = vpack.c.bf16 %v2756_v16, %v2752_v27  ;;  %v2778_v51 = vld [vmem:[#allocation11 + $0x1e0] sm:$0xff]  ;;  %v6859_v27 = vpack.c.bf16 %v2781_v39, %v2777_v36 }
 0x7d6   :  { %4972 = vmatpush1.bf16.msra.mxu0 %v6777_v56  ;;  %v6861_v16 = vpack.c.bf16 %v2778_v51, %v2774_v55 }
 0x7d7   :  { %2557 = vmatmul.mubr.f32.gmra.mrb[28].mxu0 %v6739_v45  ;;  %2670 = vmatmul.mubr.f32.gmra.mrb[28].mxu1 %v6739_v45  ;;  %v6780_v45 = vpack.c.bf16 %v2724_v14, %v2720_v61  ;;  %v2759_v61 = vld [vmem:[#allocation11 + $0x148] sm:$0xff] }
 0x7d8   :  { %2562 = vmatprep.mubr.f32.mxu0 %v6050_v0  ;;  %2675 = vmatprep.mubr.f32.mxu1 %v6050_v0  ;;  %v2763_v14 = vld [vmem:[#allocation11 + $0x168] sm:$0xff] }
 0x7d9   :  { %5004 = vmatpush1.bf16.msra.mxu1 %v6780_v45  ;;  %4974 = vmatprep.subr.bf16.mxu0 %v6785_v18  ;;  %v6831_v29 = vpack.c.bf16 %v2763_v14, %v2759_v61  ;;  %v2776_v61 = vld [vmem:[#allocation11 + $0x1d0] sm:$0xff] }
 0x7da   :  { %5006 = vmatprep.subr.bf16.mxu1 %v6787_v60  ;;  %4976 = vmatpush1.bf16.msra.mxu0 %v6789_v57  ;;  %v2780_v14 = vld [vmem:[#allocation11 + $0x1f0] sm:$0xff] }
 0x7db   :  { %4978 = vmatprep.subr.bf16.mxu0 %v6797_v12  ;;  %v6864_v25 = vpack.c.bf16 %v2780_v14, %v2776_v61 }
 0x7dd   :  { %5008 = vmatpush1.bf16.msra.mxu1 %v6792_v30 }
 0x7de   :  { %5010 = vmatprep.subr.bf16.mxu1 %v6799_v44  ;;  %4980 = vmatpush1.bf16.msra.mxu0 %v6801_v54 }
 0x7df   :  { %4982 = vmatprep.subr.bf16.mxu0 %v6809_v2 }
 0x7e1   :  { %5012 = vmatpush1.bf16.msra.mxu1 %v6804_v24 }
 0x7e2   :  { %5014 = vmatprep.subr.bf16.mxu1 %v6811_v53  ;;  %4984 = vmatpush1.bf16.msra.mxu0 %v6813_v7 }
 0x7e3   :  { %4986 = vmatprep.subr.bf16.mxu0 %v6820_v48 }
 0x7e5   :  { %5016 = vmatpush1.bf16.msra.mxu1 %v6816_v50 }
 0x7e6   :  { %5018 = vmatprep.subr.bf16.mxu1 %v6822_v9  ;;  %4988 = vmatpush1.bf16.msra.mxu0 %v6825_v37 }
 0x7e7   :  { %4990 = vmatprep.subr.bf16.mxu0 %v6831_v29 }
 0x7e9   :  { %5020 = vmatpush1.bf16.msra.mxu1 %v6829_v62 }
 0x7ea   :  { %5022 = vmatprep.subr.bf16.mxu1 %v6833_v47  ;;  %4992 = vmatpush1.bf16.msra.mxu0 %v6836_v11 }
 0x7eb   :  { %4994 = vmatprep.subr.bf16.mxu0 %v6842_v4 }
 0x7ed   :  { %5024 = vmatpush1.bf16.msra.mxu1 %v6840_v41 }
 0x7ee   :  { %5026 = vmatprep.subr.bf16.mxu1 %v6845_v52  ;;  %4996 = vmatpush1.bf16.msra.mxu0 %v6848_v42 }
 0x7ef   :  { %4998 = vmatprep.subr.bf16.mxu0 %v6857_v3 }
 0x7f1   :  { %5028 = vmatpush1.bf16.msra.mxu1 %v6852_v8 }
 0x7f2   :  { %5030 = vmatprep.subr.bf16.mxu1 %v6859_v27  ;;  %5000 = vmatpush1.bf16.msra.mxu0 %v6861_v16 }
 0x7f3   :  { %5034 = vmatprep.subr.bf16.mxu0 %v6773_v40 }
 0x7f5   :  { %5032 = vmatpush1.bf16.msra.mxu1 %v6864_v25 }
 0x7f6   :  { %5066 = vmatprep.subr.bf16.mxu1 %v6775_v46 }
 0x872   :  { %v2256_v33 = vpop.f32.mrb[14].mxu0  ;;  %v2327_v17 = vpop.f32.mrb[14].mxu1 }
 0x873   :  { %v5519_v58 = vadd.f32 %v2256_v33, %v6386_v6  ;;  %v2258_v20 = vpop.f32.mrb[15].mxu0  ;;  %v2329_v31 = vpop.f32.mrb[15].mxu1  ;;  %v5535_v59 = vadd.f32 %v2327_v17, %v6403_v32 }
 0x874   :  { %v5520_v26 = vadd.f32 %v2258_v20, %v6390_v10  ;;  %v5536_v21 = vadd.f32 %v2329_v31, %v6397_v23 }
 0x875   :  { %v4313_v19 = vmul.f32 -1.442695, %v5519_v58 }
 0x876   :  { %v4314_v35 = vmul.f32 -1.442695, %v5520_v26  ;;  %v4315_v38 = vmul.f32 -1.442695, %v5536_v21 }
 0x877   :  { %5758 = vpow2.f32 %v4313_v19 }
 0x878   :  { %5760 = vpow2.f32 %v4314_v35 }
 0x879   :  { %5762 = vpow2.f32 %v4315_v38 }
 0x87a   :  { %5764 = vtanh.f32 %v5535_v59 }
 0x881   :  { %v5759_v15 = vpop.eup %5758 }
 0x882   :  { %v5761_v34 = vpop.eup %5760  ;;  %v2339_v43 = vadd.f32 1.0, %v5759_v15 }
 0x883   :  { %v2345_v49 = vadd.f32 1.0, %v5761_v34  ;;  %v5763_v6 = vpop.eup %5762 }
 0x884   :  { %5766 = vrcp.f32 %v2339_v43  ;;  %v5765_v36 = vpop.eup %5764  ;;  %v2352_v51 = vadd.f32 1.0, %v5763_v6 }
 0x885   :  { %5768 = vrcp.f32 %v2345_v49 }
 0x886   :  { %5770 = vrcp.f32 %v2352_v51 }
 0x88e   :  { %v5767_v10 = vpop.eup %5766 }
 0x88f   :  { %v5769_v39 = vpop.eup %5768  ;;  %v2356_v55 = vmul.f32 %v5767_v10, %v5765_v36 }
 0x890   :  { %v2355_v61 = vmul.f32 %v5769_v39, %v6736_v22  ;;  %v5771_v32 = vpop.eup %5770  ;;  %v2434_v22 = vld [vmem:[#allocation12] sm:$0xf] }
 0x891   :  { %v6916_v17 = vrot.slane %v2434_v22, %v122_v1  ;;  %v6920_v58 = vrot.slane %v2434_v22, %v126_v5  ;;  %v6926_v15 = vrot.slane %v2434_v22, %v134_v13  ;;  %v6931_v5 = vrot.slane %v2434_v22, %v130_v28 }
 0x892   :  { %v2357_v23 = vadd.f32 %v2356_v55, %v2355_v61 }
 0x894   :  { %5772 = vtanh.f32 %v2357_v23 }
 0x89e   :  { %v5773_v14 = vpop.eup %5772 }
 0x89f   :  { %v2359_v33 = vmul.f32 %v5773_v14, %v5771_v32 }
 0x8a1   :  { %2563 = vmatmul.mubr.f32.gmra.mrb[30].mxu0 %v2359_v33  ;;  %2676 = vmatmul.mubr.f32.gmra.mrb[30].mxu1 %v2359_v33 }
 0x8a2   :  { %2846 = vmatprep.mubr.f32.mxu0 %v6050_v0  ;;  %2917 = vmatprep.mubr.f32.mxu1 %v6050_v0 }
 0x8a5   :  { %2847 = vmatmul.mubr.f32.vlgmr.msra.gmra.mrb[16].mxu0 %v6050_v0  ;;  %2918 = vmatmul.mubr.f32.vlgmr.msra.gmra.mrb[16].mxu1 %v6050_v0 }
 0x8a6   :  { %5036 = vmatpush1.bf16.msra.mxu0 %v6777_v56  ;;  %5068 = vmatpush1.bf16.msra.mxu1 %v6780_v45 }
 0x8a7   :  { %5038 = vmatprep.subr.bf16.mxu0 %v6785_v18  ;;  %5070 = vmatprep.subr.bf16.mxu1 %v6787_v60 }
 0x8a8   :  { %3020 = vmatprep.mubr.f32.mxu0 %v6050_v0  ;;  %3091 = vmatprep.mubr.f32.mxu1 %v6050_v0 }
 0x8aa   :  { %5040 = vmatpush1.bf16.msra.mxu0 %v6789_v57  ;;  %5072 = vmatpush1.bf16.msra.mxu1 %v6792_v30 }
 0x8ab   :  { %5042 = vmatprep.subr.bf16.mxu0 %v6797_v12  ;;  %5074 = vmatprep.subr.bf16.mxu1 %v6799_v44 }
 0x8ae   :  { %5044 = vmatpush1.bf16.msra.mxu0 %v6801_v54  ;;  %5076 = vmatpush1.bf16.msra.mxu1 %v6804_v24 }
 0x8af   :  { %5046 = vmatprep.subr.bf16.mxu0 %v6809_v2  ;;  %5078 = vmatprep.subr.bf16.mxu1 %v6811_v53 }
 0x8b2   :  { %5048 = vmatpush1.bf16.msra.mxu0 %v6813_v7  ;;  %5080 = vmatpush1.bf16.msra.mxu1 %v6816_v50 }
 0x8b3   :  { %5050 = vmatprep.subr.bf16.mxu0 %v6820_v48  ;;  %5082 = vmatprep.subr.bf16.mxu1 %v6822_v9 }
 0x8b6   :  { %5052 = vmatpush1.bf16.msra.mxu0 %v6825_v37  ;;  %5084 = vmatpush1.bf16.msra.mxu1 %v6829_v62 }
 0x8b7   :  { %5054 = vmatprep.subr.bf16.mxu0 %v6831_v29  ;;  %5086 = vmatprep.subr.bf16.mxu1 %v6833_v47 }
 0x8ba   :  { %5056 = vmatpush1.bf16.msra.mxu0 %v6836_v11  ;;  %5088 = vmatpush1.bf16.msra.mxu1 %v6840_v41 }
 0x8bb   :  { %5058 = vmatprep.subr.bf16.mxu0 %v6842_v4  ;;  %5090 = vmatprep.subr.bf16.mxu1 %v6845_v52 }
 0x8be   :  { %5060 = vmatpush1.bf16.msra.mxu0 %v6848_v42  ;;  %5092 = vmatpush1.bf16.msra.mxu1 %v6852_v8 }
 0x8bf   :  { %5062 = vmatprep.subr.bf16.mxu0 %v6857_v3  ;;  %5094 = vmatprep.subr.bf16.mxu1 %v6859_v27 }
 0x8c2   :  { %5064 = vmatpush1.bf16.msra.mxu0 %v6861_v16  ;;  %5096 = vmatpush1.bf16.msra.mxu1 %v6864_v25 }
 0x8c3   :  { %5098 = vmatprep.subr.bf16.mxu0 %v6773_v40  ;;  %5130 = vmatprep.subr.bf16.mxu1 %v6775_v46 }
 0x978   :  { %v2848_v20 = vpop.f32.mrb[16].mxu0  ;;  %v2919_v31 = vpop.f32.mrb[16].mxu1 }
 0x979   :  { %v5537_v26 = vadd.f32 %v2848_v20, %v6916_v17  ;;  %v2850_v19 = vpop.f32.mrb[17].mxu0  ;;  %v2921_v35 = vpop.f32.mrb[17].mxu1  ;;  %v5553_v43 = vadd.f32 %v2919_v31, %v6931_v5 }
 0x97a   :  { %v5538_v21 = vadd.f32 %v2850_v19, %v6920_v58  ;;  %v5554_v1 = vadd.f32 %v2921_v35, %v6926_v15 }
 0x97b   :  { %v4316_v38 = vmul.f32 -1.442695, %v5537_v26 }
 0x97c   :  { %v4317_v59 = vmul.f32 -1.442695, %v5538_v21  ;;  %v4318_v34 = vmul.f32 -1.442695, %v5554_v1 }
 0x97d   :  { %5774 = vpow2.f32 %v4316_v38 }
 0x97e   :  { %5776 = vpow2.f32 %v4317_v59 }
 0x97f   :  { %5778 = vpow2.f32 %v4318_v34 }
 0x980   :  { %5780 = vtanh.f32 %v5553_v43 }
 0x987   :  { %v5775_v49 = vpop.eup %5774 }
 0x988   :  { %v5777_v6 = vpop.eup %5776  ;;  %v2931_v36 = vadd.f32 1.0, %v5775_v49 }
 0x989   :  { %v2937_v10 = vadd.f32 1.0, %v5777_v6  ;;  %v5779_v13 = vpop.eup %5778 }
 0x98a   :  { %5782 = vrcp.f32 %v2931_v36  ;;  %v5781_v39 = vpop.eup %5780  ;;  %v2944_v23 = vadd.f32 1.0, %v5779_v13 }
 0x98b   :  { %5784 = vrcp.f32 %v2937_v10 }
 0x98c   :  { %5786 = vrcp.f32 %v2944_v23 }
 0x994   :  { %v5783_v55 = vpop.eup %5782 }
 0x995   :  { %v5785_v51 = vpop.eup %5784  ;;  %v2948_v61 = vmul.f32 %v5783_v55, %v5781_v39 }
 0x996   :  { %v2947_v63 = vmul.f32 0.0, %v5785_v51  ;;  %v5787_v32 = vpop.eup %5786 }
 0x998   :  { %v6934_v28 = vadd.f32 %v2948_v61, %v2947_v63 }
 0x99a   :  { %5788 = vtanh.f32 %v6934_v28 }
 0x9a4   :  { %v5789_v14 = vpop.eup %5788 }
 0x9a5   :  { %v2951_v33 = vmul.f32 %v5789_v14, %v5787_v32 }
 0x9a7   :  { %3021 = vmatmul.mubr.f32.vlgmr.msra.gmra.mrb[18].mxu0 %v2951_v33  ;;  %3092 = vmatmul.mubr.f32.vlgmr.msra.gmra.mrb[18].mxu1 %v2951_v33 }
 0x9a8   :  { %5100 = vmatpush1.bf16.msra.mxu0 %v6777_v56  ;;  %5132 = vmatpush1.bf16.msra.mxu1 %v6780_v45 }
 0x9a9   :  { %5102 = vmatprep.subr.bf16.mxu0 %v6785_v18  ;;  %5134 = vmatprep.subr.bf16.mxu1 %v6787_v60 }
 0x9aa   :  { %3194 = vmatprep.mubr.f32.mxu0 %v6050_v0  ;;  %3265 = vmatprep.mubr.f32.mxu1 %v6050_v0 }
 0x9ac   :  { %5104 = vmatpush1.bf16.msra.mxu0 %v6789_v57  ;;  %5136 = vmatpush1.bf16.msra.mxu1 %v6792_v30 }
 0x9ad   :  { %5106 = vmatprep.subr.bf16.mxu0 %v6797_v12  ;;  %5138 = vmatprep.subr.bf16.mxu1 %v6799_v44 }
 0x9b0   :  { %5108 = vmatpush1.bf16.msra.mxu0 %v6801_v54  ;;  %5140 = vmatpush1.bf16.msra.mxu1 %v6804_v24 }
 0x9b1   :  { %5110 = vmatprep.subr.bf16.mxu0 %v6809_v2  ;;  %5142 = vmatprep.subr.bf16.mxu1 %v6811_v53 }
 0x9b4   :  { %5112 = vmatpush1.bf16.msra.mxu0 %v6813_v7  ;;  %5144 = vmatpush1.bf16.msra.mxu1 %v6816_v50 }
 0x9b5   :  { %5114 = vmatprep.subr.bf16.mxu0 %v6820_v48  ;;  %5146 = vmatprep.subr.bf16.mxu1 %v6822_v9 }
 0x9b8   :  { %5116 = vmatpush1.bf16.msra.mxu0 %v6825_v37  ;;  %5148 = vmatpush1.bf16.msra.mxu1 %v6829_v62 }
 0x9b9   :  { %5118 = vmatprep.subr.bf16.mxu0 %v6831_v29  ;;  %5150 = vmatprep.subr.bf16.mxu1 %v6833_v47 }
 0x9bc   :  { %5120 = vmatpush1.bf16.msra.mxu0 %v6836_v11  ;;  %5152 = vmatpush1.bf16.msra.mxu1 %v6840_v41 }
 0x9bd   :  { %5122 = vmatprep.subr.bf16.mxu0 %v6842_v4  ;;  %5154 = vmatprep.subr.bf16.mxu1 %v6845_v52 }
 0x9c0   :  { %5124 = vmatpush1.bf16.msra.mxu0 %v6848_v42  ;;  %5156 = vmatpush1.bf16.msra.mxu1 %v6852_v8 }
 0x9c1   :  { %5126 = vmatprep.subr.bf16.mxu0 %v6857_v3  ;;  %5158 = vmatprep.subr.bf16.mxu1 %v6859_v27 }
 0x9c4   :  { %5128 = vmatpush1.bf16.msra.mxu0 %v6861_v16  ;;  %5160 = vmatpush1.bf16.msra.mxu1 %v6864_v25 }
 0x9c5   :  { %5162 = vmatprep.subr.bf16.mxu0 %v6773_v40  ;;  %5194 = vmatprep.subr.bf16.mxu1 %v6775_v46 }
 0xa7a   :  { %v3022_v22 = vpop.f32.mrb[18].mxu0  ;;  %v3093_v20 = vpop.f32.mrb[18].mxu1 }
 0xa7b   :  { %v5539_v31 = vadd.f32 %v3022_v22, %v6916_v17  ;;  %v3024_v26 = vpop.f32.mrb[19].mxu0  ;;  %v3095_v19 = vpop.f32.mrb[19].mxu1  ;;  %v5555_v34 = vadd.f32 %v3093_v20, %v6931_v5 }
 0xa7c   :  { %v5540_v35 = vadd.f32 %v3024_v26, %v6920_v58  ;;  %v5556_v59 = vadd.f32 %v3095_v19, %v6926_v15 }
 0xa7d   :  { %v4319_v21 = vmul.f32 -1.442695, %v5539_v31 }
 0xa7e   :  { %v4320_v38 = vmul.f32 -1.442695, %v5540_v35  ;;  %v4321_v1 = vmul.f32 -1.442695, %v5556_v59 }
 0xa7f   :  { %5790 = vpow2.f32 %v4319_v21 }
 0xa80   :  { %5792 = vpow2.f32 %v4320_v38 }
 0xa81   :  { %5794 = vpow2.f32 %v4321_v1 }
 0xa82   :  { %5796 = vtanh.f32 %v5555_v34 }
 0xa89   :  { %v5791_v43 = vpop.eup %5790 }
 0xa8a   :  { %v5793_v49 = vpop.eup %5792  ;;  %v3105_v6 = vadd.f32 1.0, %v5791_v43 }
 0xa8b   :  { %v3111_v36 = vadd.f32 1.0, %v5793_v49  ;;  %v5795_v10 = vpop.eup %5794 }
 0xa8c   :  { %5798 = vrcp.f32 %v3105_v6  ;;  %v5797_v13 = vpop.eup %5796  ;;  %v3118_v61 = vadd.f32 1.0, %v5795_v10 }
 0xa8d   :  { %5800 = vrcp.f32 %v3111_v36 }
 0xa8e   :  { %5802 = vrcp.f32 %v3118_v61 }
 0xa96   :  { %v5799_v39 = vpop.eup %5798 }
 0xa97   :  { %v5801_v55 = vpop.eup %5800  ;;  %v3122_v51 = vmul.f32 %v5799_v39, %v5797_v13 }
 0xa98   :  { %v3121_v23 = vmul.f32 %v5801_v55, %v6934_v28  ;;  %v5803_v32 = vpop.eup %5802 }
 0xa9a   :  { %v6976_v63 = vadd.f32 %v3122_v51, %v3121_v23 }
 0xa9c   :  { %5804 = vtanh.f32 %v6976_v63 }
 0xaa6   :  { %v5805_v14 = vpop.eup %5804 }
 0xaa7   :  { %v3125_v33 = vmul.f32 %v5805_v14, %v5803_v32 }
 0xaa9   :  { %3195 = vmatmul.mubr.f32.vlgmr.msra.gmra.mrb[20].mxu0 %v3125_v33  ;;  %3266 = vmatmul.mubr.f32.vlgmr.msra.gmra.mrb[20].mxu1 %v3125_v33 }
 0xaaa   :  { %5164 = vmatpush1.bf16.msra.mxu0 %v6777_v56  ;;  %5196 = vmatpush1.bf16.msra.mxu1 %v6780_v45 }
 0xaab   :  { %5166 = vmatprep.subr.bf16.mxu0 %v6785_v18  ;;  %5198 = vmatprep.subr.bf16.mxu1 %v6787_v60 }
 0xaac   :  { %3368 = vmatprep.mubr.f32.mxu0 %v6050_v0  ;;  %3439 = vmatprep.mubr.f32.mxu1 %v6050_v0 }
 0xaae   :  { %5168 = vmatpush1.bf16.msra.mxu0 %v6789_v57  ;;  %5200 = vmatpush1.bf16.msra.mxu1 %v6792_v30 }
 0xaaf   :  { %5170 = vmatprep.subr.bf16.mxu0 %v6797_v12  ;;  %5202 = vmatprep.subr.bf16.mxu1 %v6799_v44 }
 0xab2   :  { %5172 = vmatpush1.bf16.msra.mxu0 %v6801_v54  ;;  %5204 = vmatpush1.bf16.msra.mxu1 %v6804_v24 }
 0xab3   :  { %5174 = vmatprep.subr.bf16.mxu0 %v6809_v2  ;;  %5206 = vmatprep.subr.bf16.mxu1 %v6811_v53 }
 0xab6   :  { %5176 = vmatpush1.bf16.msra.mxu0 %v6813_v7  ;;  %5208 = vmatpush1.bf16.msra.mxu1 %v6816_v50 }
 0xab7   :  { %5178 = vmatprep.subr.bf16.mxu0 %v6820_v48  ;;  %5210 = vmatprep.subr.bf16.mxu1 %v6822_v9 }
 0xaba   :  { %5180 = vmatpush1.bf16.msra.mxu0 %v6825_v37  ;;  %5212 = vmatpush1.bf16.msra.mxu1 %v6829_v62 }
 0xabb   :  { %5182 = vmatprep.subr.bf16.mxu0 %v6831_v29  ;;  %5214 = vmatprep.subr.bf16.mxu1 %v6833_v47 }
 0xabe   :  { %5184 = vmatpush1.bf16.msra.mxu0 %v6836_v11  ;;  %5216 = vmatpush1.bf16.msra.mxu1 %v6840_v41 }
 0xabf   :  { %5186 = vmatprep.subr.bf16.mxu0 %v6842_v4  ;;  %5218 = vmatprep.subr.bf16.mxu1 %v6845_v52 }
 0xac2   :  { %5188 = vmatpush1.bf16.msra.mxu0 %v6848_v42  ;;  %5220 = vmatpush1.bf16.msra.mxu1 %v6852_v8 }
 0xac3   :  { %5190 = vmatprep.subr.bf16.mxu0 %v6857_v3  ;;  %5222 = vmatprep.subr.bf16.mxu1 %v6859_v27 }
 0xac6   :  { %5192 = vmatpush1.bf16.msra.mxu0 %v6861_v16  ;;  %5224 = vmatpush1.bf16.msra.mxu1 %v6864_v25 }
 0xac7   :  { %5226 = vmatprep.subr.bf16.mxu0 %v6773_v40  ;;  %5258 = vmatprep.subr.bf16.mxu1 %v6775_v46 }
 0xb7c   :  { %v3196_v28 = vpop.f32.mrb[20].mxu0  ;;  %v3267_v22 = vpop.f32.mrb[20].mxu1 }
 0xb7d   :  { %v5541_v20 = vadd.f32 %v3196_v28, %v6916_v17  ;;  %v3198_v31 = vpop.f32.mrb[21].mxu0  ;;  %v3269_v26 = vpop.f32.mrb[21].mxu1  ;;  %v5557_v1 = vadd.f32 %v3267_v22, %v6931_v5 }
 0xb7e   :  { %v5542_v19 = vadd.f32 %v3198_v31, %v6920_v58  ;;  %v5558_v38 = vadd.f32 %v3269_v26, %v6926_v15 }
 0xb7f   :  { %v4322_v35 = vmul.f32 -1.442695, %v5541_v20 }
 0xb80   :  { %v4323_v21 = vmul.f32 -1.442695, %v5542_v19  ;;  %v4324_v59 = vmul.f32 -1.442695, %v5558_v38 }
 0xb81   :  { %5806 = vpow2.f32 %v4322_v35 }
 0xb82   :  { %5808 = vpow2.f32 %v4323_v21 }
 0xb83   :  { %5810 = vpow2.f32 %v4324_v59 }
 0xb84   :  { %5812 = vtanh.f32 %v5557_v1 }
 0xb8b   :  { %v5807_v34 = vpop.eup %5806 }
 0xb8c   :  { %v5809_v43 = vpop.eup %5808  ;;  %v3279_v49 = vadd.f32 1.0, %v5807_v34 }
 0xb8d   :  { %v3285_v6 = vadd.f32 1.0, %v5809_v43  ;;  %v5811_v36 = vpop.eup %5810 }
 0xb8e   :  { %5814 = vrcp.f32 %v3279_v49  ;;  %v5813_v10 = vpop.eup %5812  ;;  %v3292_v51 = vadd.f32 1.0, %v5811_v36 }
 0xb8f   :  { %5816 = vrcp.f32 %v3285_v6 }
 0xb90   :  { %5818 = vrcp.f32 %v3292_v51 }
 0xb98   :  { %v5815_v13 = vpop.eup %5814 }
 0xb99   :  { %v5817_v39 = vpop.eup %5816  ;;  %v3296_v55 = vmul.f32 %v5815_v13, %v5813_v10 }
 0xb9a   :  { %v3295_v61 = vmul.f32 %v5817_v39, %v6976_v63  ;;  %v5819_v32 = vpop.eup %5818 }
 0xb9c   :  { %v7018_v23 = vadd.f32 %v3296_v55, %v3295_v61 }
 0xb9e   :  { %5820 = vtanh.f32 %v7018_v23 }
 0xba8   :  { %v5821_v14 = vpop.eup %5820 }
 0xba9   :  { %v3299_v33 = vmul.f32 %v5821_v14, %v5819_v32 }
 0xbab   :  { %3369 = vmatmul.mubr.f32.vlgmr.msra.gmra.mrb[22].mxu0 %v3299_v33  ;;  %3440 = vmatmul.mubr.f32.vlgmr.msra.gmra.mrb[22].mxu1 %v3299_v33 }
 0xbac   :  { %5228 = vmatpush1.bf16.msra.mxu0 %v6777_v56  ;;  %5260 = vmatpush1.bf16.msra.mxu1 %v6780_v45 }
 0xbad   :  { %5230 = vmatprep.subr.bf16.mxu0 %v6785_v18  ;;  %5262 = vmatprep.subr.bf16.mxu1 %v6787_v60 }
 0xbae   :  { %3542 = vmatprep.mubr.f32.mxu0 %v6050_v0  ;;  %3613 = vmatprep.mubr.f32.mxu1 %v6050_v0 }
 0xbb0   :  { %5232 = vmatpush1.bf16.msra.mxu0 %v6789_v57  ;;  %5264 = vmatpush1.bf16.msra.mxu1 %v6792_v30 }
 0xbb1   :  { %5234 = vmatprep.subr.bf16.mxu0 %v6797_v12  ;;  %5266 = vmatprep.subr.bf16.mxu1 %v6799_v44 }
 0xbb4   :  { %5236 = vmatpush1.bf16.msra.mxu0 %v6801_v54  ;;  %5268 = vmatpush1.bf16.msra.mxu1 %v6804_v24 }
 0xbb5   :  { %5238 = vmatprep.subr.bf16.mxu0 %v6809_v2  ;;  %5270 = vmatprep.subr.bf16.mxu1 %v6811_v53 }
 0xbb8   :  { %5240 = vmatpush1.bf16.msra.mxu0 %v6813_v7  ;;  %5272 = vmatpush1.bf16.msra.mxu1 %v6816_v50 }
 0xbb9   :  { %5242 = vmatprep.subr.bf16.mxu0 %v6820_v48  ;;  %5274 = vmatprep.subr.bf16.mxu1 %v6822_v9 }
 0xbbc   :  { %5244 = vmatpush1.bf16.msra.mxu0 %v6825_v37  ;;  %5276 = vmatpush1.bf16.msra.mxu1 %v6829_v62 }
 0xbbd   :  { %5246 = vmatprep.subr.bf16.mxu0 %v6831_v29  ;;  %5278 = vmatprep.subr.bf16.mxu1 %v6833_v47 }
 0xbc0   :  { %5248 = vmatpush1.bf16.msra.mxu0 %v6836_v11  ;;  %5280 = vmatpush1.bf16.msra.mxu1 %v6840_v41 }
 0xbc1   :  { %5250 = vmatprep.subr.bf16.mxu0 %v6842_v4  ;;  %5282 = vmatprep.subr.bf16.mxu1 %v6845_v52 }
 0xbc4   :  { %5252 = vmatpush1.bf16.msra.mxu0 %v6848_v42  ;;  %5284 = vmatpush1.bf16.msra.mxu1 %v6852_v8 }
 0xbc5   :  { %5254 = vmatprep.subr.bf16.mxu0 %v6857_v3  ;;  %5286 = vmatprep.subr.bf16.mxu1 %v6859_v27 }
 0xbc8   :  { %5256 = vmatpush1.bf16.msra.mxu0 %v6861_v16  ;;  %5288 = vmatpush1.bf16.msra.mxu1 %v6864_v25 }
 0xbc9   :  { %5290 = vmatprep.subr.bf16.mxu0 %v6773_v40  ;;  %5322 = vmatprep.subr.bf16.mxu1 %v6775_v46 }
 0xc7e   :  { %v3370_v63 = vpop.f32.mrb[22].mxu0  ;;  %v3441_v28 = vpop.f32.mrb[22].mxu1 }
 0xc7f   :  { %v5543_v22 = vadd.f32 %v3370_v63, %v6916_v17  ;;  %v3372_v20 = vpop.f32.mrb[23].mxu0  ;;  %v3443_v31 = vpop.f32.mrb[23].mxu1  ;;  %v5559_v59 = vadd.f32 %v3441_v28, %v6931_v5 }
 0xc80   :  { %v5544_v26 = vadd.f32 %v3372_v20, %v6920_v58  ;;  %v5560_v21 = vadd.f32 %v3443_v31, %v6926_v15 }
 0xc81   :  { %v4325_v19 = vmul.f32 -1.442695, %v5543_v22 }
 0xc82   :  { %v4326_v35 = vmul.f32 -1.442695, %v5544_v26  ;;  %v4327_v38 = vmul.f32 -1.442695, %v5560_v21 }
 0xc83   :  { %5822 = vpow2.f32 %v4325_v19 }
 0xc84   :  { %5824 = vpow2.f32 %v4326_v35 }
 0xc85   :  { %5826 = vpow2.f32 %v4327_v38 }
 0xc86   :  { %5828 = vtanh.f32 %v5559_v59 }
 0xc8d   :  { %v5823_v1 = vpop.eup %5822 }
 0xc8e   :  { %v5825_v34 = vpop.eup %5824  ;;  %v3453_v43 = vadd.f32 1.0, %v5823_v1 }
 0xc8f   :  { %v3459_v49 = vadd.f32 1.0, %v5825_v34  ;;  %v5827_v6 = vpop.eup %5826 }
 0xc90   :  { %5830 = vrcp.f32 %v3453_v43  ;;  %v5829_v36 = vpop.eup %5828  ;;  %v3466_v55 = vadd.f32 1.0, %v5827_v6 }
 0xc91   :  { %5832 = vrcp.f32 %v3459_v49 }
 0xc92   :  { %5834 = vrcp.f32 %v3466_v55 }
 0xc9a   :  { %v5831_v10 = vpop.eup %5830 }
 0xc9b   :  { %v5833_v13 = vpop.eup %5832  ;;  %v3470_v39 = vmul.f32 %v5831_v10, %v5829_v36 }
 0xc9c   :  { %v3469_v51 = vmul.f32 %v5833_v13, %v7018_v23  ;;  %v5835_v32 = vpop.eup %5834 }
 0xc9e   :  { %v7060_v61 = vadd.f32 %v3470_v39, %v3469_v51 }
 0xca0   :  { %5836 = vtanh.f32 %v7060_v61 }
 0xcaa   :  { %v5837_v14 = vpop.eup %5836 }
 0xcab   :  { %v3473_v33 = vmul.f32 %v5837_v14, %v5835_v32 }
 0xcad   :  { %3543 = vmatmul.mubr.f32.vlgmr.msra.gmra.mrb[24].mxu0 %v3473_v33  ;;  %3614 = vmatmul.mubr.f32.vlgmr.msra.gmra.mrb[24].mxu1 %v3473_v33 }
 0xcae   :  { %5292 = vmatpush1.bf16.msra.mxu0 %v6777_v56  ;;  %5324 = vmatpush1.bf16.msra.mxu1 %v6780_v45 }
 0xcaf   :  { %5294 = vmatprep.subr.bf16.mxu0 %v6785_v18  ;;  %5326 = vmatprep.subr.bf16.mxu1 %v6787_v60 }
 0xcb0   :  { %3716 = vmatprep.mubr.f32.mxu0 %v6050_v0  ;;  %3787 = vmatprep.mubr.f32.mxu1 %v6050_v0 }
 0xcb2   :  { %5296 = vmatpush1.bf16.msra.mxu0 %v6789_v57  ;;  %5328 = vmatpush1.bf16.msra.mxu1 %v6792_v30 }
 0xcb3   :  { %5298 = vmatprep.subr.bf16.mxu0 %v6797_v12  ;;  %5330 = vmatprep.subr.bf16.mxu1 %v6799_v44 }
 0xcb6   :  { %5300 = vmatpush1.bf16.msra.mxu0 %v6801_v54  ;;  %5332 = vmatpush1.bf16.msra.mxu1 %v6804_v24 }
 0xcb7   :  { %5302 = vmatprep.subr.bf16.mxu0 %v6809_v2  ;;  %5334 = vmatprep.subr.bf16.mxu1 %v6811_v53 }
 0xcba   :  { %5304 = vmatpush1.bf16.msra.mxu0 %v6813_v7  ;;  %5336 = vmatpush1.bf16.msra.mxu1 %v6816_v50 }
 0xcbb   :  { %5306 = vmatprep.subr.bf16.mxu0 %v6820_v48  ;;  %5338 = vmatprep.subr.bf16.mxu1 %v6822_v9 }
 0xcbe   :  { %5308 = vmatpush1.bf16.msra.mxu0 %v6825_v37  ;;  %5340 = vmatpush1.bf16.msra.mxu1 %v6829_v62 }
 0xcbf   :  { %5310 = vmatprep.subr.bf16.mxu0 %v6831_v29  ;;  %5342 = vmatprep.subr.bf16.mxu1 %v6833_v47 }
 0xcc2   :  { %5312 = vmatpush1.bf16.msra.mxu0 %v6836_v11  ;;  %5344 = vmatpush1.bf16.msra.mxu1 %v6840_v41 }
 0xcc3   :  { %5314 = vmatprep.subr.bf16.mxu0 %v6842_v4  ;;  %5346 = vmatprep.subr.bf16.mxu1 %v6845_v52 }
 0xcc6   :  { %5316 = vmatpush1.bf16.msra.mxu0 %v6848_v42  ;;  %5348 = vmatpush1.bf16.msra.mxu1 %v6852_v8 }
 0xcc7   :  { %5318 = vmatprep.subr.bf16.mxu0 %v6857_v3  ;;  %5350 = vmatprep.subr.bf16.mxu1 %v6859_v27 }
 0xcca   :  { %5320 = vmatpush1.bf16.msra.mxu0 %v6861_v16  ;;  %5352 = vmatpush1.bf16.msra.mxu1 %v6864_v25 }
 0xccb   :  { %5354 = vmatprep.subr.bf16.mxu0 %v6773_v40  ;;  %5386 = vmatprep.subr.bf16.mxu1 %v6775_v46 }
 0xd80   :  { %v3544_v23 = vpop.f32.mrb[24].mxu0  ;;  %v3615_v63 = vpop.f32.mrb[24].mxu1 }
 0xd81   :  { %v5545_v28 = vadd.f32 %v3544_v23, %v6916_v17  ;;  %v3546_v22 = vpop.f32.mrb[25].mxu0  ;;  %v3617_v20 = vpop.f32.mrb[25].mxu1  ;;  %v5561_v38 = vadd.f32 %v3615_v63, %v6931_v5 }
 0xd82   :  { %v5546_v31 = vadd.f32 %v3546_v22, %v6920_v58  ;;  %v5562_v35 = vadd.f32 %v3617_v20, %v6926_v15 }
 0xd83   :  { %v4328_v26 = vmul.f32 -1.442695, %v5545_v28 }
 0xd84   :  { %v4329_v19 = vmul.f32 -1.442695, %v5546_v31  ;;  %v4330_v21 = vmul.f32 -1.442695, %v5562_v35 }
 0xd85   :  { %5838 = vpow2.f32 %v4328_v26 }
 0xd86   :  { %5840 = vpow2.f32 %v4329_v19 }
 0xd87   :  { %5842 = vpow2.f32 %v4330_v21 }
 0xd88   :  { %5844 = vtanh.f32 %v5561_v38 }
 0xd8f   :  { %v5839_v59 = vpop.eup %5838 }
 0xd90   :  { %v5841_v1 = vpop.eup %5840  ;;  %v3627_v34 = vadd.f32 1.0, %v5839_v59 }
 0xd91   :  { %v3633_v43 = vadd.f32 1.0, %v5841_v1  ;;  %v5843_v49 = vpop.eup %5842 }
 0xd92   :  { %5846 = vrcp.f32 %v3627_v34  ;;  %v5845_v6 = vpop.eup %5844  ;;  %v3640_v39 = vadd.f32 1.0, %v5843_v49 }
 0xd93   :  { %5848 = vrcp.f32 %v3633_v43 }
 0xd94   :  { %5850 = vrcp.f32 %v3640_v39 }
 0xd9c   :  { %v5847_v36 = vpop.eup %5846 }
 0xd9d   :  { %v5849_v10 = vpop.eup %5848  ;;  %v3644_v13 = vmul.f32 %v5847_v36, %v5845_v6 }
 0xd9e   :  { %v3643_v55 = vmul.f32 %v5849_v10, %v7060_v61  ;;  %v5851_v32 = vpop.eup %5850 }
 0xda0   :  { %v7102_v51 = vadd.f32 %v3644_v13, %v3643_v55 }
 0xda2   :  { %5852 = vtanh.f32 %v7102_v51 }
 0xdac   :  { %v5853_v14 = vpop.eup %5852 }
 0xdad   :  { %v3647_v33 = vmul.f32 %v5853_v14, %v5851_v32  ;;  %v4173_v14 = vld [vmem:[%s7254_s7 + $0x18] sm:$0xff] }
 0xdaf   :  { %3717 = vmatmul.mubr.f32.vlgmr.msra.gmra.mrb[26].mxu0 %v3647_v33  ;;  %3788 = vmatmul.mubr.f32.vlgmr.msra.gmra.mrb[26].mxu1 %v3647_v33 }
 0xdb0   :  { %5356 = vmatpush1.bf16.msra.mxu0 %v6777_v56  ;;  %5388 = vmatpush1.bf16.msra.mxu1 %v6780_v45 }
 0xdb1   :  { %5358 = vmatprep.subr.bf16.mxu0 %v6785_v18  ;;  %5390 = vmatprep.subr.bf16.mxu1 %v6787_v60 }
 0xdb2   :  { %3890 = vmatprep.mubr.f32.mxu0 %v6050_v0  ;;  %3961 = vmatprep.mubr.f32.mxu1 %v6050_v0 }
 0xdb4   :  { %5360 = vmatpush1.bf16.msra.mxu0 %v6789_v57  ;;  %5392 = vmatpush1.bf16.msra.mxu1 %v6792_v30 }
 0xdb5   :  { %5362 = vmatprep.subr.bf16.mxu0 %v6797_v12  ;;  %5394 = vmatprep.subr.bf16.mxu1 %v6799_v44 }
 0xdb8   :  { %5364 = vmatpush1.bf16.msra.mxu0 %v6801_v54  ;;  %5396 = vmatpush1.bf16.msra.mxu1 %v6804_v24 }
 0xdb9   :  { %5366 = vmatprep.subr.bf16.mxu0 %v6809_v2  ;;  %5398 = vmatprep.subr.bf16.mxu1 %v6811_v53 }
 0xdbc   :  { %5368 = vmatpush1.bf16.msra.mxu0 %v6813_v7  ;;  %5400 = vmatpush1.bf16.msra.mxu1 %v6816_v50 }
 0xdbd   :  { %5370 = vmatprep.subr.bf16.mxu0 %v6820_v48  ;;  %5402 = vmatprep.subr.bf16.mxu1 %v6822_v9 }
 0xdc0   :  { %5372 = vmatpush1.bf16.msra.mxu0 %v6825_v37  ;;  %5404 = vmatpush1.bf16.msra.mxu1 %v6829_v62 }
 0xdc1   :  { %5374 = vmatprep.subr.bf16.mxu0 %v6831_v29  ;;  %5406 = vmatprep.subr.bf16.mxu1 %v6833_v47 }
 0xdc4   :  { %5376 = vmatpush1.bf16.msra.mxu0 %v6836_v11  ;;  %5408 = vmatpush1.bf16.msra.mxu1 %v6840_v41 }
 0xdc5   :  { %5378 = vmatprep.subr.bf16.mxu0 %v6842_v4  ;;  %5410 = vmatprep.subr.bf16.mxu1 %v6845_v52 }
 0xdc8   :  { %5380 = vmatpush1.bf16.msra.mxu0 %v6848_v42  ;;  %5412 = vmatpush1.bf16.msra.mxu1 %v6852_v8 }
 0xdc9   :  { %5382 = vmatprep.subr.bf16.mxu0 %v6857_v3  ;;  %5414 = vmatprep.subr.bf16.mxu1 %v6859_v27 }
 0xdcc   :  { %5384 = vmatpush1.bf16.msra.mxu0 %v6861_v16  ;;  %5416 = vmatpush1.bf16.msra.mxu1 %v6864_v25 }
 0xdcd   :  { %5418 = vmatprep.subr.bf16.mxu0 %v6773_v40  ;;  %5450 = vmatprep.subr.bf16.mxu1 %v6775_v46 }
 0xe82   :  { %v3718_v61 = vpop.f32.mrb[26].mxu0  ;;  %v3789_v23 = vpop.f32.mrb[26].mxu1 }
 0xe83   :  { %v5547_v63 = vadd.f32 %v3718_v61, %v6916_v17  ;;  %v3720_v28 = vpop.f32.mrb[27].mxu0  ;;  %v3791_v22 = vpop.f32.mrb[27].mxu1  ;;  %v5563_v21 = vadd.f32 %v3789_v23, %v6931_v5  ;;  %v4174_v61 = vld [vmem:[%s7254_s7 + $0x20] sm:$0xff]  ;;  %v4175_v23 = vld [vmem:[%s7254_s7 + $0x28] sm:$0xff] }
 0xe84   :  { %v5548_v20 = vadd.f32 %v3720_v28, %v6920_v58  ;;  %v5564_v19 = vadd.f32 %v3791_v22, %v6926_v15  ;;  %v4176_v28 = vld [vmem:[%s7254_s7 + $0x30] sm:$0xff]  ;;  %v4177_v22 = vld [vmem:[%s7254_s7 + $0x38] sm:$0xff] }
 0xe85   :  { %v4331_v31 = vmul.f32 -1.442695, %v5547_v63  ;;  %v5488_v63 = vpack.c.bf16 %v4175_v23, %v4174_v61 }
 0xe86   :  { %v4332_v26 = vmul.f32 -1.442695, %v5548_v20  ;;  %v4333_v35 = vmul.f32 -1.442695, %v5564_v19  ;;  %v5491_v20 = vpack.c.bf16 %v4177_v22, %v4176_v28 }
 0xe87   :  { %5854 = vpow2.f32 %v4331_v31  ;;  %v4178_v31 = vld [vmem:[%s7254_s7 + $0x40] sm:$0xff] }
 0xe88   :  { %5856 = vpow2.f32 %v4332_v26  ;;  %v4179_v26 = vld [vmem:[%s7254_s7 + $0x48] sm:$0xff] }
 0xe89   :  { %5858 = vpow2.f32 %v4333_v35  ;;  %v5494_v19 = vpack.c.bf16 %v4179_v26, %v4178_v31  ;;  %v4180_v35 = vld [vmem:[%s7254_s7 + $0x50] sm:$0xff] }
 0xe8a   :  { %5860 = vtanh.f32 %v5563_v21  ;;  %v4181_v21 = vld [vmem:[%s7254_s7 + $0x58] sm:$0xff] }
 0xe91   :  { %v5855_v40 = vpop.eup %5854 }
 0xe92   :  { %v5857_v38 = vpop.eup %5856  ;;  %v3801_v46 = vadd.f32 1.0, %v5855_v40  ;;  %v4182_v40 = vld [vmem:[%s7254_s7 + $0x60] sm:$0xff] }
 0xe93   :  { %v3807_v59 = vadd.f32 1.0, %v5857_v38  ;;  %v5859_v1 = vpop.eup %5858  ;;  %v5497_v38 = vpack.c.bf16 %v4181_v21, %v4180_v35 }
 0xe94   :  { %5862 = vrcp.f32 %v3801_v46  ;;  %v5861_v34 = vpop.eup %5860  ;;  %v3814_v36 = vadd.f32 1.0, %v5859_v1  ;;  %v4183_v46 = vld [vmem:[%s7254_s7 + $0x68] sm:$0xff]  ;;  %v4184_v1 = vld [vmem:[%s7254_s7 + $0x70] sm:$0xff] }
 0xe95   :  { %5864 = vrcp.f32 %v3807_v59  ;;  %v5500_v59 = vpack.c.bf16 %v4183_v46, %v4182_v40 }
 0xe96   :  { %5866 = vrcp.f32 %v3814_v36 }
 0xe9e   :  { %v5863_v43 = vpop.eup %5862 }
 0xe9f   :  { %v5865_v49 = vpop.eup %5864  ;;  %v3818_v6 = vmul.f32 %v5863_v43, %v5861_v34  ;;  %v4185_v34 = vld [vmem:[%s7254_s7 + $0x78] sm:$0xff] }
 0xea0   :  { %v3817_v10 = vmul.f32 %v5865_v49, %v7102_v51  ;;  %v5867_v39 = vpop.eup %5866  ;;  %v4172_v51 = vld [vmem:[%s7254_s7 + $0x10] sm:$0xff]  ;;  %v5503_v43 = vpack.c.bf16 %v4185_v34, %v4184_v1 }
 0xea1   :  { %v5485_v33 = vpack.c.bf16 %v4173_v14, %v4172_v51 }
 0xea2   :  { %v7144_v13 = vadd.f32 %v3818_v6, %v3817_v10 }
 0xea4   :  { %5868 = vtanh.f32 %v7144_v13 }
 0xeae   :  { %v5869_v55 = vpop.eup %5868 }
 0xeaf   :  { %v3821_v32 = vmul.f32 %v5869_v55, %v5867_v39 }
 0xeb1   :  { %3891 = vmatmul.mubr.f32.vlgmr.msra.gmra.mrb[28].mxu0 %v3821_v32  ;;  %3962 = vmatmul.mubr.f32.vlgmr.msra.gmra.mrb[28].mxu1 %v3821_v32 }
 0xeb2   :  { %5420 = vmatpush1.bf16.msra.mxu0 %v6777_v56  ;;  %5452 = vmatpush1.bf16.msra.mxu1 %v6780_v45 }
 0xeb3   :  { %5422 = vmatprep.subr.bf16.mxu0 %v6785_v18  ;;  %5454 = vmatprep.subr.bf16.mxu1 %v6787_v60 }
 0xeb4   :  { %4064 = vmatprep.mubr.f32.mxu0 %v6050_v0  ;;  %4135 = vmatprep.mubr.f32.mxu1 %v6050_v0 }
 0xeb6   :  { %5424 = vmatpush1.bf16.msra.mxu0 %v6789_v57  ;;  %5456 = vmatpush1.bf16.msra.mxu1 %v6792_v30 }
 0xeb7   :  { %5426 = vmatprep.subr.bf16.mxu0 %v6797_v12  ;;  %5458 = vmatprep.subr.bf16.mxu1 %v6799_v44 }
 0xeba   :  { %5428 = vmatpush1.bf16.msra.mxu0 %v6801_v54  ;;  %5460 = vmatpush1.bf16.msra.mxu1 %v6804_v24 }
 0xebb   :  { %5430 = vmatprep.subr.bf16.mxu0 %v6809_v2  ;;  %5462 = vmatprep.subr.bf16.mxu1 %v6811_v53 }
 0xebe   :  { %5432 = vmatpush1.bf16.msra.mxu0 %v6813_v7  ;;  %5464 = vmatpush1.bf16.msra.mxu1 %v6816_v50 }
 0xebf   :  { %5434 = vmatprep.subr.bf16.mxu0 %v6820_v48  ;;  %5466 = vmatprep.subr.bf16.mxu1 %v6822_v9 }
 0xec2   :  { %5436 = vmatpush1.bf16.msra.mxu0 %v6825_v37  ;;  %5468 = vmatpush1.bf16.msra.mxu1 %v6829_v62 }
 0xec3   :  { %5438 = vmatprep.subr.bf16.mxu0 %v6831_v29  ;;  %5470 = vmatprep.subr.bf16.mxu1 %v6833_v47 }
 0xec6   :  { %5440 = vmatpush1.bf16.msra.mxu0 %v6836_v11  ;;  %5472 = vmatpush1.bf16.msra.mxu1 %v6840_v41 }
 0xec7   :  { %5442 = vmatprep.subr.bf16.mxu0 %v6842_v4  ;;  %5474 = vmatprep.subr.bf16.mxu1 %v6845_v52 }
 0xeca   :  { %5444 = vmatpush1.bf16.msra.mxu0 %v6848_v42  ;;  %5476 = vmatpush1.bf16.msra.mxu1 %v6852_v8 }
 0xecb   :  { %5446 = vmatprep.subr.bf16.mxu0 %v6857_v3  ;;  %5478 = vmatprep.subr.bf16.mxu1 %v6859_v27  ;;  %v4170_v3 = vld [vmem:[%s7254_s7] sm:$0xff]  ;;  %v4171_v27 = vld [vmem:[%s7254_s7 + $0x8] sm:$0xff] }
 0xece   :  { %5448 = vmatpush1.bf16.msra.mxu0 %v6861_v16  ;;  %5480 = vmatpush1.bf16.msra.mxu1 %v6864_v25  ;;  %v5482_v16 = vpack.c.bf16 %v4171_v27, %v4170_v3  ;;  %v6051_v25 = vmov 0.0|0.0  }
 0xecf   :  { %5481 = vmatprep.subr.bf16.mxu0 %v6051_v25 }
 0xf84   :  { %v3892_v56 = vpop.f32.mrb[28].mxu0  ;;  %v3963_v45 = vpop.f32.mrb[28].mxu1 }
 0xf85   :  { %v5549_v18 = vadd.f32 %v3892_v56, %v6916_v17  ;;  %v3894_v60 = vpop.f32.mrb[29].mxu0  ;;  %v3965_v57 = vpop.f32.mrb[29].mxu1  ;;  %v5565_v2 = vadd.f32 %v3963_v45, %v6931_v5 }
 0xf86   :  { %v5550_v30 = vadd.f32 %v3894_v60, %v6920_v58  ;;  %v5566_v54 = vadd.f32 %v3965_v57, %v6926_v15 }
 0xf87   :  { %v4334_v12 = vmul.f32 -1.442695, %v5549_v18 }
 0xf88   :  { %v4335_v44 = vmul.f32 -1.442695, %v5550_v30  ;;  %v4336_v24 = vmul.f32 -1.442695, %v5566_v54 }
 0xf89   :  { %5870 = vpow2.f32 %v4334_v12 }
 0xf8a   :  { %5872 = vpow2.f32 %v4335_v44 }
 0xf8b   :  { %5874 = vpow2.f32 %v4336_v24 }
 0xf8c   :  { %5876 = vtanh.f32 %v5565_v2 }
 0xf93   :  { %v5871_v53 = vpop.eup %5870 }
 0xf94   :  { %v5873_v7 = vpop.eup %5872  ;;  %v3975_v50 = vadd.f32 1.0, %v5871_v53 }
 0xf95   :  { %v3981_v48 = vadd.f32 1.0, %v5873_v7  ;;  %v5875_v9 = vpop.eup %5874 }
 0xf96   :  { %5878 = vrcp.f32 %v3975_v50  ;;  %v5877_v37 = vpop.eup %5876  ;;  %v3988_v11 = vadd.f32 1.0, %v5875_v9  ;;  %v4340_v50 = vld [vmem:[%s7255_s8] ss:$0 sm:$0xff] }
 0xf97   :  { %5880 = vrcp.f32 %v3981_v48 }
 0xf98   :  { %5882 = vrcp.f32 %v3988_v11 }
 0xfa0   :  { %v5879_v62 = vpop.eup %5878 }
 0xfa1   :  { %v5881_v29 = vpop.eup %5880  ;;  %v3992_v47 = vmul.f32 %v5879_v62, %v5877_v37 }
 0xfa2   :  { %v3991_v41 = vmul.f32 %v5881_v29, %v7144_v13  ;;  %v5883_v52 = vpop.eup %5882 }
 0xfa4   :  { %v7184_v4 = vadd.f32 %v3992_v47, %v3991_v41 }
 0xfa6   :  { %5884 = vtanh.f32 %v7184_v4 }
 0xfb0   :  { %v5885_v42 = vpop.eup %5884 }
 0xfb1   :  { %v3995_v8 = vmul.f32 %v5885_v42, %v5883_v52 }
 0xfb3   :  { %4065 = vmatmul.mubr.f32.vlgmr.msra.gmra.mrb[30].mxu0 %v3995_v8  ;;  %4136 = vmatmul.mubr.f32.vlgmr.msra.gmra.mrb[30].mxu1 %v3995_v8 }
 0xfb4   :  { %5483 = vmatpush3.bf16.msra.mxu0 %v5482_v16  ;;  %4390 = vmatprep.mubr.msk.f32.mxu0 %vm6052_vm2, %v6050_v0 }
 0xfb5   :  { %5484 = vmatprep.subr.bf16.mxu0 %v6051_v25 }
 0xfb8   :  { %5486 = vmatpush3.bf16.msra.mxu0 %v5485_v33 }
 0xfb9   :  { %5487 = vmatprep.subr.bf16.mxu0 %v6051_v25 }
 0xfbc   :  { %5489 = vmatpush3.bf16.msra.mxu0 %v5488_v63 }
 0xfbd   :  { %5490 = vmatprep.subr.bf16.mxu0 %v6051_v25 }
 0xfc0   :  { %5492 = vmatpush3.bf16.msra.mxu0 %v5491_v20 }
 0xfc1   :  { %5493 = vmatprep.subr.bf16.mxu0 %v6051_v25 }
 0xfc4   :  { %5495 = vmatpush3.bf16.msra.mxu0 %v5494_v19 }
 0xfc5   :  { %5496 = vmatprep.subr.bf16.mxu0 %v6051_v25 }
 0xfc8   :  { %5498 = vmatpush3.bf16.msra.mxu0 %v5497_v38 }
 0xfc9   :  { %5499 = vmatprep.subr.bf16.mxu0 %v6051_v25 }
 0xfcc   :  { %5501 = vmatpush3.bf16.msra.mxu0 %v5500_v59 }
 0xfcd   :  { %5502 = vmatprep.subr.bf16.mxu0 %v6051_v25 }
 0xfd0   :  { %5504 = vmatpush3.bf16.msra.mxu0 %v5503_v43 }
0x1086   :  { %v4066_v49 = vpop.f32.mrb[30].mxu0  ;;  %v4137_v6 = vpop.f32.mrb[30].mxu1 }
0x1087   :  { %v5551_v36 = vadd.f32 %v4066_v49, %v6916_v17  ;;  %v4068_v0 = vpop.f32.mrb[31].mxu0  ;;  %v4139_v10 = vpop.f32.mrb[31].mxu1  ;;  %v5567_v45 = vadd.f32 %v4137_v6, %v6931_v5 }
0x1088   :  { %v5552_v13 = vadd.f32 %v4068_v0, %v6920_v58  ;;  %v5568_v32 = vadd.f32 %v4139_v10, %v6926_v15 }
0x1089   :  { %v4337_v39 = vmul.f32 -1.442695, %v5551_v36 }
0x108a   :  { %v4338_v55 = vmul.f32 -1.442695, %v5552_v13  ;;  %v4339_v56 = vmul.f32 -1.442695, %v5568_v32 }
0x108b   :  { %5886 = vpow2.f32 %v4337_v39 }
0x108c   :  { %5888 = vpow2.f32 %v4338_v55 }
0x108d   :  { %5890 = vpow2.f32 %v4339_v56 }
0x108e   :  { %5892 = vtanh.f32 %v5567_v45 }
0x1095   :  { %v5887_v18 = vpop.eup %5886 }
0x1096   :  { %v5889_v60 = vpop.eup %5888  ;;  %v4149_v57 = vadd.f32 1.0, %v5887_v18 }
0x1097   :  { %v4155_v30 = vadd.f32 1.0, %v5889_v60  ;;  %v5891_v17 = vpop.eup %5890 }
0x1098   :  { %5894 = vrcp.f32 %v4149_v57  ;;  %v5893_v12 = vpop.eup %5892  ;;  %v4162_v24 = vadd.f32 1.0, %v5891_v17 }
0x1099   :  { %5896 = vrcp.f32 %v4155_v30 }
0x109a   :  { %5898 = vrcp.f32 %v4162_v24 }
0x10a2   :  { %v5895_v58 = vpop.eup %5894 }
0x10a3   :  { %v5897_v44 = vpop.eup %5896  ;;  %v4166_v54 = vmul.f32 %v5895_v58, %v5893_v12 }
0x10a4   :  { %v4165_v2 = vmul.f32 %v5897_v44, %v7184_v4  ;;  %v5899_v5 = vpop.eup %5898 }
0x10a6   :  { %v4167_v15 = vadd.f32 %v4166_v54, %v4165_v2 }
0x10a8   :  { %5900 = vtanh.f32 %v4167_v15 }
0x10b2   :  { %v5901_v53 = vpop.eup %5900 }
0x10b3   :  { %v4169_v7 = vmul.f32 %v5901_v53, %v5899_v5 }
0x10b5   :  { %4391 = vmatmul.mubr.f32.vlgmr.msra.gmra.mrb[32].mxu0 %v4169_v7 }
0x1188   :  { %v4259_v48 = vpop.f32.mrb[32].mxu0 }
0x1189   :  { %v4260_v9 = vadd.f32 %v4340_v50, %v4259_v48  ;;  %v4392_v37 = vpop.f32.mrb[33].mxu0 }
0x118b   :  { %4263 = vst [vmem:[%s7256_s9] sm:$0xff] %v4260_v9 }
0x118c   :  { %4268 = vsyncpa [#allocation5], 1 }
0x118d   :  { %4269 = vsyncpa [#allocation7], 1 }
0x118e   :  { %4270 = vsyncpa [#allocation10], 1 }
0x118f   :  { %4271 = vsyncpa [#allocation13], 1 }

</bundles_post_ra>
